<compile_context>
chip_gen: v7x
topology: tpu7x:2x2x1
jax: 0.10.0
libtpu: 0.0.40
codegen_flags: <defaults>
</compile_context>

<pallas_src>
import functools

import jax
import jax.numpy as jnp
from jax import lax
from jax.experimental import pallas as pl
from jax.experimental.pallas import tpu as pltpu


def _round_up(x, m):
    return ((x + m - 1) // m) * m


# ---------------------------------------------------------------------------
# Pallas kernel: one grid step == one block of Tb LSTM timesteps for one batch block.
# ---------------------------------------------------------------------------
def lstm_classifier_kernel(maxlen_ref,   # SMEM (num_batch_blocks,) int32  per-block max length
                           emb_ref,      # (Tb, TB, Ep) bf16  embeddings (+ constant-1 bias column)
                           len_ref,      # (TB, Hp) int32     sequence lengths, lane-broadcast
                           w_ih_ref,     # (Ep, 4*Hp) bf16    input->gates (bias folded in row E)
                           w_hh_ref,     # (Hp, 4*Hp) bf16    hidden->gates (pre-transposed)
                           w_out_ref,    # (Hp, Cp) bf16      output Linear (pre-transposed)
                           b_out_ref,    # (1, Cp) f32        output bias (-1e30 in padded lanes)
                           out_ref,      # (TB, Cp) f32       log-probabilities
                           h_sc,         # VMEM (TB, Hp) f32  hidden state carry
                           c_sc,         # VMEM (TB, Hp) f32  cell state carry
                           *, hidden, time_block, batch_block):
    Hp = hidden
    Tb = time_block
    TB = batch_block
    TBh = TB // 2                      # TB is always a multiple of 16
    b_blk = pl.program_id(0)
    t_blk = pl.program_id(1)

    @pl.when(t_blk == 0)
    def _init():
        h_sc[...] = jnp.zeros_like(h_sc)
        c_sc[...] = jnp.zeros_like(c_sc)

    # Skip time blocks that are entirely beyond every sequence in this batch block.
    @pl.when(t_blk * Tb < maxlen_ref[b_blk])
    def _recurrence():
        w_ih = w_ih_ref[...]           # (Ep, 4Hp) bf16
        w_hh = w_hh_ref[...]           # (Hp, 4Hp) bf16

        # Hoisted: remaining valid steps for this time block (one compare per step below).
        rem = len_ref[...] - t_blk * Tb          # (TB, Hp) int32
        rem0 = rem[:TBh]
        rem1 = rem[TBh:]

        def sig(x):                               # sigmoid via tanh: 1 EUP op + VPU fma
            return 0.5 * jnp.tanh(0.5 * x) + 0.5

        def cell(x_t, h, c, rem_c, i):
            # Input projection (independent of h -> overlaps the recurrent chain);
            # gate bias arrives via the constant-1 column of x_t / row E of W_ih.
            xg = jnp.dot(x_t, w_ih, preferred_element_type=jnp.float32)
            gates = xg + jnp.dot(h.astype(w_hh.dtype), w_hh,
                                 preferred_element_type=jnp.float32)
            # PyTorch LSTM gate ordering: i, f, g, o.  Hp is a multiple of 128, so every
            # gate slice is lane-aligned (pure VPU select/mul, no XLU realignment).
            i_g = sig(gates[:, 0 * Hp:1 * Hp])
            f_g = sig(gates[:, 1 * Hp:2 * Hp])
            g_g = jnp.tanh(gates[:, 2 * Hp:3 * Hp])
            o_g = sig(gates[:, 3 * Hp:4 * Hp])
            c_new = f_g * c + i_g * g_g
            h_new = o_g * jnp.tanh(c_new)
            # pack_padded_sequence semantics: only update state while t < length[b];
            # the carried h therefore ends at each sequence's last valid step.
            valid = i < rem_c
            return jnp.where(valid, h_new, h), jnp.where(valid, c_new, c)

        def step(i, carry):
            # Two independent batch halves -> MXU (matmul) of one half overlaps the
            # EUP/VPU gate math of the other within a timestep.
            h0, c0, h1, c1 = carry
            x_t = emb_ref[i]                      # (TB, Ep) bf16
            h0n, c0n = cell(x_t[:TBh], h0, c0, rem0, i)
            h1n, c1n = cell(x_t[TBh:], h1, c1, rem1, i)
            return (h0n, c0n, h1n, c1n)

        init = (h_sc[:TBh], c_sc[:TBh], h_sc[TBh:], c_sc[TBh:])
        h0, c0, h1, c1 = lax.fori_loop(0, Tb, step, init, unroll=True)
        h_sc[:TBh] = h0
        c_sc[:TBh] = c0
        h_sc[TBh:] = h1
        c_sc[TBh:] = c1

    @pl.when(t_blk == pl.num_programs(1) - 1)
    def _output():
        h = h_sc[...]
        logits = (jnp.dot(h.astype(w_out_ref.dtype), w_out_ref[...],
                          preferred_element_type=jnp.float32)
                  + b_out_ref[...])               # (TB, Cp)
        m = jnp.max(logits, axis=-1, keepdims=True)
        shifted = logits - m
        lse = jnp.log(jnp.sum(jnp.exp(shifted), axis=-1, keepdims=True))
        out_ref[...] = shifted - lse              # log_softmax (padded class lanes ~ -1e30)


# ---------------------------------------------------------------------------
# Wrapper: embedding gather, padding/layout glue, and the pallas_call.
# ---------------------------------------------------------------------------
def _gate_align_cols(w_t, H, Hp):
    """(K, 4H) -> (K, 4Hp): each gate's H columns placed at its lane-aligned slot."""
    K = w_t.shape[0]
    out = jnp.zeros((K, 4 * Hp), w_t.dtype)
    for k in range(4):
        out = out.at[:, k * Hp:k * Hp + H].set(w_t[:, k * H:(k + 1) * H])
    return out


def lstm_classifier_forward(one_hots, lengths, params, *, time_block=16, batch_block_cap=256):
    """one_hots: (B, T) int32 token ids; lengths: (B,) int32 (sorted desc in PyTorch)."""
    emb_table = params["embedding"]               # (V, E)
    w_ih = params["w_ih"]                         # (4H, E)
    w_hh = params["w_hh"]                         # (4H, H)
    b_ih = params["b_ih"]                         # (4H,)
    b_hh = params["b_hh"]                         # (4H,)
    w_out = params["w_out"]                       # (C, H)
    b_out = params["b_out"]                       # (C,)

    B, T = one_hots.shape
    E = emb_table.shape[1]
    H = w_hh.shape[1]
    C = w_out.shape[0]
    f32 = jnp.float32
    bf16 = jnp.bfloat16

    # Padded dims: lane-align gates / classes (128), +1 input column for the folded
    # gate bias, batch block a multiple of 16 (bf16 sublane packing + even halves).
    Hp = _round_up(H, 128)
    Cp = _round_up(C, 128)
    Ep = _round_up(E + 1, 128)
    TB = min(_round_up(B, 16), _round_up(batch_block_cap, 16))
    Bp = _round_up(B, TB)
    Tb = min(time_block, _round_up(T, 8))
    Tp = _round_up(T, Tb)
    G = 4 * Hp

    # Embedding lookup + dropout (identity, eval mode) + permute(1,0,2) -> (T, B, E),
    # padded/cast to the bf16 kernel layout.  Column E carries the constant 1 that
    # feeds the folded gate bias (row E of W_ih).
    # TODO(synk): training-mode dropout (p=0.5) not modeled; forward is eval-mode.
    embed = jnp.transpose(emb_table[one_hots], (1, 0, 2))                  # (T, B, E)
    embed_p = jnp.zeros((Tp, Bp, Ep), bf16)
    embed_p = embed_p.at[:T, :B, :E].set(embed.astype(bf16))
    embed_p = embed_p.at[:, :, E].set(jnp.asarray(1.0, bf16))

    # Gate-aligned, lane-padded parameters, pre-transposed for (rows, K) x (K, N) matmuls.
    w_ih_g = _gate_align_cols(jnp.asarray(w_ih.T, f32), H, Hp)             # (E, G)
    b_g = _gate_align_cols(jnp.asarray((b_ih + b_hh)[None, :], f32), H, Hp)  # (1, G)
    w_ih_p = (jnp.zeros((Ep, G), f32)
              .at[:E, :].set(w_ih_g)
              .at[E, :].set(b_g[0])).astype(bf16)                          # (Ep, G)
    w_hh_p = jnp.zeros((Hp, G), f32).at[:H, :].set(
        _gate_align_cols(jnp.asarray(w_hh.T, f32), H, Hp)).astype(bf16)    # (Hp, G)
    w_out_p = jnp.zeros((Hp, Cp), f32).at[:H, :C].set(
        jnp.asarray(w_out.T, f32)).astype(bf16)                            # (Hp, Cp)
    # Padded class lanes get a huge negative bias so log_softmax ignores them.
    b_out_p = jnp.full((1, Cp), -1e30, f32).at[0, :C].set(jnp.asarray(b_out, f32))

    # Lane-broadcast lengths; padded batch rows get length 0 so they never update.
    len_p = jnp.zeros((Bp,), jnp.int32).at[:B].set(jnp.asarray(lengths, jnp.int32))
    len_b = jnp.broadcast_to(len_p[:, None], (Bp, Hp)).astype(jnp.int32)
    # Per-batch-block max length (scalar prefetch) -> skip fully-padded time blocks.
    maxlen_blk = jnp.max(len_p.reshape(Bp // TB, TB), axis=1).astype(jnp.int32)

    kernel = functools.partial(lstm_classifier_kernel,
                               hidden=Hp, time_block=Tb, batch_block=TB)

    grid_spec = pltpu.PrefetchScalarGridSpec(
        num_scalar_prefetch=1,
        grid=(Bp // TB, Tp // Tb),
        in_specs=[
            pl.BlockSpec((Tb, TB, Ep), lambda b, t, ml: (t, b, 0)),   # embeddings (bf16)
            pl.BlockSpec((TB, Hp), lambda b, t, ml: (b, 0)),          # lengths (lane-broadcast)
            pl.BlockSpec((Ep, G), lambda b, t, ml: (0, 0)),           # W_ih^T (+ bias row, bf16)
            pl.BlockSpec((Hp, G), lambda b, t, ml: (0, 0)),           # W_hh^T (bf16)
            pl.BlockSpec((Hp, Cp), lambda b, t, ml: (0, 0)),          # W_out^T (bf16)
            pl.BlockSpec((1, Cp), lambda b, t, ml: (0, 0)),           # b_out (padded lanes -1e30)
        ],
        out_specs=pl.BlockSpec((TB, Cp), lambda b, t, ml: (b, 0)),
        scratch_shapes=[
            pltpu.VMEM((TB, Hp), f32),                                # h carry
            pltpu.VMEM((TB, Hp), f32),                                # c carry
        ],
    )

    out_p = pl.pallas_call(
        kernel,
        out_shape=jax.ShapeDtypeStruct((Bp, Cp), f32),
        grid_spec=grid_spec,
        compiler_params=pltpu.CompilerParams(
            dimension_semantics=("parallel", "arbitrary"),            # batch parallel, time serial
            vmem_limit_bytes=64 * 1024 * 1024),
    )(maxlen_blk, embed_p, len_b, w_ih_p, w_hh_p, w_out_p, b_out_p)

    return out_p[:B, :C]


# ---------------------------------------------------------------------------
# Pure-JAX reference (same math, f32) for a correctness sanity check.
# ---------------------------------------------------------------------------
def reference_forward(one_hots, lengths, params):
    emb_table = params["embedding"]
    w_ih, w_hh = params["w_ih"], params["w_hh"]
    b = params["b_ih"] + params["b_hh"]
    w_out, b_out = params["w_out"], params["b_out"]
    H = w_hh.shape[1]

    embed = jnp.transpose(emb_table[one_hots], (1, 0, 2)).astype(jnp.float32)
    T, B, _ = embed.shape
    h0 = jnp.zeros((B, H), jnp.float32)
    c0 = jnp.zeros((B, H), jnp.float32)

    def step(carry, inp):
        h, c = carry
        x_t, t = inp
        gates = x_t @ w_ih.T + h @ w_hh.T + b
        i_g = jax.nn.sigmoid(gates[:, :H])
        f_g = jax.nn.sigmoid(gates[:, H:2 * H])
        g_g = jnp.tanh(gates[:, 2 * H:3 * H])
        o_g = jax.nn.sigmoid(gates[:, 3 * H:])
        c_new = f_g * c + i_g * g_g
        h_new = o_g * jnp.tanh(c_new)
        valid = (t < lengths)[:, None]
        return (jnp.where(valid, h_new, h), jnp.where(valid, c_new, c)), None

    (h, _), _ = lax.scan(step, (h0, c0), (embed, jnp.arange(T)))
    logits = h @ w_out.T + b_out
    return jax.nn.log_softmax(logits, axis=-1)


# ---------------------------------------------------------------------------
# Deterministic synthetic parameters + example inputs.
# ---------------------------------------------------------------------------
def orthogonal(key, shape):
    a = jax.random.normal(key, shape, jnp.float32)
    q, _ = jnp.linalg.qr(a)
    return q[: shape[0], : shape[1]]


def make_params(key, vocab, embed_dims, rnn_units, num_classes):
    ks = jax.random.split(key, 7)
    H = rnn_units
    return {
        "embedding": jax.random.normal(ks[0], (vocab, embed_dims), jnp.float32) * 0.1,
        "w_ih": orthogonal(ks[1], (4 * H, embed_dims)),
        "w_hh": orthogonal(ks[2], (4 * H, H)),
        "b_ih": jax.random.uniform(ks[3], (4 * H,), jnp.float32, -0.1, 0.1),
        "b_hh": jax.random.uniform(ks[4], (4 * H,), jnp.float32, -0.1, 0.1),
        "w_out": jax.random.normal(ks[5], (num_classes, H), jnp.float32) * 0.1,
        "b_out": jax.random.uniform(ks[6], (num_classes,), jnp.float32, -0.1, 0.1),
    }


if __name__ == "__main__":
    key = jax.random.PRNGKey(0)
    B, T = 16, 8                      # B=16 -> TB=16: exercises the two-half split path
    vocab, embed_dims, rnn_units, num_classes = 50, 32, 32, 5

    k_params, k_tok = jax.random.split(key)
    params = make_params(k_params, vocab, embed_dims, rnn_units, num_classes)

    one_hots = jax.random.randint(k_tok, (B, T), 0, vocab, jnp.int32)
    # Sorted descending (pack_padded_sequence enforce_sorted semantics), ragged masking.
    lengths = jnp.array([8, 8, 7, 7, 6, 6, 5, 5, 4, 4, 3, 3, 2, 2, 1, 1], jnp.int32)

    out = lstm_classifier_forward(one_hots, lengths, params)
    out = jax.block_until_ready(out)

    ref = reference_forward(one_hots, lengths, params)
    assert out.shape == (B, num_classes)
    # bf16 MXU operands (x, W_ih, W_hh, W_out) with f32 accumulation vs the all-f32
    # reference -> slightly looser tolerance.
    assert jnp.allclose(out, ref, atol=3e-2, rtol=3e-2), (out, ref)

    print("KERNEL_OK")
</pallas_src>

<mosaic_0001>
module attributes {stable_mosaic.version = 11 : i64} {
  func.func @lstm_classifier_kernel(%arg0: i32, %arg1: i32, %arg2: memref<1xi32, #tpu.memory_space<smem>>, %arg3: memref<8x16x128xbf16, #tpu.memory_space<vmem>>, %arg4: memref<16x128xi32, #tpu.memory_space<vmem>>, %arg5: memref<128x512xbf16, #tpu.memory_space<vmem>>, %arg6: memref<128x512xbf16, #tpu.memory_space<vmem>>, %arg7: memref<128x128xbf16, #tpu.memory_space<vmem>>, %arg8: memref<1x128xf32, #tpu.memory_space<vmem>>, %arg9: memref<16x128xf32, #tpu.memory_space<vmem>>, %arg10: memref<16x128xf32, #tpu.memory_space<vmem>>, %arg11: memref<16x128xf32, #tpu.memory_space<vmem>>) attributes {dimension_semantics = [#tpu.dimension_semantics<parallel>, #tpu.dimension_semantics<arbitrary>], iteration_bounds = array<i64: 1, 1>, scalar_prefetch = 1 : i64, scratch_operands = 2 : i64, tpu.core_type = #tpu.core_type<tc>, window_params = [{transform_indices = @transform_0, window_bounds = array<i64: 8, 16, 128>}, {transform_indices = @transform_1, window_bounds = array<i64: 16, 128>}, {pipeline_mode = #tpu.pipeline_mode<synchronous>, transform_indices = @transform_2, window_bounds = array<i64: 128, 512>}, {pipeline_mode = #tpu.pipeline_mode<synchronous>, transform_indices = @transform_3, window_bounds = array<i64: 128, 512>}, {pipeline_mode = #tpu.pipeline_mode<synchronous>, transform_indices = @transform_4, window_bounds = array<i64: 128, 128>}, {pipeline_mode = #tpu.pipeline_mode<synchronous>, transform_indices = @transform_5, window_bounds = array<i64: 1, 128>}, {transform_indices = @transform_6, window_bounds = array<i64: 16, 128>}]} {
    %c0_i32 = arith.constant 0 : i32
    %0 = arith.cmpi eq, %arg1, %c0_i32 : i32
    %1 = arith.extui %0 : i1 to i32
    %c0_i32_0 = arith.constant 0 : i32
    %2 = arith.cmpi ne, %1, %c0_i32_0 : i32
    scf.if %2 {
      %cst = arith.constant 0.000000e+00 : f32
      %12 = vector.broadcast %cst : f32 to vector<16x128xf32>
      %c0 = arith.constant 0 : index
      %c0_4 = arith.constant 0 : index
      %13 = vector.load %arg10[%c0, %c0_4] : memref<16x128xf32, #tpu.memory_space<vmem>>, vector<16x128xf32>
      tpu.vector_store %arg10[%c0, %c0_4], %12 {strides = array<i32>} : memref<16x128xf32, #tpu.memory_space<vmem>>, vector<16x128xf32>,
      %cst_5 = arith.constant 0.000000e+00 : f32
      %14 = vector.broadcast %cst_5 : f32 to vector<16x128xf32>
      %c0_6 = arith.constant 0 : index
      %c0_7 = arith.constant 0 : index
      %15 = vector.load %arg11[%c0_6, %c0_7] : memref<16x128xf32, #tpu.memory_space<vmem>>, vector<16x128xf32>
      tpu.vector_store %arg11[%c0_6, %c0_7], %14 {strides = array<i32>} : memref<16x128xf32, #tpu.memory_space<vmem>>, vector<16x128xf32>,
    } else {
    }
    %c8_i32 = arith.constant 8 : i32
    %3 = arith.muli %arg1, %c8_i32 : i32
    %4 = arith.index_cast %arg0 : i32 to index
    %5 = memref.load %arg2[%4] : memref<1xi32, #tpu.memory_space<smem>>
    %6 = arith.cmpi slt, %3, %5 : i32
    %7 = arith.extui %6 : i1 to i32
    %c0_i32_1 = arith.constant 0 : i32
    %8 = arith.cmpi ne, %7, %c0_i32_1 : i32
    scf.if %8 {
      %c0 = arith.constant 0 : index
      %c0_4 = arith.constant 0 : index
      %12 = vector.load %arg5[%c0, %c0_4] : memref<128x512xbf16, #tpu.memory_space<vmem>>, vector<128x512xbf16>
      %c0_5 = arith.constant 0 : index
      %c0_6 = arith.constant 0 : index
      %13 = vector.load %arg6[%c0_5, %c0_6] : memref<128x512xbf16, #tpu.memory_space<vmem>>, vector<128x512xbf16>
      %c0_7 = arith.constant 0 : index
      %c0_8 = arith.constant 0 : index
      %14 = vector.load %arg4[%c0_7, %c0_8] : memref<16x128xi32, #tpu.memory_space<vmem>>, vector<16x128xi32>
      %c8_i32_9 = arith.constant 8 : i32
      %15 = arith.muli %arg1, %c8_i32_9 : i32
      %16 = vector.broadcast %15 : i32 to vector<16x128xi32>
      %17 = arith.subi %14, %16 : vector<16x128xi32>
      %18 = vector.extract_strided_slice %17 {offsets = [0, 0], sizes = [8, 128], strides = [1, 1]} : vector<16x128xi32> to vector<8x128xi32>
      %19 = vector.extract_strided_slice %17 {offsets = [8, 0], sizes = [8, 128], strides = [1, 1]} : vector<16x128xi32> to vector<8x128xi32>
      %c0_10 = arith.constant 0 : index
      %c0_11 = arith.constant 0 : index
      %20 = vector.load %arg10[%c0_10, %c0_11] : memref<16x128xf32, #tpu.memory_space<vmem>>, vector<8x128xf32>
      %c0_12 = arith.constant 0 : index
      %c0_13 = arith.constant 0 : index
      %21 = vector.load %arg11[%c0_12, %c0_13] : memref<16x128xf32, #tpu.memory_space<vmem>>, vector<8x128xf32>
      %c8 = arith.constant 8 : index
      %c0_14 = arith.constant 0 : index
      %22 = vector.load %arg10[%c8, %c0_14] : memref<16x128xf32, #tpu.memory_space<vmem>>, vector<8x128xf32>
      %c8_15 = arith.constant 8 : index
      %c0_16 = arith.constant 0 : index
      %23 = vector.load %arg11[%c8_15, %c0_16] : memref<16x128xf32, #tpu.memory_space<vmem>>, vector<8x128xf32>
      %c0_i32_17 = arith.constant 0 : i32
      %24 = arith.index_cast %c0_i32_17 : i32 to index
      %c0_18 = arith.constant 0 : index
      %c0_19 = arith.constant 0 : index
      %25 = vector.load %arg3[%24, %c0_18, %c0_19] : memref<8x16x128xbf16, #tpu.memory_space<vmem>>, vector<1x16x128xbf16>
      %26 = vector.shape_cast %25 : vector<1x16x128xbf16> to vector<16x128xbf16>
      %27 = vector.extract_strided_slice %26 {offsets = [0, 0], sizes = [8, 128], strides = [1, 1]} : vector<16x128xbf16> to vector<8x128xbf16>
      %cst = arith.constant dense<0.000000e+00> : vector<8x512xf32>
      %28 = tpu.matmul %27, %12, %cst {dimension_numbers = #tpu.dot_dimension_numbers<[1], [0], [0], [1], [0, 0, 1, 1], [], []>} : vector<8x128xbf16>, vector<128x512xbf16>, vector<8x512xf32> -> vector<8x512xf32>
      %29 = arith.truncf %20 : vector<8x128xf32> to vector<8x128xbf16>
      %cst_20 = arith.constant dense<0.000000e+00> : vector<8x512xf32>
      %30 = tpu.matmul %29, %13, %cst_20 {dimension_numbers = #tpu.dot_dimension_numbers<[1], [0], [0], [1], [0, 0, 1, 1], [], []>} : vector<8x128xbf16>, vector<128x512xbf16>, vector<8x512xf32> -> vector<8x512xf32>
      %31 = arith.addf %28, %30 : vector<8x512xf32>
      %32 = vector.extract_strided_slice %31 {offsets = [0, 0], sizes = [8, 128], strides = [1, 1]} : vector<8x512xf32> to vector<8x128xf32>
      %cst_21 = arith.constant 5.000000e-01 : f32
      %33 = vector.broadcast %cst_21 : f32 to vector<8x128xf32>
      %34 = arith.mulf %33, %32 : vector<8x128xf32>
      %35 = math.tanh %34 : vector<8x128xf32>
      %cst_22 = arith.constant 5.000000e-01 : f32
      %36 = vector.broadcast %cst_22 : f32 to vector<8x128xf32>
      %37 = arith.mulf %36, %35 : vector<8x128xf32>
      %cst_23 = arith.constant 5.000000e-01 : f32
      %38 = vector.broadcast %cst_23 : f32 to vector<8x128xf32>
      %39 = arith.addf %37, %38 : vector<8x128xf32>
      %40 = vector.extract_strided_slice %31 {offsets = [0, 128], sizes = [8, 128], strides = [1, 1]} : vector<8x512xf32> to vector<8x128xf32>
      %cst_24 = arith.constant 5.000000e-01 : f32
      %41 = vector.broadcast %cst_24 : f32 to vector<8x128xf32>
      %42 = arith.mulf %41, %40 : vector<8x128xf32>
      %43 = math.tanh %42 : vector<8x128xf32>
      %cst_25 = arith.constant 5.000000e-01 : f32
      %44 = vector.broadcast %cst_25 : f32 to vector<8x128xf32>
      %45 = arith.mulf %44, %43 : vector<8x128xf32>
      %cst_26 = arith.constant 5.000000e-01 : f32
      %46 = vector.broadcast %cst_26 : f32 to vector<8x128xf32>
      %47 = arith.addf %45, %46 : vector<8x128xf32>
      %48 = vector.extract_strided_slice %31 {offsets = [0, 256], sizes = [8, 128], strides = [1, 1]} : vector<8x512xf32> to vector<8x128xf32>
      %49 = math.tanh %48 : vector<8x128xf32>
      %50 = vector.extract_strided_slice %31 {offsets = [0, 384], sizes = [8, 128], strides = [1, 1]} : vector<8x512xf32> to vector<8x128xf32>
      %cst_27 = arith.constant 5.000000e-01 : f32
      %51 = vector.broadcast %cst_27 : f32 to vector<8x128xf32>
      %52 = arith.mulf %51, %50 : vector<8x128xf32>
      %53 = math.tanh %52 : vector<8x128xf32>
      %cst_28 = arith.constant 5.000000e-01 : f32
      %54 = vector.broadcast %cst_28 : f32 to vector<8x128xf32>
      %55 = arith.mulf %54, %53 : vector<8x128xf32>
      %cst_29 = arith.constant 5.000000e-01 : f32
      %56 = vector.broadcast %cst_29 : f32 to vector<8x128xf32>
      %57 = arith.addf %55, %56 : vector<8x128xf32>
      %58 = arith.mulf %47, %21 : vector<8x128xf32>
      %59 = arith.mulf %39, %49 : vector<8x128xf32>
      %60 = arith.addf %58, %59 : vector<8x128xf32>
      %61 = math.tanh %60 : vector<8x128xf32>
      %62 = arith.mulf %57, %61 : vector<8x128xf32>
      %63 = vector.broadcast %c0_i32_17 : i32 to vector<8x128xi32>
      %64 = arith.cmpi slt, %63, %18 : vector<8x128xi32>
      %65 = arith.select %64, %62, %20 : vector<8x128xi1>, vector<8x128xf32>
      %66 = arith.select %64, %60, %21 : vector<8x128xi1>, vector<8x128xf32>
      %67 = vector.extract_strided_slice %26 {offsets = [8, 0], sizes = [8, 128], strides = [1, 1]} : vector<16x128xbf16> to vector<8x128xbf16>
      %cst_30 = arith.constant dense<0.000000e+00> : vector<8x512xf32>
      %68 = tpu.matmul %67, %12, %cst_30 {dimension_numbers = #tpu.dot_dimension_numbers<[1], [0], [0], [1], [0, 0, 1, 1], [], []>} : vector<8x128xbf16>, vector<128x512xbf16>, vector<8x512xf32> -> vector<8x512xf32>
      %69 = arith.truncf %22 : vector<8x128xf32> to vector<8x128xbf16>
      %cst_31 = arith.constant dense<0.000000e+00> : vector<8x512xf32>
      %70 = tpu.matmul %69, %13, %cst_31 {dimension_numbers = #tpu.dot_dimension_numbers<[1], [0], [0], [1], [0, 0, 1, 1], [], []>} : vector<8x128xbf16>, vector<128x512xbf16>, vector<8x512xf32> -> vector<8x512xf32>
      %71 = arith.addf %68, %70 : vector<8x512xf32>
      %72 = vector.extract_strided_slice %71 {offsets = [0, 0], sizes = [8, 128], strides = [1, 1]} : vector<8x512xf32> to vector<8x128xf32>
      %cst_32 = arith.constant 5.000000e-01 : f32
      %73 = vector.broadcast %cst_32 : f32 to vector<8x128xf32>
      %74 = arith.mulf %73, %72 : vector<8x128xf32>
      %75 = math.tanh %74 : vector<8x128xf32>
      %cst_33 = arith.constant 5.000000e-01 : f32
      %76 = vector.broadcast %cst_33 : f32 to vector<8x128xf32>
      %77 = arith.mulf %76, %75 : vector<8x128xf32>
      %cst_34 = arith.constant 5.000000e-01 : f32
      %78 = vector.broadcast %cst_34 : f32 to vector<8x128xf32>
      %79 = arith.addf %77, %78 : vector<8x128xf32>
      %80 = vector.extract_strided_slice %71 {offsets = [0, 128], sizes = [8, 128], strides = [1, 1]} : vector<8x512xf32> to vector<8x128xf32>
      %cst_35 = arith.constant 5.000000e-01 : f32
      %81 = vector.broadcast %cst_35 : f32 to vector<8x128xf32>
      %82 = arith.mulf %81, %80 : vector<8x128xf32>
      %83 = math.tanh %82 : vector<8x128xf32>
      %cst_36 = arith.constant 5.000000e-01 : f32
      %84 = vector.broadcast %cst_36 : f32 to vector<8x128xf32>
      %85 = arith.mulf %84, %83 : vector<8x128xf32>
      %cst_37 = arith.constant 5.000000e-01 : f32
      %86 = vector.broadcast %cst_37 : f32 to vector<8x128xf32>
      %87 = arith.addf %85, %86 : vector<8x128xf32>
      %88 = vector.extract_strided_slice %71 {offsets = [0, 256], sizes = [8, 128], strides = [1, 1]} : vector<8x512xf32> to vector<8x128xf32>
      %89 = math.tanh %88 : vector<8x128xf32>
      %90 = vector.extract_strided_slice %71 {offsets = [0, 384], sizes = [8, 128], strides = [1, 1]} : vector<8x512xf32> to vector<8x128xf32>
      %cst_38 = arith.constant 5.000000e-01 : f32
      %91 = vector.broadcast %cst_38 : f32 to vector<8x128xf32>
      %92 = arith.mulf %91, %90 : vector<8x128xf32>
      %93 = math.tanh %92 : vector<8x128xf32>
      %cst_39 = arith.constant 5.000000e-01 : f32
      %94 = vector.broadcast %cst_39 : f32 to vector<8x128xf32>
      %95 = arith.mulf %94, %93 : vector<8x128xf32>
      %cst_40 = arith.constant 5.000000e-01 : f32
      %96 = vector.broadcast %cst_40 : f32 to vector<8x128xf32>
      %97 = arith.addf %95, %96 : vector<8x128xf32>
      %98 = arith.mulf %87, %23 : vector<8x128xf32>
      %99 = arith.mulf %79, %89 : vector<8x128xf32>
      %100 = arith.addf %98, %99 : vector<8x128xf32>
      %101 = math.tanh %100 : vector<8x128xf32>
      %102 = arith.mulf %97, %101 : vector<8x128xf32>
      %103 = vector.broadcast %c0_i32_17 : i32 to vector<8x128xi32>
      %104 = arith.cmpi slt, %103, %19 : vector<8x128xi32>
      %105 = arith.select %104, %102, %22 : vector<8x128xi1>, vector<8x128xf32>
      %106 = arith.select %104, %100, %23 : vector<8x128xi1>, vector<8x128xf32>
      %c1_i32 = arith.constant 1 : i32
      %107 = arith.index_cast %c1_i32 : i32 to index
      %c0_41 = arith.constant 0 : index
      %c0_42 = arith.constant 0 : index
      %108 = vector.load %arg3[%107, %c0_41, %c0_42] : memref<8x16x128xbf16, #tpu.memory_space<vmem>>, vector<1x16x128xbf16>
      %109 = vector.shape_cast %108 : vector<1x16x128xbf16> to vector<16x128xbf16>
      %110 = vector.extract_strided_slice %109 {offsets = [0, 0], sizes = [8, 128], strides = [1, 1]} : vector<16x128xbf16> to vector<8x128xbf16>
      %cst_43 = arith.constant dense<0.000000e+00> : vector<8x512xf32>
      %111 = tpu.matmul %110, %12, %cst_43 {dimension_numbers = #tpu.dot_dimension_numbers<[1], [0], [0], [1], [0, 0, 1, 1], [], []>} : vector<8x128xbf16>, vector<128x512xbf16>, vector<8x512xf32> -> vector<8x512xf32>
      %112 = arith.truncf %65 : vector<8x128xf32> to vector<8x128xbf16>
      %cst_44 = arith.constant dense<0.000000e+00> : vector<8x512xf32>
      %113 = tpu.matmul %112, %13, %cst_44 {dimension_numbers = #tpu.dot_dimension_numbers<[1], [0], [0], [1], [0, 0, 1, 1], [], []>} : vector<8x128xbf16>, vector<128x512xbf16>, vector<8x512xf32> -> vector<8x512xf32>
      %114 = arith.addf %111, %113 : vector<8x512xf32>
      %115 = vector.extract_strided_slice %114 {offsets = [0, 0], sizes = [8, 128], strides = [1, 1]} : vector<8x512xf32> to vector<8x128xf32>
      %cst_45 = arith.constant 5.000000e-01 : f32
      %116 = vector.broadcast %cst_45 : f32 to vector<8x128xf32>
      %117 = arith.mulf %116, %115 : vector<8x128xf32>
      %118 = math.tanh %117 : vector<8x128xf32>
      %cst_46 = arith.constant 5.000000e-01 : f32
      %119 = vector.broadcast %cst_46 : f32 to vector<8x128xf32>
      %120 = arith.mulf %119, %118 : vector<8x128xf32>
      %cst_47 = arith.constant 5.000000e-01 : f32
      %121 = vector.broadcast %cst_47 : f32 to vector<8x128xf32>
      %122 = arith.addf %120, %121 : vector<8x128xf32>
      %123 = vector.extract_strided_slice %114 {offsets = [0, 128], sizes = [8, 128], strides = [1, 1]} : vector<8x512xf32> to vector<8x128xf32>
      %cst_48 = arith.constant 5.000000e-01 : f32
      %124 = vector.broadcast %cst_48 : f32 to vector<8x128xf32>
      %125 = arith.mulf %124, %123 : vector<8x128xf32>
      %126 = math.tanh %125 : vector<8x128xf32>
      %cst_49 = arith.constant 5.000000e-01 : f32
      %127 = vector.broadcast %cst_49 : f32 to vector<8x128xf32>
      %128 = arith.mulf %127, %126 : vector<8x128xf32>
      %cst_50 = arith.constant 5.000000e-01 : f32
      %129 = vector.broadcast %cst_50 : f32 to vector<8x128xf32>
      %130 = arith.addf %128, %129 : vector<8x128xf32>
      %131 = vector.extract_strided_slice %114 {offsets = [0, 256], sizes = [8, 128], strides = [1, 1]} : vector<8x512xf32> to vector<8x128xf32>
      %132 = math.tanh %131 : vector<8x128xf32>
      %133 = vector.extract_strided_slice %114 {offsets = [0, 384], sizes = [8, 128], strides = [1, 1]} : vector<8x512xf32> to vector<8x128xf32>
      %cst_51 = arith.constant 5.000000e-01 : f32
      %134 = vector.broadcast %cst_51 : f32 to vector<8x128xf32>
      %135 = arith.mulf %134, %133 : vector<8x128xf32>
      %136 = math.tanh %135 : vector<8x128xf32>
      %cst_52 = arith.constant 5.000000e-01 : f32
      %137 = vector.broadcast %cst_52 : f32 to vector<8x128xf32>
      %138 = arith.mulf %137, %136 : vector<8x128xf32>
      %cst_53 = arith.constant 5.000000e-01 : f32
      %139 = vector.broadcast %cst_53 : f32 to vector<8x128xf32>
      %140 = arith.addf %138, %139 : vector<8x128xf32>
      %141 = arith.mulf %130, %66 : vector<8x128xf32>
      %142 = arith.mulf %122, %132 : vector<8x128xf32>
      %143 = arith.addf %141, %142 : vector<8x128xf32>
      %144 = math.tanh %143 : vector<8x128xf32>
      %145 = arith.mulf %140, %144 : vector<8x128xf32>
      %146 = vector.broadcast %c1_i32 : i32 to vector<8x128xi32>
      %147 = arith.cmpi slt, %146, %18 : vector<8x128xi32>
      %148 = arith.select %147, %145, %65 : vector<8x128xi1>, vector<8x128xf32>
      %149 = arith.select %147, %143, %66 : vector<8x128xi1>, vector<8x128xf32>
      %150 = vector.extract_strided_slice %109 {offsets = [8, 0], sizes = [8, 128], strides = [1, 1]} : vector<16x128xbf16> to vector<8x128xbf16>
      %cst_54 = arith.constant dense<0.000000e+00> : vector<8x512xf32>
      %151 = tpu.matmul %150, %12, %cst_54 {dimension_numbers = #tpu.dot_dimension_numbers<[1], [0], [0], [1], [0, 0, 1, 1], [], []>} : vector<8x128xbf16>, vector<128x512xbf16>, vector<8x512xf32> -> vector<8x512xf32>
      %152 = arith.truncf %105 : vector<8x128xf32> to vector<8x128xbf16>
      %cst_55 = arith.constant dense<0.000000e+00> : vector<8x512xf32>
      %153 = tpu.matmul %152, %13, %cst_55 {dimension_numbers = #tpu.dot_dimension_numbers<[1], [0], [0], [1], [0, 0, 1, 1], [], []>} : vector<8x128xbf16>, vector<128x512xbf16>, vector<8x512xf32> -> vector<8x512xf32>
      %154 = arith.addf %151, %153 : vector<8x512xf32>
      %155 = vector.extract_strided_slice %154 {offsets = [0, 0], sizes = [8, 128], strides = [1, 1]} : vector<8x512xf32> to vector<8x128xf32>
      %cst_56 = arith.constant 5.000000e-01 : f32
      %156 = vector.broadcast %cst_56 : f32 to vector<8x128xf32>
      %157 = arith.mulf %156, %155 : vector<8x128xf32>
      %158 = math.tanh %157 : vector<8x128xf32>
      %cst_57 = arith.constant 5.000000e-01 : f32
      %159 = vector.broadcast %cst_57 : f32 to vector<8x128xf32>
      %160 = arith.mulf %159, %158 : vector<8x128xf32>
      %cst_58 = arith.constant 5.000000e-01 : f32
      %161 = vector.broadcast %cst_58 : f32 to vector<8x128xf32>
      %162 = arith.addf %160, %161 : vector<8x128xf32>
      %163 = vector.extract_strided_slice %154 {offsets = [0, 128], sizes = [8, 128], strides = [1, 1]} : vector<8x512xf32> to vector<8x128xf32>
      %cst_59 = arith.constant 5.000000e-01 : f32
      %164 = vector.broadcast %cst_59 : f32 to vector<8x128xf32>
      %165 = arith.mulf %164, %163 : vector<8x128xf32>
      %166 = math.tanh %165 : vector<8x128xf32>
      %cst_60 = arith.constant 5.000000e-01 : f32
      %167 = vector.broadcast %cst_60 : f32 to vector<8x128xf32>
      %168 = arith.mulf %167, %166 : vector<8x128xf32>
      %cst_61 = arith.constant 5.000000e-01 : f32
      %169 = vector.broadcast %cst_61 : f32 to vector<8x128xf32>
      %170 = arith.addf %168, %169 : vector<8x128xf32>
      %171 = vector.extract_strided_slice %154 {offsets = [0, 256], sizes = [8, 128], strides = [1, 1]} : vector<8x512xf32> to vector<8x128xf32>
      %172 = math.tanh %171 : vector<8x128xf32>
      %173 = vector.extract_strided_slice %154 {offsets = [0, 384], sizes = [8, 128], strides = [1, 1]} : vector<8x512xf32> to vector<8x128xf32>
      %cst_62 = arith.constant 5.000000e-01 : f32
      %174 = vector.broadcast %cst_62 : f32 to vector<8x128xf32>
      %175 = arith.mulf %174, %173 : vector<8x128xf32>
      %176 = math.tanh %175 : vector<8x128xf32>
      %cst_63 = arith.constant 5.000000e-01 : f32
      %177 = vector.broadcast %cst_63 : f32 to vector<8x128xf32>
      %178 = arith.mulf %177, %176 : vector<8x128xf32>
      %cst_64 = arith.constant 5.000000e-01 : f32
      %179 = vector.broadcast %cst_64 : f32 to vector<8x128xf32>
      %180 = arith.addf %178, %179 : vector<8x128xf32>
      %181 = arith.mulf %170, %106 : vector<8x128xf32>
      %182 = arith.mulf %162, %172 : vector<8x128xf32>
      %183 = arith.addf %181, %182 : vector<8x128xf32>
      %184 = math.tanh %183 : vector<8x128xf32>
      %185 = arith.mulf %180, %184 : vector<8x128xf32>
      %186 = vector.broadcast %c1_i32 : i32 to vector<8x128xi32>
      %187 = arith.cmpi slt, %186, %19 : vector<8x128xi32>
      %188 = arith.select %187, %185, %105 : vector<8x128xi1>, vector<8x128xf32>
      %189 = arith.select %187, %183, %106 : vector<8x128xi1>, vector<8x128xf32>
      %c2_i32 = arith.constant 2 : i32
      %190 = arith.index_cast %c2_i32 : i32 to index
      %c0_65 = arith.constant 0 : index
      %c0_66 = arith.constant 0 : index
      %191 = vector.load %arg3[%190, %c0_65, %c0_66] : memref<8x16x128xbf16, #tpu.memory_space<vmem>>, vector<1x16x128xbf16>
      %192 = vector.shape_cast %191 : vector<1x16x128xbf16> to vector<16x128xbf16>
      %193 = vector.extract_strided_slice %192 {offsets = [0, 0], sizes = [8, 128], strides = [1, 1]} : vector<16x128xbf16> to vector<8x128xbf16>
      %cst_67 = arith.constant dense<0.000000e+00> : vector<8x512xf32>
      %194 = tpu.matmul %193, %12, %cst_67 {dimension_numbers = #tpu.dot_dimension_numbers<[1], [0], [0], [1], [0, 0, 1, 1], [], []>} : vector<8x128xbf16>, vector<128x512xbf16>, vector<8x512xf32> -> vector<8x512xf32>
      %195 = arith.truncf %148 : vector<8x128xf32> to vector<8x128xbf16>
      %cst_68 = arith.constant dense<0.000000e+00> : vector<8x512xf32>
      %196 = tpu.matmul %195, %13, %cst_68 {dimension_numbers = #tpu.dot_dimension_numbers<[1], [0], [0], [1], [0, 0, 1, 1], [], []>} : vector<8x128xbf16>, vector<128x512xbf16>, vector<8x512xf32> -> vector<8x512xf32>
      %197 = arith.addf %194, %196 : vector<8x512xf32>
      %198 = vector.extract_strided_slice %197 {offsets = [0, 0], sizes = [8, 128], strides = [1, 1]} : vector<8x512xf32> to vector<8x128xf32>
      %cst_69 = arith.constant 5.000000e-01 : f32
      %199 = vector.broadcast %cst_69 : f32 to vector<8x128xf32>
      %200 = arith.mulf %199, %198 : vector<8x128xf32>
      %201 = math.tanh %200 : vector<8x128xf32>
      %cst_70 = arith.constant 5.000000e-01 : f32
      %202 = vector.broadcast %cst_70 : f32 to vector<8x128xf32>
      %203 = arith.mulf %202, %201 : vector<8x128xf32>
      %cst_71 = arith.constant 5.000000e-01 : f32
      %204 = vector.broadcast %cst_71 : f32 to vector<8x128xf32>
      %205 = arith.addf %203, %204 : vector<8x128xf32>
      %206 = vector.extract_strided_slice %197 {offsets = [0, 128], sizes = [8, 128], strides = [1, 1]} : vector<8x512xf32> to vector<8x128xf32>
      %cst_72 = arith.constant 5.000000e-01 : f32
      %207 = vector.broadcast %cst_72 : f32 to vector<8x128xf32>
      %208 = arith.mulf %207, %206 : vector<8x128xf32>
      %209 = math.tanh %208 : vector<8x128xf32>
      %cst_73 = arith.constant 5.000000e-01 : f32
      %210 = vector.broadcast %cst_73 : f32 to vector<8x128xf32>
      %211 = arith.mulf %210, %209 : vector<8x128xf32>
      %cst_74 = arith.constant 5.000000e-01 : f32
      %212 = vector.broadcast %cst_74 : f32 to vector<8x128xf32>
      %213 = arith.addf %211, %212 : vector<8x128xf32>
      %214 = vector.extract_strided_slice %197 {offsets = [0, 256], sizes = [8, 128], strides = [1, 1]} : vector<8x512xf32> to vector<8x128xf32>
      %215 = math.tanh %214 : vector<8x128xf32>
      %216 = vector.extract_strided_slice %197 {offsets = [0, 384], sizes = [8, 128], strides = [1, 1]} : vector<8x512xf32> to vector<8x128xf32>
      %cst_75 = arith.constant 5.000000e-01 : f32
      %217 = vector.broadcast %cst_75 : f32 to vector<8x128xf32>
      %218 = arith.mulf %217, %216 : vector<8x128xf32>
      %219 = math.tanh %218 : vector<8x128xf32>
      %cst_76 = arith.constant 5.000000e-01 : f32
      %220 = vector.broadcast %cst_76 : f32 to vector<8x128xf32>
      %221 = arith.mulf %220, %219 : vector<8x128xf32>
      %cst_77 = arith.constant 5.000000e-01 : f32
      %222 = vector.broadcast %cst_77 : f32 to vector<8x128xf32>
      %223 = arith.addf %221, %222 : vector<8x128xf32>
      %224 = arith.mulf %213, %149 : vector<8x128xf32>
      %225 = arith.mulf %205, %215 : vector<8x128xf32>
      %226 = arith.addf %224, %225 : vector<8x128xf32>
      %227 = math.tanh %226 : vector<8x128xf32>
      %228 = arith.mulf %223, %227 : vector<8x128xf32>
      %229 = vector.broadcast %c2_i32 : i32 to vector<8x128xi32>
      %230 = arith.cmpi slt, %229, %18 : vector<8x128xi32>
      %231 = arith.select %230, %228, %148 : vector<8x128xi1>, vector<8x128xf32>
      %232 = arith.select %230, %226, %149 : vector<8x128xi1>, vector<8x128xf32>
      %233 = vector.extract_strided_slice %192 {offsets = [8, 0], sizes = [8, 128], strides = [1, 1]} : vector<16x128xbf16> to vector<8x128xbf16>
      %cst_78 = arith.constant dense<0.000000e+00> : vector<8x512xf32>
      %234 = tpu.matmul %233, %12, %cst_78 {dimension_numbers = #tpu.dot_dimension_numbers<[1], [0], [0], [1], [0, 0, 1, 1], [], []>} : vector<8x128xbf16>, vector<128x512xbf16>, vector<8x512xf32> -> vector<8x512xf32>
      %235 = arith.truncf %188 : vector<8x128xf32> to vector<8x128xbf16>
      %cst_79 = arith.constant dense<0.000000e+00> : vector<8x512xf32>
      %236 = tpu.matmul %235, %13, %cst_79 {dimension_numbers = #tpu.dot_dimension_numbers<[1], [0], [0], [1], [0, 0, 1, 1], [], []>} : vector<8x128xbf16>, vector<128x512xbf16>, vector<8x512xf32> -> vector<8x512xf32>
      %237 = arith.addf %234, %236 : vector<8x512xf32>
      %238 = vector.extract_strided_slice %237 {offsets = [0, 0], sizes = [8, 128], strides = [1, 1]} : vector<8x512xf32> to vector<8x128xf32>
      %cst_80 = arith.constant 5.000000e-01 : f32
      %239 = vector.broadcast %cst_80 : f32 to vector<8x128xf32>
      %240 = arith.mulf %239, %238 : vector<8x128xf32>
      %241 = math.tanh %240 : vector<8x128xf32>
      %cst_81 = arith.constant 5.000000e-01 : f32
      %242 = vector.broadcast %cst_81 : f32 to vector<8x128xf32>
      %243 = arith.mulf %242, %241 : vector<8x128xf32>
      %cst_82 = arith.constant 5.000000e-01 : f32
      %244 = vector.broadcast %cst_82 : f32 to vector<8x128xf32>
      %245 = arith.addf %243, %244 : vector<8x128xf32>
      %246 = vector.extract_strided_slice %237 {offsets = [0, 128], sizes = [8, 128], strides = [1, 1]} : vector<8x512xf32> to vector<8x128xf32>
      %cst_83 = arith.constant 5.000000e-01 : f32
      %247 = vector.broadcast %cst_83 : f32 to vector<8x128xf32>
      %248 = arith.mulf %247, %246 : vector<8x128xf32>
      %249 = math.tanh %248 : vector<8x128xf32>
      %cst_84 = arith.constant 5.000000e-01 : f32
      %250 = vector.broadcast %cst_84 : f32 to vector<8x128xf32>
      %251 = arith.mulf %250, %249 : vector<8x128xf32>
      %cst_85 = arith.constant 5.000000e-01 : f32
      %252 = vector.broadcast %cst_85 : f32 to vector<8x128xf32>
      %253 = arith.addf %251, %252 : vector<8x128xf32>
      %254 = vector.extract_strided_slice %237 {offsets = [0, 256], sizes = [8, 128], strides = [1, 1]} : vector<8x512xf32> to vector<8x128xf32>
      %255 = math.tanh %254 : vector<8x128xf32>
      %256 = vector.extract_strided_slice %237 {offsets = [0, 384], sizes = [8, 128], strides = [1, 1]} : vector<8x512xf32> to vector<8x128xf32>
      %cst_86 = arith.constant 5.000000e-01 : f32
      %257 = vector.broadcast %cst_86 : f32 to vector<8x128xf32>
      %258 = arith.mulf %257, %256 : vector<8x128xf32>
      %259 = math.tanh %258 : vector<8x128xf32>
      %cst_87 = arith.constant 5.000000e-01 : f32
      %260 = vector.broadcast %cst_87 : f32 to vector<8x128xf32>
      %261 = arith.mulf %260, %259 : vector<8x128xf32>
      %cst_88 = arith.constant 5.000000e-01 : f32
      %262 = vector.broadcast %cst_88 : f32 to vector<8x128xf32>
      %263 = arith.addf %261, %262 : vector<8x128xf32>
      %264 = arith.mulf %253, %189 : vector<8x128xf32>
      %265 = arith.mulf %245, %255 : vector<8x128xf32>
      %266 = arith.addf %264, %265 : vector<8x128xf32>
      %267 = math.tanh %266 : vector<8x128xf32>
      %268 = arith.mulf %263, %267 : vector<8x128xf32>
      %269 = vector.broadcast %c2_i32 : i32 to vector<8x128xi32>
      %270 = arith.cmpi slt, %269, %19 : vector<8x128xi32>
      %271 = arith.select %270, %268, %188 : vector<8x128xi1>, vector<8x128xf32>
      %272 = arith.select %270, %266, %189 : vector<8x128xi1>, vector<8x128xf32>
      %c3_i32 = arith.constant 3 : i32
      %273 = arith.index_cast %c3_i32 : i32 to index
      %c0_89 = arith.constant 0 : index
      %c0_90 = arith.constant 0 : index
      %274 = vector.load %arg3[%273, %c0_89, %c0_90] : memref<8x16x128xbf16, #tpu.memory_space<vmem>>, vector<1x16x128xbf16>
      %275 = vector.shape_cast %274 : vector<1x16x128xbf16> to vector<16x128xbf16>
      %276 = vector.extract_strided_slice %275 {offsets = [0, 0], sizes = [8, 128], strides = [1, 1]} : vector<16x128xbf16> to vector<8x128xbf16>
      %cst_91 = arith.constant dense<0.000000e+00> : vector<8x512xf32>
      %277 = tpu.matmul %276, %12, %cst_91 {dimension_numbers = #tpu.dot_dimension_numbers<[1], [0], [0], [1], [0, 0, 1, 1], [], []>} : vector<8x128xbf16>, vector<128x512xbf16>, vector<8x512xf32> -> vector<8x512xf32>
      %278 = arith.truncf %231 : vector<8x128xf32> to vector<8x128xbf16>
      %cst_92 = arith.constant dense<0.000000e+00> : vector<8x512xf32>
      %279 = tpu.matmul %278, %13, %cst_92 {dimension_numbers = #tpu.dot_dimension_numbers<[1], [0], [0], [1], [0, 0, 1, 1], [], []>} : vector<8x128xbf16>, vector<128x512xbf16>, vector<8x512xf32> -> vector<8x512xf32>
      %280 = arith.addf %277, %279 : vector<8x512xf32>
      %281 = vector.extract_strided_slice %280 {offsets = [0, 0], sizes = [8, 128], strides = [1, 1]} : vector<8x512xf32> to vector<8x128xf32>
      %cst_93 = arith.constant 5.000000e-01 : f32
      %282 = vector.broadcast %cst_93 : f32 to vector<8x128xf32>
      %283 = arith.mulf %282, %281 : vector<8x128xf32>
      %284 = math.tanh %283 : vector<8x128xf32>
      %cst_94 = arith.constant 5.000000e-01 : f32
      %285 = vector.broadcast %cst_94 : f32 to vector<8x128xf32>
      %286 = arith.mulf %285, %284 : vector<8x128xf32>
      %cst_95 = arith.constant 5.000000e-01 : f32
      %287 = vector.broadcast %cst_95 : f32 to vector<8x128xf32>
      %288 = arith.addf %286, %287 : vector<8x128xf32>
      %289 = vector.extract_strided_slice %280 {offsets = [0, 128], sizes = [8, 128], strides = [1, 1]} : vector<8x512xf32> to vector<8x128xf32>
      %cst_96 = arith.constant 5.000000e-01 : f32
      %290 = vector.broadcast %cst_96 : f32 to vector<8x128xf32>
      %291 = arith.mulf %290, %289 : vector<8x128xf32>
      %292 = math.tanh %291 : vector<8x128xf32>
      %cst_97 = arith.constant 5.000000e-01 : f32
      %293 = vector.broadcast %cst_97 : f32 to vector<8x128xf32>
      %294 = arith.mulf %293, %292 : vector<8x128xf32>
      %cst_98 = arith.constant 5.000000e-01 : f32
      %295 = vector.broadcast %cst_98 : f32 to vector<8x128xf32>
      %296 = arith.addf %294, %295 : vector<8x128xf32>
      %297 = vector.extract_strided_slice %280 {offsets = [0, 256], sizes = [8, 128], strides = [1, 1]} : vector<8x512xf32> to vector<8x128xf32>
      %298 = math.tanh %297 : vector<8x128xf32>
      %299 = vector.extract_strided_slice %280 {offsets = [0, 384], sizes = [8, 128], strides = [1, 1]} : vector<8x512xf32> to vector<8x128xf32>
      %cst_99 = arith.constant 5.000000e-01 : f32
      %300 = vector.broadcast %cst_99 : f32 to vector<8x128xf32>
      %301 = arith.mulf %300, %299 : vector<8x128xf32>
      %302 = math.tanh %301 : vector<8x128xf32>
      %cst_100 = arith.constant 5.000000e-01 : f32
      %303 = vector.broadcast %cst_100 : f32 to vector<8x128xf32>
      %304 = arith.mulf %303, %302 : vector<8x128xf32>
      %cst_101 = arith.constant 5.000000e-01 : f32
      %305 = vector.broadcast %cst_101 : f32 to vector<8x128xf32>
      %306 = arith.addf %304, %305 : vector<8x128xf32>
      %307 = arith.mulf %296, %232 : vector<8x128xf32>
      %308 = arith.mulf %288, %298 : vector<8x128xf32>
      %309 = arith.addf %307, %308 : vector<8x128xf32>
      %310 = math.tanh %309 : vector<8x128xf32>
      %311 = arith.mulf %306, %310 : vector<8x128xf32>
      %312 = vector.broadcast %c3_i32 : i32 to vector<8x128xi32>
      %313 = arith.cmpi slt, %312, %18 : vector<8x128xi32>
      %314 = arith.select %313, %311, %231 : vector<8x128xi1>, vector<8x128xf32>
      %315 = arith.select %313, %309, %232 : vector<8x128xi1>, vector<8x128xf32>
      %316 = vector.extract_strided_slice %275 {offsets = [8, 0], sizes = [8, 128], strides = [1, 1]} : vector<16x128xbf16> to vector<8x128xbf16>
      %cst_102 = arith.constant dense<0.000000e+00> : vector<8x512xf32>
      %317 = tpu.matmul %316, %12, %cst_102 {dimension_numbers = #tpu.dot_dimension_numbers<[1], [0], [0], [1], [0, 0, 1, 1], [], []>} : vector<8x128xbf16>, vector<128x512xbf16>, vector<8x512xf32> -> vector<8x512xf32>
      %318 = arith.truncf %271 : vector<8x128xf32> to vector<8x128xbf16>
      %cst_103 = arith.constant dense<0.000000e+00> : vector<8x512xf32>
      %319 = tpu.matmul %318, %13, %cst_103 {dimension_numbers = #tpu.dot_dimension_numbers<[1], [0], [0], [1], [0, 0, 1, 1], [], []>} : vector<8x128xbf16>, vector<128x512xbf16>, vector<8x512xf32> -> vector<8x512xf32>
      %320 = arith.addf %317, %319 : vector<8x512xf32>
      %321 = vector.extract_strided_slice %320 {offsets = [0, 0], sizes = [8, 128], strides = [1, 1]} : vector<8x512xf32> to vector<8x128xf32>
      %cst_104 = arith.constant 5.000000e-01 : f32
      %322 = vector.broadcast %cst_104 : f32 to vector<8x128xf32>
      %323 = arith.mulf %322, %321 : vector<8x128xf32>
      %324 = math.tanh %323 : vector<8x128xf32>
      %cst_105 = arith.constant 5.000000e-01 : f32
      %325 = vector.broadcast %cst_105 : f32 to vector<8x128xf32>
      %326 = arith.mulf %325, %324 : vector<8x128xf32>
      %cst_106 = arith.constant 5.000000e-01 : f32
      %327 = vector.broadcast %cst_106 : f32 to vector<8x128xf32>
      %328 = arith.addf %326, %327 : vector<8x128xf32>
      %329 = vector.extract_strided_slice %320 {offsets = [0, 128], sizes = [8, 128], strides = [1, 1]} : vector<8x512xf32> to vector<8x128xf32>
      %cst_107 = arith.constant 5.000000e-01 : f32
      %330 = vector.broadcast %cst_107 : f32 to vector<8x128xf32>
      %331 = arith.mulf %330, %329 : vector<8x128xf32>
      %332 = math.tanh %331 : vector<8x128xf32>
      %cst_108 = arith.constant 5.000000e-01 : f32
      %333 = vector.broadcast %cst_108 : f32 to vector<8x128xf32>
      %334 = arith.mulf %333, %332 : vector<8x128xf32>
      %cst_109 = arith.constant 5.000000e-01 : f32
      %335 = vector.broadcast %cst_109 : f32 to vector<8x128xf32>
      %336 = arith.addf %334, %335 : vector<8x128xf32>
      %337 = vector.extract_strided_slice %320 {offsets = [0, 256], sizes = [8, 128], strides = [1, 1]} : vector<8x512xf32> to vector<8x128xf32>
      %338 = math.tanh %337 : vector<8x128xf32>
      %339 = vector.extract_strided_slice %320 {offsets = [0, 384], sizes = [8, 128], strides = [1, 1]} : vector<8x512xf32> to vector<8x128xf32>
      %cst_110 = arith.constant 5.000000e-01 : f32
      %340 = vector.broadcast %cst_110 : f32 to vector<8x128xf32>
      %341 = arith.mulf %340, %339 : vector<8x128xf32>
      %342 = math.tanh %341 : vector<8x128xf32>
      %cst_111 = arith.constant 5.000000e-01 : f32
      %343 = vector.broadcast %cst_111 : f32 to vector<8x128xf32>
      %344 = arith.mulf %343, %342 : vector<8x128xf32>
      %cst_112 = arith.constant 5.000000e-01 : f32
      %345 = vector.broadcast %cst_112 : f32 to vector<8x128xf32>
      %346 = arith.addf %344, %345 : vector<8x128xf32>
      %347 = arith.mulf %336, %272 : vector<8x128xf32>
      %348 = arith.mulf %328, %338 : vector<8x128xf32>
      %349 = arith.addf %347, %348 : vector<8x128xf32>
      %350 = math.tanh %349 : vector<8x128xf32>
      %351 = arith.mulf %346, %350 : vector<8x128xf32>
      %352 = vector.broadcast %c3_i32 : i32 to vector<8x128xi32>
      %353 = arith.cmpi slt, %352, %19 : vector<8x128xi32>
      %354 = arith.select %353, %351, %271 : vector<8x128xi1>, vector<8x128xf32>
      %355 = arith.select %353, %349, %272 : vector<8x128xi1>, vector<8x128xf32>
      %c4_i32 = arith.constant 4 : i32
      %356 = arith.index_cast %c4_i32 : i32 to index
      %c0_113 = arith.constant 0 : index
      %c0_114 = arith.constant 0 : index
      %357 = vector.load %arg3[%356, %c0_113, %c0_114] : memref<8x16x128xbf16, #tpu.memory_space<vmem>>, vector<1x16x128xbf16>
      %358 = vector.shape_cast %357 : vector<1x16x128xbf16> to vector<16x128xbf16>
      %359 = vector.extract_strided_slice %358 {offsets = [0, 0], sizes = [8, 128], strides = [1, 1]} : vector<16x128xbf16> to vector<8x128xbf16>
      %cst_115 = arith.constant dense<0.000000e+00> : vector<8x512xf32>
      %360 = tpu.matmul %359, %12, %cst_115 {dimension_numbers = #tpu.dot_dimension_numbers<[1], [0], [0], [1], [0, 0, 1, 1], [], []>} : vector<8x128xbf16>, vector<128x512xbf16>, vector<8x512xf32> -> vector<8x512xf32>
      %361 = arith.truncf %314 : vector<8x128xf32> to vector<8x128xbf16>
      %cst_116 = arith.constant dense<0.000000e+00> : vector<8x512xf32>
      %362 = tpu.matmul %361, %13, %cst_116 {dimension_numbers = #tpu.dot_dimension_numbers<[1], [0], [0], [1], [0, 0, 1, 1], [], []>} : vector<8x128xbf16>, vector<128x512xbf16>, vector<8x512xf32> -> vector<8x512xf32>
      %363 = arith.addf %360, %362 : vector<8x512xf32>
      %364 = vector.extract_strided_slice %363 {offsets = [0, 0], sizes = [8, 128], strides = [1, 1]} : vector<8x512xf32> to vector<8x128xf32>
      %cst_117 = arith.constant 5.000000e-01 : f32
      %365 = vector.broadcast %cst_117 : f32 to vector<8x128xf32>
      %366 = arith.mulf %365, %364 : vector<8x128xf32>
      %367 = math.tanh %366 : vector<8x128xf32>
      %cst_118 = arith.constant 5.000000e-01 : f32
      %368 = vector.broadcast %cst_118 : f32 to vector<8x128xf32>
      %369 = arith.mulf %368, %367 : vector<8x128xf32>
      %cst_119 = arith.constant 5.000000e-01 : f32
      %370 = vector.broadcast %cst_119 : f32 to vector<8x128xf32>
      %371 = arith.addf %369, %370 : vector<8x128xf32>
      %372 = vector.extract_strided_slice %363 {offsets = [0, 128], sizes = [8, 128], strides = [1, 1]} : vector<8x512xf32> to vector<8x128xf32>
      %cst_120 = arith.constant 5.000000e-01 : f32
      %373 = vector.broadcast %cst_120 : f32 to vector<8x128xf32>
      %374 = arith.mulf %373, %372 : vector<8x128xf32>
      %375 = math.tanh %374 : vector<8x128xf32>
      %cst_121 = arith.constant 5.000000e-01 : f32
      %376 = vector.broadcast %cst_121 : f32 to vector<8x128xf32>
      %377 = arith.mulf %376, %375 : vector<8x128xf32>
      %cst_122 = arith.constant 5.000000e-01 : f32
      %378 = vector.broadcast %cst_122 : f32 to vector<8x128xf32>
      %379 = arith.addf %377, %378 : vector<8x128xf32>
      %380 = vector.extract_strided_slice %363 {offsets = [0, 256], sizes = [8, 128], strides = [1, 1]} : vector<8x512xf32> to vector<8x128xf32>
      %381 = math.tanh %380 : vector<8x128xf32>
      %382 = vector.extract_strided_slice %363 {offsets = [0, 384], sizes = [8, 128], strides = [1, 1]} : vector<8x512xf32> to vector<8x128xf32>
      %cst_123 = arith.constant 5.000000e-01 : f32
      %383 = vector.broadcast %cst_123 : f32 to vector<8x128xf32>
      %384 = arith.mulf %383, %382 : vector<8x128xf32>
      %385 = math.tanh %384 : vector<8x128xf32>
      %cst_124 = arith.constant 5.000000e-01 : f32
      %386 = vector.broadcast %cst_124 : f32 to vector<8x128xf32>
      %387 = arith.mulf %386, %385 : vector<8x128xf32>
      %cst_125 = arith.constant 5.000000e-01 : f32
      %388 = vector.broadcast %cst_125 : f32 to vector<8x128xf32>
      %389 = arith.addf %387, %388 : vector<8x128xf32>
      %390 = arith.mulf %379, %315 : vector<8x128xf32>
      %391 = arith.mulf %371, %381 : vector<8x128xf32>
      %392 = arith.addf %390, %391 : vector<8x128xf32>
      %393 = math.tanh %392 : vector<8x128xf32>
      %394 = arith.mulf %389, %393 : vector<8x128xf32>
      %395 = vector.broadcast %c4_i32 : i32 to vector<8x128xi32>
      %396 = arith.cmpi slt, %395, %18 : vector<8x128xi32>
      %397 = arith.select %396, %394, %314 : vector<8x128xi1>, vector<8x128xf32>
      %398 = arith.select %396, %392, %315 : vector<8x128xi1>, vector<8x128xf32>
      %399 = vector.extract_strided_slice %358 {offsets = [8, 0], sizes = [8, 128], strides = [1, 1]} : vector<16x128xbf16> to vector<8x128xbf16>
      %cst_126 = arith.constant dense<0.000000e+00> : vector<8x512xf32>
      %400 = tpu.matmul %399, %12, %cst_126 {dimension_numbers = #tpu.dot_dimension_numbers<[1], [0], [0], [1], [0, 0, 1, 1], [], []>} : vector<8x128xbf16>, vector<128x512xbf16>, vector<8x512xf32> -> vector<8x512xf32>
      %401 = arith.truncf %354 : vector<8x128xf32> to vector<8x128xbf16>
      %cst_127 = arith.constant dense<0.000000e+00> : vector<8x512xf32>
      %402 = tpu.matmul %401, %13, %cst_127 {dimension_numbers = #tpu.dot_dimension_numbers<[1], [0], [0], [1], [0, 0, 1, 1], [], []>} : vector<8x128xbf16>, vector<128x512xbf16>, vector<8x512xf32> -> vector<8x512xf32>
      %403 = arith.addf %400, %402 : vector<8x512xf32>
      %404 = vector.extract_strided_slice %403 {offsets = [0, 0], sizes = [8, 128], strides = [1, 1]} : vector<8x512xf32> to vector<8x128xf32>
      %cst_128 = arith.constant 5.000000e-01 : f32
      %405 = vector.broadcast %cst_128 : f32 to vector<8x128xf32>
      %406 = arith.mulf %405, %404 : vector<8x128xf32>
      %407 = math.tanh %406 : vector<8x128xf32>
      %cst_129 = arith.constant 5.000000e-01 : f32
      %408 = vector.broadcast %cst_129 : f32 to vector<8x128xf32>
      %409 = arith.mulf %408, %407 : vector<8x128xf32>
      %cst_130 = arith.constant 5.000000e-01 : f32
      %410 = vector.broadcast %cst_130 : f32 to vector<8x128xf32>
      %411 = arith.addf %409, %410 : vector<8x128xf32>
      %412 = vector.extract_strided_slice %403 {offsets = [0, 128], sizes = [8, 128], strides = [1, 1]} : vector<8x512xf32> to vector<8x128xf32>
      %cst_131 = arith.constant 5.000000e-01 : f32
      %413 = vector.broadcast %cst_131 : f32 to vector<8x128xf32>
      %414 = arith.mulf %413, %412 : vector<8x128xf32>
      %415 = math.tanh %414 : vector<8x128xf32>
      %cst_132 = arith.constant 5.000000e-01 : f32
      %416 = vector.broadcast %cst_132 : f32 to vector<8x128xf32>
      %417 = arith.mulf %416, %415 : vector<8x128xf32>
      %cst_133 = arith.constant 5.000000e-01 : f32
      %418 = vector.broadcast %cst_133 : f32 to vector<8x128xf32>
      %419 = arith.addf %417, %418 : vector<8x128xf32>
      %420 = vector.extract_strided_slice %403 {offsets = [0, 256], sizes = [8, 128], strides = [1, 1]} : vector<8x512xf32> to vector<8x128xf32>
      %421 = math.tanh %420 : vector<8x128xf32>
      %422 = vector.extract_strided_slice %403 {offsets = [0, 384], sizes = [8, 128], strides = [1, 1]} : vector<8x512xf32> to vector<8x128xf32>
      %cst_134 = arith.constant 5.000000e-01 : f32
      %423 = vector.broadcast %cst_134 : f32 to vector<8x128xf32>
      %424 = arith.mulf %423, %422 : vector<8x128xf32>
      %425 = math.tanh %424 : vector<8x128xf32>
      %cst_135 = arith.constant 5.000000e-01 : f32
      %426 = vector.broadcast %cst_135 : f32 to vector<8x128xf32>
      %427 = arith.mulf %426, %425 : vector<8x128xf32>
      %cst_136 = arith.constant 5.000000e-01 : f32
      %428 = vector.broadcast %cst_136 : f32 to vector<8x128xf32>
      %429 = arith.addf %427, %428 : vector<8x128xf32>
      %430 = arith.mulf %419, %355 : vector<8x128xf32>
      %431 = arith.mulf %411, %421 : vector<8x128xf32>
      %432 = arith.addf %430, %431 : vector<8x128xf32>
      %433 = math.tanh %432 : vector<8x128xf32>
      %434 = arith.mulf %429, %433 : vector<8x128xf32>
      %435 = vector.broadcast %c4_i32 : i32 to vector<8x128xi32>
      %436 = arith.cmpi slt, %435, %19 : vector<8x128xi32>
      %437 = arith.select %436, %434, %354 : vector<8x128xi1>, vector<8x128xf32>
      %438 = arith.select %436, %432, %355 : vector<8x128xi1>, vector<8x128xf32>
      %c5_i32 = arith.constant 5 : i32
      %439 = arith.index_cast %c5_i32 : i32 to index
      %c0_137 = arith.constant 0 : index
      %c0_138 = arith.constant 0 : index
      %440 = vector.load %arg3[%439, %c0_137, %c0_138] : memref<8x16x128xbf16, #tpu.memory_space<vmem>>, vector<1x16x128xbf16>
      %441 = vector.shape_cast %440 : vector<1x16x128xbf16> to vector<16x128xbf16>
      %442 = vector.extract_strided_slice %441 {offsets = [0, 0], sizes = [8, 128], strides = [1, 1]} : vector<16x128xbf16> to vector<8x128xbf16>
      %cst_139 = arith.constant dense<0.000000e+00> : vector<8x512xf32>
      %443 = tpu.matmul %442, %12, %cst_139 {dimension_numbers = #tpu.dot_dimension_numbers<[1], [0], [0], [1], [0, 0, 1, 1], [], []>} : vector<8x128xbf16>, vector<128x512xbf16>, vector<8x512xf32> -> vector<8x512xf32>
      %444 = arith.truncf %397 : vector<8x128xf32> to vector<8x128xbf16>
      %cst_140 = arith.constant dense<0.000000e+00> : vector<8x512xf32>
      %445 = tpu.matmul %444, %13, %cst_140 {dimension_numbers = #tpu.dot_dimension_numbers<[1], [0], [0], [1], [0, 0, 1, 1], [], []>} : vector<8x128xbf16>, vector<128x512xbf16>, vector<8x512xf32> -> vector<8x512xf32>
      %446 = arith.addf %443, %445 : vector<8x512xf32>
      %447 = vector.extract_strided_slice %446 {offsets = [0, 0], sizes = [8, 128], strides = [1, 1]} : vector<8x512xf32> to vector<8x128xf32>
      %cst_141 = arith.constant 5.000000e-01 : f32
      %448 = vector.broadcast %cst_141 : f32 to vector<8x128xf32>
      %449 = arith.mulf %448, %447 : vector<8x128xf32>
      %450 = math.tanh %449 : vector<8x128xf32>
      %cst_142 = arith.constant 5.000000e-01 : f32
      %451 = vector.broadcast %cst_142 : f32 to vector<8x128xf32>
      %452 = arith.mulf %451, %450 : vector<8x128xf32>
      %cst_143 = arith.constant 5.000000e-01 : f32
      %453 = vector.broadcast %cst_143 : f32 to vector<8x128xf32>
      %454 = arith.addf %452, %453 : vector<8x128xf32>
      %455 = vector.extract_strided_slice %446 {offsets = [0, 128], sizes = [8, 128], strides = [1, 1]} : vector<8x512xf32> to vector<8x128xf32>
      %cst_144 = arith.constant 5.000000e-01 : f32
      %456 = vector.broadcast %cst_144 : f32 to vector<8x128xf32>
      %457 = arith.mulf %456, %455 : vector<8x128xf32>
      %458 = math.tanh %457 : vector<8x128xf32>
      %cst_145 = arith.constant 5.000000e-01 : f32
      %459 = vector.broadcast %cst_145 : f32 to vector<8x128xf32>
      %460 = arith.mulf %459, %458 : vector<8x128xf32>
      %cst_146 = arith.constant 5.000000e-01 : f32
      %461 = vector.broadcast %cst_146 : f32 to vector<8x128xf32>
      %462 = arith.addf %460, %461 : vector<8x128xf32>
      %463 = vector.extract_strided_slice %446 {offsets = [0, 256], sizes = [8, 128], strides = [1, 1]} : vector<8x512xf32> to vector<8x128xf32>
      %464 = math.tanh %463 : vector<8x128xf32>
      %465 = vector.extract_strided_slice %446 {offsets = [0, 384], sizes = [8, 128], strides = [1, 1]} : vector<8x512xf32> to vector<8x128xf32>
      %cst_147 = arith.constant 5.000000e-01 : f32
      %466 = vector.broadcast %cst_147 : f32 to vector<8x128xf32>
      %467 = arith.mulf %466, %465 : vector<8x128xf32>
      %468 = math.tanh %467 : vector<8x128xf32>
      %cst_148 = arith.constant 5.000000e-01 : f32
      %469 = vector.broadcast %cst_148 : f32 to vector<8x128xf32>
      %470 = arith.mulf %469, %468 : vector<8x128xf32>
      %cst_149 = arith.constant 5.000000e-01 : f32
      %471 = vector.broadcast %cst_149 : f32 to vector<8x128xf32>
      %472 = arith.addf %470, %471 : vector<8x128xf32>
      %473 = arith.mulf %462, %398 : vector<8x128xf32>
      %474 = arith.mulf %454, %464 : vector<8x128xf32>
      %475 = arith.addf %473, %474 : vector<8x128xf32>
      %476 = math.tanh %475 : vector<8x128xf32>
      %477 = arith.mulf %472, %476 : vector<8x128xf32>
      %478 = vector.broadcast %c5_i32 : i32 to vector<8x128xi32>
      %479 = arith.cmpi slt, %478, %18 : vector<8x128xi32>
      %480 = arith.select %479, %477, %397 : vector<8x128xi1>, vector<8x128xf32>
      %481 = arith.select %479, %475, %398 : vector<8x128xi1>, vector<8x128xf32>
      %482 = vector.extract_strided_slice %441 {offsets = [8, 0], sizes = [8, 128], strides = [1, 1]} : vector<16x128xbf16> to vector<8x128xbf16>
      %cst_150 = arith.constant dense<0.000000e+00> : vector<8x512xf32>
      %483 = tpu.matmul %482, %12, %cst_150 {dimension_numbers = #tpu.dot_dimension_numbers<[1], [0], [0], [1], [0, 0, 1, 1], [], []>} : vector<8x128xbf16>, vector<128x512xbf16>, vector<8x512xf32> -> vector<8x512xf32>
      %484 = arith.truncf %437 : vector<8x128xf32> to vector<8x128xbf16>
      %cst_151 = arith.constant dense<0.000000e+00> : vector<8x512xf32>
      %485 = tpu.matmul %484, %13, %cst_151 {dimension_numbers = #tpu.dot_dimension_numbers<[1], [0], [0], [1], [0, 0, 1, 1], [], []>} : vector<8x128xbf16>, vector<128x512xbf16>, vector<8x512xf32> -> vector<8x512xf32>
      %486 = arith.addf %483, %485 : vector<8x512xf32>
      %487 = vector.extract_strided_slice %486 {offsets = [0, 0], sizes = [8, 128], strides = [1, 1]} : vector<8x512xf32> to vector<8x128xf32>
      %cst_152 = arith.constant 5.000000e-01 : f32
      %488 = vector.broadcast %cst_152 : f32 to vector<8x128xf32>
      %489 = arith.mulf %488, %487 : vector<8x128xf32>
      %490 = math.tanh %489 : vector<8x128xf32>
      %cst_153 = arith.constant 5.000000e-01 : f32
      %491 = vector.broadcast %cst_153 : f32 to vector<8x128xf32>
      %492 = arith.mulf %491, %490 : vector<8x128xf32>
      %cst_154 = arith.constant 5.000000e-01 : f32
      %493 = vector.broadcast %cst_154 : f32 to vector<8x128xf32>
      %494 = arith.addf %492, %493 : vector<8x128xf32>
      %495 = vector.extract_strided_slice %486 {offsets = [0, 128], sizes = [8, 128], strides = [1, 1]} : vector<8x512xf32> to vector<8x128xf32>
      %cst_155 = arith.constant 5.000000e-01 : f32
      %496 = vector.broadcast %cst_155 : f32 to vector<8x128xf32>
      %497 = arith.mulf %496, %495 : vector<8x128xf32>
      %498 = math.tanh %497 : vector<8x128xf32>
      %cst_156 = arith.constant 5.000000e-01 : f32
      %499 = vector.broadcast %cst_156 : f32 to vector<8x128xf32>
      %500 = arith.mulf %499, %498 : vector<8x128xf32>
      %cst_157 = arith.constant 5.000000e-01 : f32
      %501 = vector.broadcast %cst_157 : f32 to vector<8x128xf32>
      %502 = arith.addf %500, %501 : vector<8x128xf32>
      %503 = vector.extract_strided_slice %486 {offsets = [0, 256], sizes = [8, 128], strides = [1, 1]} : vector<8x512xf32> to vector<8x128xf32>
      %504 = math.tanh %503 : vector<8x128xf32>
      %505 = vector.extract_strided_slice %486 {offsets = [0, 384], sizes = [8, 128], strides = [1, 1]} : vector<8x512xf32> to vector<8x128xf32>
      %cst_158 = arith.constant 5.000000e-01 : f32
      %506 = vector.broadcast %cst_158 : f32 to vector<8x128xf32>
      %507 = arith.mulf %506, %505 : vector<8x128xf32>
      %508 = math.tanh %507 : vector<8x128xf32>
      %cst_159 = arith.constant 5.000000e-01 : f32
      %509 = vector.broadcast %cst_159 : f32 to vector<8x128xf32>
      %510 = arith.mulf %509, %508 : vector<8x128xf32>
      %cst_160 = arith.constant 5.000000e-01 : f32
      %511 = vector.broadcast %cst_160 : f32 to vector<8x128xf32>
      %512 = arith.addf %510, %511 : vector<8x128xf32>
      %513 = arith.mulf %502, %438 : vector<8x128xf32>
      %514 = arith.mulf %494, %504 : vector<8x128xf32>
      %515 = arith.addf %513, %514 : vector<8x128xf32>
      %516 = math.tanh %515 : vector<8x128xf32>
      %517 = arith.mulf %512, %516 : vector<8x128xf32>
      %518 = vector.broadcast %c5_i32 : i32 to vector<8x128xi32>
      %519 = arith.cmpi slt, %518, %19 : vector<8x128xi32>
      %520 = arith.select %519, %517, %437 : vector<8x128xi1>, vector<8x128xf32>
      %521 = arith.select %519, %515, %438 : vector<8x128xi1>, vector<8x128xf32>
      %c6_i32 = arith.constant 6 : i32
      %522 = arith.index_cast %c6_i32 : i32 to index
      %c0_161 = arith.constant 0 : index
      %c0_162 = arith.constant 0 : index
      %523 = vector.load %arg3[%522, %c0_161, %c0_162] : memref<8x16x128xbf16, #tpu.memory_space<vmem>>, vector<1x16x128xbf16>
      %524 = vector.shape_cast %523 : vector<1x16x128xbf16> to vector<16x128xbf16>
      %525 = vector.extract_strided_slice %524 {offsets = [0, 0], sizes = [8, 128], strides = [1, 1]} : vector<16x128xbf16> to vector<8x128xbf16>
      %cst_163 = arith.constant dense<0.000000e+00> : vector<8x512xf32>
      %526 = tpu.matmul %525, %12, %cst_163 {dimension_numbers = #tpu.dot_dimension_numbers<[1], [0], [0], [1], [0, 0, 1, 1], [], []>} : vector<8x128xbf16>, vector<128x512xbf16>, vector<8x512xf32> -> vector<8x512xf32>
      %527 = arith.truncf %480 : vector<8x128xf32> to vector<8x128xbf16>
      %cst_164 = arith.constant dense<0.000000e+00> : vector<8x512xf32>
      %528 = tpu.matmul %527, %13, %cst_164 {dimension_numbers = #tpu.dot_dimension_numbers<[1], [0], [0], [1], [0, 0, 1, 1], [], []>} : vector<8x128xbf16>, vector<128x512xbf16>, vector<8x512xf32> -> vector<8x512xf32>
      %529 = arith.addf %526, %528 : vector<8x512xf32>
      %530 = vector.extract_strided_slice %529 {offsets = [0, 0], sizes = [8, 128], strides = [1, 1]} : vector<8x512xf32> to vector<8x128xf32>
      %cst_165 = arith.constant 5.000000e-01 : f32
      %531 = vector.broadcast %cst_165 : f32 to vector<8x128xf32>
      %532 = arith.mulf %531, %530 : vector<8x128xf32>
      %533 = math.tanh %532 : vector<8x128xf32>
      %cst_166 = arith.constant 5.000000e-01 : f32
      %534 = vector.broadcast %cst_166 : f32 to vector<8x128xf32>
      %535 = arith.mulf %534, %533 : vector<8x128xf32>
      %cst_167 = arith.constant 5.000000e-01 : f32
      %536 = vector.broadcast %cst_167 : f32 to vector<8x128xf32>
      %537 = arith.addf %535, %536 : vector<8x128xf32>
      %538 = vector.extract_strided_slice %529 {offsets = [0, 128], sizes = [8, 128], strides = [1, 1]} : vector<8x512xf32> to vector<8x128xf32>
      %cst_168 = arith.constant 5.000000e-01 : f32
      %539 = vector.broadcast %cst_168 : f32 to vector<8x128xf32>
      %540 = arith.mulf %539, %538 : vector<8x128xf32>
      %541 = math.tanh %540 : vector<8x128xf32>
      %cst_169 = arith.constant 5.000000e-01 : f32
      %542 = vector.broadcast %cst_169 : f32 to vector<8x128xf32>
      %543 = arith.mulf %542, %541 : vector<8x128xf32>
      %cst_170 = arith.constant 5.000000e-01 : f32
      %544 = vector.broadcast %cst_170 : f32 to vector<8x128xf32>
      %545 = arith.addf %543, %544 : vector<8x128xf32>
      %546 = vector.extract_strided_slice %529 {offsets = [0, 256], sizes = [8, 128], strides = [1, 1]} : vector<8x512xf32> to vector<8x128xf32>
      %547 = math.tanh %546 : vector<8x128xf32>
      %548 = vector.extract_strided_slice %529 {offsets = [0, 384], sizes = [8, 128], strides = [1, 1]} : vector<8x512xf32> to vector<8x128xf32>
      %cst_171 = arith.constant 5.000000e-01 : f32
      %549 = vector.broadcast %cst_171 : f32 to vector<8x128xf32>
      %550 = arith.mulf %549, %548 : vector<8x128xf32>
      %551 = math.tanh %550 : vector<8x128xf32>
      %cst_172 = arith.constant 5.000000e-01 : f32
      %552 = vector.broadcast %cst_172 : f32 to vector<8x128xf32>
      %553 = arith.mulf %552, %551 : vector<8x128xf32>
      %cst_173 = arith.constant 5.000000e-01 : f32
      %554 = vector.broadcast %cst_173 : f32 to vector<8x128xf32>
      %555 = arith.addf %553, %554 : vector<8x128xf32>
      %556 = arith.mulf %545, %481 : vector<8x128xf32>
      %557 = arith.mulf %537, %547 : vector<8x128xf32>
      %558 = arith.addf %556, %557 : vector<8x128xf32>
      %559 = math.tanh %558 : vector<8x128xf32>
      %560 = arith.mulf %555, %559 : vector<8x128xf32>
      %561 = vector.broadcast %c6_i32 : i32 to vector<8x128xi32>
      %562 = arith.cmpi slt, %561, %18 : vector<8x128xi32>
      %563 = arith.select %562, %560, %480 : vector<8x128xi1>, vector<8x128xf32>
      %564 = arith.select %562, %558, %481 : vector<8x128xi1>, vector<8x128xf32>
      %565 = vector.extract_strided_slice %524 {offsets = [8, 0], sizes = [8, 128], strides = [1, 1]} : vector<16x128xbf16> to vector<8x128xbf16>
      %cst_174 = arith.constant dense<0.000000e+00> : vector<8x512xf32>
      %566 = tpu.matmul %565, %12, %cst_174 {dimension_numbers = #tpu.dot_dimension_numbers<[1], [0], [0], [1], [0, 0, 1, 1], [], []>} : vector<8x128xbf16>, vector<128x512xbf16>, vector<8x512xf32> -> vector<8x512xf32>
      %567 = arith.truncf %520 : vector<8x128xf32> to vector<8x128xbf16>
      %cst_175 = arith.constant dense<0.000000e+00> : vector<8x512xf32>
      %568 = tpu.matmul %567, %13, %cst_175 {dimension_numbers = #tpu.dot_dimension_numbers<[1], [0], [0], [1], [0, 0, 1, 1], [], []>} : vector<8x128xbf16>, vector<128x512xbf16>, vector<8x512xf32> -> vector<8x512xf32>
      %569 = arith.addf %566, %568 : vector<8x512xf32>
      %570 = vector.extract_strided_slice %569 {offsets = [0, 0], sizes = [8, 128], strides = [1, 1]} : vector<8x512xf32> to vector<8x128xf32>
      %cst_176 = arith.constant 5.000000e-01 : f32
      %571 = vector.broadcast %cst_176 : f32 to vector<8x128xf32>
      %572 = arith.mulf %571, %570 : vector<8x128xf32>
      %573 = math.tanh %572 : vector<8x128xf32>
      %cst_177 = arith.constant 5.000000e-01 : f32
      %574 = vector.broadcast %cst_177 : f32 to vector<8x128xf32>
      %575 = arith.mulf %574, %573 : vector<8x128xf32>
      %cst_178 = arith.constant 5.000000e-01 : f32
      %576 = vector.broadcast %cst_178 : f32 to vector<8x128xf32>
      %577 = arith.addf %575, %576 : vector<8x128xf32>
      %578 = vector.extract_strided_slice %569 {offsets = [0, 128], sizes = [8, 128], strides = [1, 1]} : vector<8x512xf32> to vector<8x128xf32>
      %cst_179 = arith.constant 5.000000e-01 : f32
      %579 = vector.broadcast %cst_179 : f32 to vector<8x128xf32>
      %580 = arith.mulf %579, %578 : vector<8x128xf32>
      %581 = math.tanh %580 : vector<8x128xf32>
      %cst_180 = arith.constant 5.000000e-01 : f32
      %582 = vector.broadcast %cst_180 : f32 to vector<8x128xf32>
      %583 = arith.mulf %582, %581 : vector<8x128xf32>
      %cst_181 = arith.constant 5.000000e-01 : f32
      %584 = vector.broadcast %cst_181 : f32 to vector<8x128xf32>
      %585 = arith.addf %583, %584 : vector<8x128xf32>
      %586 = vector.extract_strided_slice %569 {offsets = [0, 256], sizes = [8, 128], strides = [1, 1]} : vector<8x512xf32> to vector<8x128xf32>
      %587 = math.tanh %586 : vector<8x128xf32>
      %588 = vector.extract_strided_slice %569 {offsets = [0, 384], sizes = [8, 128], strides = [1, 1]} : vector<8x512xf32> to vector<8x128xf32>
      %cst_182 = arith.constant 5.000000e-01 : f32
      %589 = vector.broadcast %cst_182 : f32 to vector<8x128xf32>
      %590 = arith.mulf %589, %588 : vector<8x128xf32>
      %591 = math.tanh %590 : vector<8x128xf32>
      %cst_183 = arith.constant 5.000000e-01 : f32
      %592 = vector.broadcast %cst_183 : f32 to vector<8x128xf32>
      %593 = arith.mulf %592, %591 : vector<8x128xf32>
      %cst_184 = arith.constant 5.000000e-01 : f32
      %594 = vector.broadcast %cst_184 : f32 to vector<8x128xf32>
      %595 = arith.addf %593, %594 : vector<8x128xf32>
      %596 = arith.mulf %585, %521 : vector<8x128xf32>
      %597 = arith.mulf %577, %587 : vector<8x128xf32>
      %598 = arith.addf %596, %597 : vector<8x128xf32>
      %599 = math.tanh %598 : vector<8x128xf32>
      %600 = arith.mulf %595, %599 : vector<8x128xf32>
      %601 = vector.broadcast %c6_i32 : i32 to vector<8x128xi32>
      %602 = arith.cmpi slt, %601, %19 : vector<8x128xi32>
      %603 = arith.select %602, %600, %520 : vector<8x128xi1>, vector<8x128xf32>
      %604 = arith.select %602, %598, %521 : vector<8x128xi1>, vector<8x128xf32>
      %c7_i32 = arith.constant 7 : i32
      %605 = arith.index_cast %c7_i32 : i32 to index
      %c0_185 = arith.constant 0 : index
      %c0_186 = arith.constant 0 : index
      %606 = vector.load %arg3[%605, %c0_185, %c0_186] : memref<8x16x128xbf16, #tpu.memory_space<vmem>>, vector<1x16x128xbf16>
      %607 = vector.shape_cast %606 : vector<1x16x128xbf16> to vector<16x128xbf16>
      %608 = vector.extract_strided_slice %607 {offsets = [0, 0], sizes = [8, 128], strides = [1, 1]} : vector<16x128xbf16> to vector<8x128xbf16>
      %cst_187 = arith.constant dense<0.000000e+00> : vector<8x512xf32>
      %609 = tpu.matmul %608, %12, %cst_187 {dimension_numbers = #tpu.dot_dimension_numbers<[1], [0], [0], [1], [0, 0, 1, 1], [], []>} : vector<8x128xbf16>, vector<128x512xbf16>, vector<8x512xf32> -> vector<8x512xf32>
      %610 = arith.truncf %563 : vector<8x128xf32> to vector<8x128xbf16>
      %cst_188 = arith.constant dense<0.000000e+00> : vector<8x512xf32>
      %611 = tpu.matmul %610, %13, %cst_188 {dimension_numbers = #tpu.dot_dimension_numbers<[1], [0], [0], [1], [0, 0, 1, 1], [], []>} : vector<8x128xbf16>, vector<128x512xbf16>, vector<8x512xf32> -> vector<8x512xf32>
      %612 = arith.addf %609, %611 : vector<8x512xf32>
      %613 = vector.extract_strided_slice %612 {offsets = [0, 0], sizes = [8, 128], strides = [1, 1]} : vector<8x512xf32> to vector<8x128xf32>
      %cst_189 = arith.constant 5.000000e-01 : f32
      %614 = vector.broadcast %cst_189 : f32 to vector<8x128xf32>
      %615 = arith.mulf %614, %613 : vector<8x128xf32>
      %616 = math.tanh %615 : vector<8x128xf32>
      %cst_190 = arith.constant 5.000000e-01 : f32
      %617 = vector.broadcast %cst_190 : f32 to vector<8x128xf32>
      %618 = arith.mulf %617, %616 : vector<8x128xf32>
      %cst_191 = arith.constant 5.000000e-01 : f32
      %619 = vector.broadcast %cst_191 : f32 to vector<8x128xf32>
      %620 = arith.addf %618, %619 : vector<8x128xf32>
      %621 = vector.extract_strided_slice %612 {offsets = [0, 128], sizes = [8, 128], strides = [1, 1]} : vector<8x512xf32> to vector<8x128xf32>
      %cst_192 = arith.constant 5.000000e-01 : f32
      %622 = vector.broadcast %cst_192 : f32 to vector<8x128xf32>
      %623 = arith.mulf %622, %621 : vector<8x128xf32>
      %624 = math.tanh %623 : vector<8x128xf32>
      %cst_193 = arith.constant 5.000000e-01 : f32
      %625 = vector.broadcast %cst_193 : f32 to vector<8x128xf32>
      %626 = arith.mulf %625, %624 : vector<8x128xf32>
      %cst_194 = arith.constant 5.000000e-01 : f32
      %627 = vector.broadcast %cst_194 : f32 to vector<8x128xf32>
      %628 = arith.addf %626, %627 : vector<8x128xf32>
      %629 = vector.extract_strided_slice %612 {offsets = [0, 256], sizes = [8, 128], strides = [1, 1]} : vector<8x512xf32> to vector<8x128xf32>
      %630 = math.tanh %629 : vector<8x128xf32>
      %631 = vector.extract_strided_slice %612 {offsets = [0, 384], sizes = [8, 128], strides = [1, 1]} : vector<8x512xf32> to vector<8x128xf32>
      %cst_195 = arith.constant 5.000000e-01 : f32
      %632 = vector.broadcast %cst_195 : f32 to vector<8x128xf32>
      %633 = arith.mulf %632, %631 : vector<8x128xf32>
      %634 = math.tanh %633 : vector<8x128xf32>
      %cst_196 = arith.constant 5.000000e-01 : f32
      %635 = vector.broadcast %cst_196 : f32 to vector<8x128xf32>
      %636 = arith.mulf %635, %634 : vector<8x128xf32>
      %cst_197 = arith.constant 5.000000e-01 : f32
      %637 = vector.broadcast %cst_197 : f32 to vector<8x128xf32>
      %638 = arith.addf %636, %637 : vector<8x128xf32>
      %639 = arith.mulf %628, %564 : vector<8x128xf32>
      %640 = arith.mulf %620, %630 : vector<8x128xf32>
      %641 = arith.addf %639, %640 : vector<8x128xf32>
      %642 = math.tanh %641 : vector<8x128xf32>
      %643 = arith.mulf %638, %642 : vector<8x128xf32>
      %644 = vector.broadcast %c7_i32 : i32 to vector<8x128xi32>
      %645 = arith.cmpi slt, %644, %18 : vector<8x128xi32>
      %646 = arith.select %645, %643, %563 : vector<8x128xi1>, vector<8x128xf32>
      %647 = arith.select %645, %641, %564 : vector<8x128xi1>, vector<8x128xf32>
      %648 = vector.extract_strided_slice %607 {offsets = [8, 0], sizes = [8, 128], strides = [1, 1]} : vector<16x128xbf16> to vector<8x128xbf16>
      %cst_198 = arith.constant dense<0.000000e+00> : vector<8x512xf32>
      %649 = tpu.matmul %648, %12, %cst_198 {dimension_numbers = #tpu.dot_dimension_numbers<[1], [0], [0], [1], [0, 0, 1, 1], [], []>} : vector<8x128xbf16>, vector<128x512xbf16>, vector<8x512xf32> -> vector<8x512xf32>
      %650 = arith.truncf %603 : vector<8x128xf32> to vector<8x128xbf16>
      %cst_199 = arith.constant dense<0.000000e+00> : vector<8x512xf32>
      %651 = tpu.matmul %650, %13, %cst_199 {dimension_numbers = #tpu.dot_dimension_numbers<[1], [0], [0], [1], [0, 0, 1, 1], [], []>} : vector<8x128xbf16>, vector<128x512xbf16>, vector<8x512xf32> -> vector<8x512xf32>
      %652 = arith.addf %649, %651 : vector<8x512xf32>
      %653 = vector.extract_strided_slice %652 {offsets = [0, 0], sizes = [8, 128], strides = [1, 1]} : vector<8x512xf32> to vector<8x128xf32>
      %cst_200 = arith.constant 5.000000e-01 : f32
      %654 = vector.broadcast %cst_200 : f32 to vector<8x128xf32>
      %655 = arith.mulf %654, %653 : vector<8x128xf32>
      %656 = math.tanh %655 : vector<8x128xf32>
      %cst_201 = arith.constant 5.000000e-01 : f32
      %657 = vector.broadcast %cst_201 : f32 to vector<8x128xf32>
      %658 = arith.mulf %657, %656 : vector<8x128xf32>
      %cst_202 = arith.constant 5.000000e-01 : f32
      %659 = vector.broadcast %cst_202 : f32 to vector<8x128xf32>
      %660 = arith.addf %658, %659 : vector<8x128xf32>
      %661 = vector.extract_strided_slice %652 {offsets = [0, 128], sizes = [8, 128], strides = [1, 1]} : vector<8x512xf32> to vector<8x128xf32>
      %cst_203 = arith.constant 5.000000e-01 : f32
      %662 = vector.broadcast %cst_203 : f32 to vector<8x128xf32>
      %663 = arith.mulf %662, %661 : vector<8x128xf32>
      %664 = math.tanh %663 : vector<8x128xf32>
      %cst_204 = arith.constant 5.000000e-01 : f32
      %665 = vector.broadcast %cst_204 : f32 to vector<8x128xf32>
      %666 = arith.mulf %665, %664 : vector<8x128xf32>
      %cst_205 = arith.constant 5.000000e-01 : f32
      %667 = vector.broadcast %cst_205 : f32 to vector<8x128xf32>
      %668 = arith.addf %666, %667 : vector<8x128xf32>
      %669 = vector.extract_strided_slice %652 {offsets = [0, 256], sizes = [8, 128], strides = [1, 1]} : vector<8x512xf32> to vector<8x128xf32>
      %670 = math.tanh %669 : vector<8x128xf32>
      %671 = vector.extract_strided_slice %652 {offsets = [0, 384], sizes = [8, 128], strides = [1, 1]} : vector<8x512xf32> to vector<8x128xf32>
      %cst_206 = arith.constant 5.000000e-01 : f32
      %672 = vector.broadcast %cst_206 : f32 to vector<8x128xf32>
      %673 = arith.mulf %672, %671 : vector<8x128xf32>
      %674 = math.tanh %673 : vector<8x128xf32>
      %cst_207 = arith.constant 5.000000e-01 : f32
      %675 = vector.broadcast %cst_207 : f32 to vector<8x128xf32>
      %676 = arith.mulf %675, %674 : vector<8x128xf32>
      %cst_208 = arith.constant 5.000000e-01 : f32
      %677 = vector.broadcast %cst_208 : f32 to vector<8x128xf32>
      %678 = arith.addf %676, %677 : vector<8x128xf32>
      %679 = arith.mulf %668, %604 : vector<8x128xf32>
      %680 = arith.mulf %660, %670 : vector<8x128xf32>
      %681 = arith.addf %679, %680 : vector<8x128xf32>
      %682 = math.tanh %681 : vector<8x128xf32>
      %683 = arith.mulf %678, %682 : vector<8x128xf32>
      %684 = vector.broadcast %c7_i32 : i32 to vector<8x128xi32>
      %685 = arith.cmpi slt, %684, %19 : vector<8x128xi32>
      %686 = arith.select %685, %683, %603 : vector<8x128xi1>, vector<8x128xf32>
      %687 = arith.select %685, %681, %604 : vector<8x128xi1>, vector<8x128xf32>
      %c8_i32_209 = arith.constant 8 : i32
      %c0_210 = arith.constant 0 : index
      %c0_211 = arith.constant 0 : index
      %688 = vector.load %arg10[%c0_210, %c0_211] : memref<16x128xf32, #tpu.memory_space<vmem>>, vector<8x128xf32>
      tpu.vector_store %arg10[%c0_210, %c0_211], %646 {strides = array<i32>} : memref<16x128xf32, #tpu.memory_space<vmem>>, vector<8x128xf32>,
      %c0_212 = arith.constant 0 : index
      %c0_213 = arith.constant 0 : index
      %689 = vector.load %arg11[%c0_212, %c0_213] : memref<16x128xf32, #tpu.memory_space<vmem>>, vector<8x128xf32>
      tpu.vector_store %arg11[%c0_212, %c0_213], %647 {strides = array<i32>} : memref<16x128xf32, #tpu.memory_space<vmem>>, vector<8x128xf32>,
      %c8_214 = arith.constant 8 : index
      %c0_215 = arith.constant 0 : index
      %690 = vector.load %arg10[%c8_214, %c0_215] : memref<16x128xf32, #tpu.memory_space<vmem>>, vector<8x128xf32>
      tpu.vector_store %arg10[%c8_214, %c0_215], %686 {strides = array<i32>} : memref<16x128xf32, #tpu.memory_space<vmem>>, vector<8x128xf32>,
      %c8_216 = arith.constant 8 : index
      %c0_217 = arith.constant 0 : index
      %691 = vector.load %arg11[%c8_216, %c0_217] : memref<16x128xf32, #tpu.memory_space<vmem>>, vector<8x128xf32>
      tpu.vector_store %arg11[%c8_216, %c0_217], %687 {strides = array<i32>} : memref<16x128xf32, #tpu.memory_space<vmem>>, vector<8x128xf32>,
    } else {
    }
    %c0_i32_2 = arith.constant 0 : i32
    %9 = arith.cmpi eq, %arg1, %c0_i32_2 : i32
    %10 = arith.extui %9 : i1 to i32
    %c0_i32_3 = arith.constant 0 : i32
    %11 = arith.cmpi ne, %10, %c0_i32_3 : i32
    scf.if %11 {
      %c0 = arith.constant 0 : index
      %c0_4 = arith.constant 0 : index
      %12 = vector.load %arg10[%c0, %c0_4] : memref<16x128xf32, #tpu.memory_space<vmem>>, vector<16x128xf32>
      %13 = arith.truncf %12 : vector<16x128xf32> to vector<16x128xbf16>
      %c0_5 = arith.constant 0 : index
      %c0_6 = arith.constant 0 : index
      %14 = vector.load %arg7[%c0_5, %c0_6] : memref<128x128xbf16, #tpu.memory_space<vmem>>, vector<128x128xbf16>
      %cst = arith.constant dense<0.000000e+00> : vector<16x128xf32>
      %15 = tpu.matmul %13, %14, %cst {dimension_numbers = #tpu.dot_dimension_numbers<[1], [0], [0], [1], [0, 0, 1, 1], [], []>} : vector<16x128xbf16>, vector<128x128xbf16>, vector<16x128xf32> -> vector<16x128xf32>
      %c0_7 = arith.constant 0 : index
      %c0_8 = arith.constant 0 : index
      %16 = vector.load %arg8[%c0_7, %c0_8] : memref<1x128xf32, #tpu.memory_space<vmem>>, vector<1x128xf32>
      %17 = vector.broadcast %16 : vector<1x128xf32> to vector<16x128xf32>
      %18 = arith.addf %15, %17 : vector<16x128xf32>
      %cst_9 = arith.constant dense<0xFF800000> : vector<16xf32>
      %19 = vector.multi_reduction <maximumf>, %18, %cst_9 [1] : vector<16x128xf32> to vector<16xf32>
      %20 = vector.shape_cast %19 : vector<16xf32> to vector<16x1xf32>
      %21 = vector.broadcast %20 : vector<16x1xf32> to vector<16x128xf32>
      %22 = arith.subf %18, %21 : vector<16x128xf32>
      %23 = math.exp %22 : vector<16x128xf32>
      %cst_10 = arith.constant dense<0.000000e+00> : vector<16xf32>
      %24 = vector.multi_reduction <add>, %23, %cst_10 [1] : vector<16x128xf32> to vector<16xf32>
      %25 = vector.shape_cast %24 : vector<16xf32> to vector<16x1xf32>
      %26 = math.log %25 : vector<16x1xf32>
      %27 = vector.broadcast %26 : vector<16x1xf32> to vector<16x128xf32>
      %28 = arith.subf %22, %27 : vector<16x128xf32>
      %c0_11 = arith.constant 0 : index
      %c0_12 = arith.constant 0 : index
      %29 = vector.load %arg9[%c0_11, %c0_12] : memref<16x128xf32, #tpu.memory_space<vmem>>, vector<16x128xf32>
      tpu.vector_store %arg9[%c0_11, %c0_12], %28 {strides = array<i32>} : memref<16x128xf32, #tpu.memory_space<vmem>>, vector<16x128xf32>,
    } else {
    }
    return
  }
  func.func @transform_0(%arg0: i32, %arg1: i32, %arg2: memref<1xi32, #tpu.memory_space<smem>>) -> (i32, i32, i32) {
    %c0_i32 = arith.constant 0 : i32
    %c0_i32_0 = arith.constant 0 : i32
    return %arg1, %arg0, %c0_i32 : i32, i32, i32
  }
  func.func @transform_1(%arg0: i32, %arg1: i32, %arg2: memref<1xi32, #tpu.memory_space<smem>>) -> (i32, i32) {
    %c0_i32 = arith.constant 0 : i32
    %c0_i32_0 = arith.constant 0 : i32
    return %arg0, %c0_i32 : i32, i32
  }
  func.func @transform_2(%arg0: i32, %arg1: i32, %arg2: memref<1xi32, #tpu.memory_space<smem>>) -> (i32, i32) {
    %c0_i32 = arith.constant 0 : i32
    %c0_i32_0 = arith.constant 0 : i32
    %c0_i32_1 = arith.constant 0 : i32
    return %c0_i32, %c0_i32_0 : i32, i32
  }
  func.func @transform_3(%arg0: i32, %arg1: i32, %arg2: memref<1xi32, #tpu.memory_space<smem>>) -> (i32, i32) {
    %c0_i32 = arith.constant 0 : i32
    %c0_i32_0 = arith.constant 0 : i32
    %c0_i32_1 = arith.constant 0 : i32
    return %c0_i32, %c0_i32_0 : i32, i32
  }
  func.func @transform_4(%arg0: i32, %arg1: i32, %arg2: memref<1xi32, #tpu.memory_space<smem>>) -> (i32, i32) {
    %c0_i32 = arith.constant 0 : i32
    %c0_i32_0 = arith.constant 0 : i32
    %c0_i32_1 = arith.constant 0 : i32
    return %c0_i32, %c0_i32_0 : i32, i32
  }
  func.func @transform_5(%arg0: i32, %arg1: i32, %arg2: memref<1xi32, #tpu.memory_space<smem>>) -> (i32, i32) {
    %c0_i32 = arith.constant 0 : i32
    %c0_i32_0 = arith.constant 0 : i32
    %c0_i32_1 = arith.constant 0 : i32
    return %c0_i32, %c0_i32_0 : i32, i32
  }
  func.func @transform_6(%arg0: i32, %arg1: i32, %arg2: memref<1xi32, #tpu.memory_space<smem>>) -> (i32, i32) {
    %c0_i32 = arith.constant 0 : i32
    %c0_i32_0 = arith.constant 0 : i32
    return %arg0, %c0_i32 : i32, i32
  }
}

</mosaic_0001>

<bundles_post_ra>
// kernel: tpu_custom_call.1
= control target key start
LH: loop header
LB: loop body
LE: loop exit
PB: predicated region body
PF: predicated region fallthrough
CT: control target
= control target key end

     0   :  { %13 = vsyncpa [#allocation7], 0  ;;  %s6331_s0 = inlined_call_operand.<no memory space> [shape: s32[1], index: 0, kind: input, shape index: {}]   ;;  %s6332_s1 = inlined_call_operand.hbm [shape: bf16[8,16,128], index: 1, kind: input, shape index: {}]   ;;  %s6333_s2 = inlined_call_operand.hbm [shape: s32[16,128], index: 2, kind: input, shape index: {}]   ;;  %s6334_s3 = inlined_call_operand.hbm [shape: bf16[128,512], index: 3, kind: input, shape index: {}]   ;;  %s6335_s4 = inlined_call_operand.hbm [shape: bf16[128,512], index: 4, kind: input, shape index: {}]   ;;  %s6336_s5 = inlined_call_operand.hbm [shape: bf16[128,128], index: 5, kind: input, shape index: {}]   ;;  %s6337_s6 = inlined_call_operand.hbm [shape: f32[1,128], index: 6, kind: input, shape index: {}]   ;;  %s6338_s7 = inlined_call_operand.hbm [shape: f32[16,128], index: 7, kind: output, shape index: {}]  }
   0x1   :  { %14 = vsyncpa [#allocation10], 0 }
   0x2   :  { %15 = vsyncpa [#allocation13], 0 }
   0x3   :  { %16 = vsyncpa [#allocation16], 0 }
   0x4   :  { %17 = vsyncpa [#allocation8], 0  ;;  %s4543_s24 = smov [#allocation9]   ;;  %s4379_s28 = scalar_lea.hbm %s6333_s2, 256 }
   0x5   :  { %s35_s25 = sshll.u32 %s4543_s24, 4  ;;  %p4380_p0 = scmp.ne.s32.totalorder %s6333_s2, %s4379_s28  ;;  %s36_s25 = int_to_ptr.vmem [resolvable:$true] %s35_s25 }
   0x6   :  { %p4383_p1 = scmp.lt.u32.totalorder %s4379_s28, %s6333_s2 }
   0x8   :  { %p4385_p2 = pnand %p4383_p1, %p4380_p0 }
   0xa   :  { %4388 = shalt.err (!%p4385_p2)
}
   0xb   :  { %s4389_s10 = scalar_lea.vmem %s36_s25, 256  ;;  %p4394_p4 = scmp.lt.s32.totalorder %s36_s25, %s36_s25 }
   0xc   :  { %p4390_p3 = scmp.ne.s32.totalorder %s36_s25, %s4389_s10  ;;  %p4395_p5 = scmp.lt.s32.totalorder %s4389_s10, %s4389_s10 }
   0xe   :  { %p4396_p6 = por %p4395_p5, %p4394_p4 }
  0x10   :  { %p4397_p7 = pnand %p4396_p6, %p4390_p3 }
  0x12   :  { %4400 = shalt.err (!%p4397_p7)
}
  0x13   :  { %s4544_s11 = smov 128   ;;  %s4545_s12 = smov 8  }
  0x14   :  { %41 = dma.hbm_to_vmem [thread:$0]  %s6333_s2, 256, %s36_s25, [#allocation10], %s4544_s11, %s4544_s11, %s4545_s12  }
  0x15   :  { %s4546_s15 = smov [#allocation12]   ;;  %s4547_s17 = smov [#allocation6]  }
  0x16   :  { %s59_s16 = sshll.u32 %s4546_s15, 4  ;;  %s23_s18 = sshll.u32 %s4547_s17, 4  ;;  %s60_s16 = int_to_ptr.vmem [resolvable:$true] %s59_s16  ;;  %s24_s18 = int_to_ptr.vmem [resolvable:$true] %s23_s18 }
  0x17   :  { %s4401_s21 = scalar_lea.hbm %s6335_s4, 4096 }
  0x18   :  { %p4402_p8 = scmp.ne.s32.totalorder %s6335_s4, %s4401_s21  ;;  %p4405_p9 = scmp.lt.u32.totalorder %s4401_s21, %s6335_s4 }
  0x1a   :  { %p4407_p10 = pnand %p4405_p9, %p4402_p8 }
  0x1c   :  { %4410 = shalt.err (!%p4407_p10)
}
  0x1d   :  { %s4411_s2 = scalar_lea.vmem %s60_s16, 4096  ;;  %p4416_p12 = scmp.lt.s32.totalorder %s60_s16, %s60_s16 }
  0x1e   :  { %p4412_p11 = scmp.ne.s32.totalorder %s60_s16, %s4411_s2  ;;  %p4417_p13 = scmp.lt.s32.totalorder %s4411_s2, %s4411_s2 }
  0x20   :  { %p4418_p0 = por %p4417_p13, %p4416_p12 }
  0x22   :  { %p4419_p1 = pnand %p4418_p0, %p4412_p11 }
  0x24   :  { %4422 = shalt.err (!%p4419_p1)
}
  0x25   :  { %s4548_s25 = smov 256   ;;  %s4549_s27 = smov 16  }
  0x26   :  { %65 = dma.hbm_to_vmem [thread:$0]  %s6335_s4, 4096, %s60_s16, [#allocation13], %s4548_s25, %s4548_s25, %s4549_s27  }
  0x27   :  { %s4423_s9 = scalar_lea.hbm %s6332_s1, 1024 }
  0x28   :  { %p4424_p2 = scmp.ne.s32.totalorder %s6332_s1, %s4423_s9  ;;  %p4427_p3 = scmp.lt.u32.totalorder %s4423_s9, %s6332_s1 }
  0x2a   :  { %p4429_p4 = pnand %p4427_p3, %p4424_p2 }
  0x2c   :  { %4432 = shalt.err (!%p4429_p4)
}
  0x2d   :  { %s4433_s17 = scalar_lea.vmem %s24_s18, 1024  ;;  %p4438_p6 = scmp.lt.s32.totalorder %s24_s18, %s24_s18 }
  0x2e   :  { %p4434_p5 = scmp.ne.s32.totalorder %s24_s18, %s4433_s17  ;;  %p4439_p7 = scmp.lt.s32.totalorder %s4433_s17, %s4433_s17 }
  0x30   :  { %p4440_p8 = por %p4439_p7, %p4438_p6 }
  0x32   :  { %p4441_p9 = pnand %p4440_p8, %p4434_p5 }
  0x34   :  { %4444 = shalt.err (!%p4441_p9)
}
  0x35   :  { %s4550_s4 = smov 64   ;;  %s4551_s16 = smov 4  }
  0x36   :  { %29 = dma.hbm_to_vmem [thread:$0]  %s6332_s1, 1024, %s24_s18, [#allocation7], %s4550_s4, %s4550_s4, %s4551_s16  }
  0x37   :  { %s4552_s21 = smov [#allocation11]   ;;  %s4553_s23 = smov [#allocation14]  }
  0x38   :  { %s47_s22 = sshll.u32 %s4552_s21, 4  ;;  %s71_s24 = sshll.u32 %s4553_s23, 4  ;;  %s48_s22 = int_to_ptr.vmem [resolvable:$true] %s47_s22  ;;  %s72_s24 = int_to_ptr.vmem [resolvable:$true] %s71_s24 }
  0x39   :  { %s4445_s28 = scalar_lea.hbm %s6334_s3, 4096 }
  0x3a   :  { %p4446_p10 = scmp.ne.s32.totalorder %s6334_s3, %s4445_s28  ;;  %p4449_p11 = scmp.lt.u32.totalorder %s4445_s28, %s6334_s3 }
  0x3c   :  { %p4451_p12 = pnand %p4449_p11, %p4446_p10 }
  0x3e   :  { %4454 = shalt.err (!%p4451_p12)
}
  0x3f   :  { %s4455_s1 = scalar_lea.vmem %s48_s22, 4096  ;;  %p4460_p0 = scmp.lt.s32.totalorder %s48_s22, %s48_s22 }
  0x40   :  { %p4456_p13 = scmp.ne.s32.totalorder %s48_s22, %s4455_s1  ;;  %p4461_p1 = scmp.lt.s32.totalorder %s4455_s1, %s4455_s1 }
  0x42   :  { %p4462_p2 = por %p4461_p1, %p4460_p0 }
  0x44   :  { %p4463_p3 = pnand %p4462_p2, %p4456_p13 }
  0x46   :  { %4466 = shalt.err (!%p4463_p3)
}
  0x47   :  { %53 = dma.hbm_to_vmem [thread:$0]  %s6334_s3, 4096, %s48_s22, [#allocation10], %s4548_s25, %s4548_s25, %s4549_s27  }
  0x48   :  { %s4467_s15 = scalar_lea.hbm %s6336_s5, 1024 }
  0x49   :  { %p4468_p4 = scmp.ne.s32.totalorder %s6336_s5, %s4467_s15  ;;  %p4471_p5 = scmp.lt.u32.totalorder %s4467_s15, %s6336_s5 }
  0x4b   :  { %p4473_p6 = pnand %p4471_p5, %p4468_p4 }
  0x4d   :  { %4476 = shalt.err (!%p4473_p6)
}
  0x4e   :  { %s4477_s23 = scalar_lea.vmem %s72_s24, 1024  ;;  %p4482_p8 = scmp.lt.s32.totalorder %s72_s24, %s72_s24 }
  0x4f   :  { %p4478_p7 = scmp.ne.s32.totalorder %s72_s24, %s4477_s23  ;;  %p4483_p9 = scmp.lt.s32.totalorder %s4477_s23, %s4477_s23 }
  0x51   :  { %p4484_p10 = por %p4483_p9, %p4482_p8 }
  0x53   :  { %p4485_p11 = pnand %p4484_p10, %p4478_p7 }
  0x55   :  { %4488 = shalt.err (!%p4485_p11)
}
  0x56   :  { %77 = dma.hbm_to_vmem [thread:$0]  %s6336_s5, 1024, %s72_s24, [#allocation13], %s4550_s4, %s4550_s4, %s4551_s16  }
  0x57   :  { %s4554_s27 = smov [#allocation15]   ;;  %s4489_s28 = scalar_lea.hbm %s6337_s6, 16 }
  0x58   :  { %s84_s22 = sshll.u32 %s4554_s27, 4  ;;  %p4490_p12 = scmp.ne.s32.totalorder %s6337_s6, %s4489_s28  ;;  %s85_s22 = int_to_ptr.vmem [resolvable:$true] %s84_s22 }
  0x59   :  { %p4493_p13 = scmp.lt.u32.totalorder %s4489_s28, %s6337_s6 }
  0x5b   :  { %p4495_p0 = pnand %p4493_p13, %p4490_p12 }
  0x5d   :  { %4498 = shalt.err (!%p4495_p0)
}
  0x5e   :  { %s4499_s1 = scalar_lea.vmem %s85_s22, 16  ;;  %s4503_s5 = scalar_lea.vmem %s85_s22, 32 }
  0x5f   :  { %p4500_p1 = scmp.ne.s32.totalorder %s85_s22, %s4499_s1  ;;  %p4504_p2 = scmp.lt.s32.totalorder %s85_s22, %s85_s22 }
  0x60   :  { %p4505_p3 = scmp.lt.s32.totalorder %s4503_s5, %s4499_s1 }
  0x62   :  { %p4506_p4 = por %p4505_p3, %p4504_p2 }
  0x64   :  { %p4507_p5 = pnand %p4506_p4, %p4500_p1 }
  0x66   :  { %4510 = shalt.err (!%p4507_p5)
}
  0x67   :  { %87 = dma.hbm_to_vmem [thread:$0]  %s6337_s6, 16, %s85_s22, [#allocation16]  }
  0x68   :  { %4533 = dma.done.wait [#allocation7], 1024  }
  0x69   :  { %4534 = vsyncadd [#allocation7], 4294966272 }
  0x6a   :  { %4535 = dma.done.wait [#allocation10], 4352  }
  0x6b   :  { %4536 = vsyncadd [#allocation10], 4294962944 }
  0x6c   :  { %4537 = dma.done.wait [#allocation13], 5120  }
  0x6d   :  { %4538 = vsyncadd [#allocation13], 4294962176 }
  0x6e   :  { %4539 = dma.done.wait [#allocation16], 16  }
  0x6f   :  { %4540 = vsyncadd [#allocation16], 4294967280  ;;  %v6339_v0 = vmov 0.0   ;;  %p3678_p6 = scmp.le.s32.totalorder %s6331_s0, 0 }
  0x70   :  { %111 = vst [vmem:[#allocation2] sm:$0xff] %v6339_v0  ;;  %112 = vst [vmem:[#allocation2 + $0x8] sm:$0xff] %v6339_v0 }
  0x71   :  { %113 = vst [vmem:[#allocation3] sm:$0xff] %v6339_v0  ;;  %114 = vst [vmem:[#allocation3 + $0x8] sm:$0xff] %v6339_v0  ;;  %120 = sbr.rel (%p3678_p6) target bundleno = 2473 (0x9a9), region = 57 }
  0x78   :  { %v4693_v1 = vld [vmem:[#allocation12 + $0x4] ss:$16 sps:$4 sm:$0xff]   ;;  %v4695_v2 = vld [vmem:[#allocation12 + $0xc] ss:$16 sps:$4 sm:$0xff]   ;;  %v6341_v3 = vmov 0  }
  0x79   :  { %389 = vmatprep.mubr.bf16.mxu0 %v6341_v3  ;;  %430 = vmatprep.mubr.bf16.mxu1 %v6341_v3  ;;  %v4700_v4 = vld [vmem:[#allocation12] ss:$16 sps:$4 sm:$0xff]   ;;  %v4702_v5 = vld [vmem:[#allocation12 + $0x8] ss:$16 sps:$4 sm:$0xff]   ;;  %v4705_v6 = vld [vmem:[#allocation12 + $0x24] ss:$16 sps:$4 sm:$0xff]  }
  0x7a   :  { %357 = vmatprep.subr.bf16.mxu0 %v4693_v1  ;;  %398 = vmatprep.subr.bf16.mxu1 %v4695_v2  ;;  %v4709_v7 = vld [vmem:[#allocation12 + $0x2c] ss:$16 sps:$4 sm:$0xff]   ;;  %v4711_v8 = vld [vmem:[#allocation12 + $0x20] ss:$16 sps:$4 sm:$0xff]   ;;  %v4714_v9 = vld [vmem:[#allocation12 + $0x28] ss:$16 sps:$4 sm:$0xff]  }
  0x7b   :  { %358 = vmatpush1.bf16.msra.mxu0 %v4700_v4  ;;  %399 = vmatpush1.bf16.msra.mxu1 %v4702_v5  ;;  %v4717_v10 = vld [vmem:[#allocation12 + $0x44] ss:$16 sps:$4 sm:$0xff]   ;;  %v4719_v11 = vld [vmem:[#allocation12 + $0x4c] ss:$16 sps:$4 sm:$0xff]   ;;  %v4721_v12 = vld [vmem:[#allocation12 + $0x40] ss:$16 sps:$4 sm:$0xff]  }
  0x7c   :  { %359 = vmatprep.subr.bf16.mxu0 %v4705_v6  ;;  %400 = vmatprep.subr.bf16.mxu1 %v4709_v7  ;;  %v4723_v13 = vld [vmem:[#allocation12 + $0x48] ss:$16 sps:$4 sm:$0xff]   ;;  %v4727_v14 = vld [vmem:[#allocation12 + $0x64] ss:$16 sps:$4 sm:$0xff]   ;;  %v4731_v15 = vld [vmem:[#allocation12 + $0x6c] ss:$16 sps:$4 sm:$0xff]  }
  0x7d   :  { %v4733_v16 = vld [vmem:[#allocation12 + $0x60] ss:$16 sps:$4 sm:$0xff]   ;;  %v4737_v17 = vld [vmem:[#allocation12 + $0x68] ss:$16 sps:$4 sm:$0xff]   ;;  %v4739_v18 = vld [vmem:[#allocation12 + $0x84] ss:$16 sps:$4 sm:$0xff]  }
  0x7e   :  { %6515 = vst [vmem:[#allocation23_spill] sm:$0xff] %v4737_v17  ;;  %6516 = vst [vmem:[#allocation24_spill] sm:$0xff] %v4739_v18  ;;  %v4743_v19 = vld [vmem:[#allocation12 + $0x8c] ss:$16 sps:$4 sm:$0xff]   ;;  %v4745_v20 = vld [vmem:[#allocation12 + $0x80] ss:$16 sps:$4 sm:$0xff]  }
  0x7f   :  { %360 = vmatpush1.bf16.msra.mxu0 %v4711_v8  ;;  %401 = vmatpush1.bf16.msra.mxu1 %v4714_v9  ;;  %6517 = vst [vmem:[#allocation25_spill] sm:$0xff] %v4743_v19  ;;  %6518 = vst [vmem:[#allocation26_spill] sm:$0xff] %v4745_v20  ;;  %v4747_v21 = vld [vmem:[#allocation12 + $0x88] ss:$16 sps:$4 sm:$0xff]   ;;  %v4751_v22 = vld [vmem:[#allocation12 + $0xa4] ss:$16 sps:$4 sm:$0xff]  }
  0x80   :  { %361 = vmatprep.subr.bf16.mxu0 %v4717_v10  ;;  %402 = vmatprep.subr.bf16.mxu1 %v4719_v11  ;;  %6519 = vst [vmem:[#allocation27_spill] sm:$0xff] %v4747_v21  ;;  %6520 = vst [vmem:[#allocation28_spill] sm:$0xff] %v4751_v22  ;;  %v4755_v23 = vld [vmem:[#allocation12 + $0xac] ss:$16 sps:$4 sm:$0xff]   ;;  %v4757_v24 = vld [vmem:[#allocation12 + $0xa0] ss:$16 sps:$4 sm:$0xff]  }
  0x81   :  { %6521 = vst [vmem:[#allocation29_spill] sm:$0xff] %v4755_v23  ;;  %6522 = vst [vmem:[#allocation30_spill] sm:$0xff] %v4757_v24  ;;  %v4761_v25 = vld [vmem:[#allocation12 + $0xa8] ss:$16 sps:$4 sm:$0xff]   ;;  %v4763_v26 = vld [vmem:[#allocation12 + $0xc4] ss:$16 sps:$4 sm:$0xff]  }
  0x82   :  { %6523 = vst [vmem:[#allocation31_spill] sm:$0xff] %v4761_v25  ;;  %6524 = vst [vmem:[#allocation32_spill] sm:$0xff] %v4763_v26  ;;  %v4767_v27 = vld [vmem:[#allocation12 + $0xcc] ss:$16 sps:$4 sm:$0xff]   ;;  %v4769_v28 = vld [vmem:[#allocation12 + $0xc0] ss:$16 sps:$4 sm:$0xff]  }
  0x83   :  { %362 = vmatpush1.bf16.msra.mxu0 %v4721_v12  ;;  %403 = vmatpush1.bf16.msra.mxu1 %v4723_v13  ;;  %6525 = vst [vmem:[#allocation33_spill] sm:$0xff] %v4767_v27  ;;  %6526 = vst [vmem:[#allocation34_spill] sm:$0xff] %v4769_v28  ;;  %v4771_v29 = vld [vmem:[#allocation12 + $0xc8] ss:$16 sps:$4 sm:$0xff]   ;;  %v4775_v30 = vld [vmem:[#allocation12 + $0xe4] ss:$16 sps:$4 sm:$0xff]  }
  0x84   :  { %363 = vmatprep.subr.bf16.mxu0 %v4727_v14  ;;  %404 = vmatprep.subr.bf16.mxu1 %v4731_v15  ;;  %6527 = vst [vmem:[#allocation35_spill] sm:$0xff] %v4771_v29  ;;  %6528 = vst [vmem:[#allocation36_spill] sm:$0xff] %v4775_v30  ;;  %v4779_v31 = vld [vmem:[#allocation12 + $0xec] ss:$16 sps:$4 sm:$0xff]   ;;  %v4781_v32 = vld [vmem:[#allocation12 + $0xe0] ss:$16 sps:$4 sm:$0xff]  }
  0x85   :  { %6529 = vst [vmem:[#allocation37_spill] sm:$0xff] %v4779_v31  ;;  %6530 = vst [vmem:[#allocation38_spill] sm:$0xff] %v4781_v32  ;;  %v4783_v33 = vld [vmem:[#allocation12 + $0xe8] ss:$16 sps:$4 sm:$0xff]   ;;  %v4787_v34 = vld [vmem:[#allocation2] sm:$0xff] }
  0x86   :  { %6531 = vst [vmem:[#allocation39_spill] sm:$0xff] %v4783_v33  ;;  %6532 = vst [vmem:[#allocation40_spill] sm:$0xff] %v4787_v34  ;;  %v4791_v35 = vld [vmem:[#allocation11 + $0x4] ss:$16 sps:$4 sm:$0xff]   ;;  %v4793_v36 = vld [vmem:[#allocation11 + $0xc] ss:$16 sps:$4 sm:$0xff]   ;;  %v196_v37 = vpack.c.bf16 %v4787_v34, %v4787_v34 }
  0x87   :  { %364 = vmatpush1.bf16.msra.mxu0 %v4733_v16  ;;  %405 = vmatpush1.bf16.msra.mxu1 %v4737_v17  ;;  %6533 = vst [vmem:[#allocation41_spill] sm:$0xff] %v4791_v35  ;;  %6534 = vst [vmem:[#allocation42_spill] sm:$0xff] %v4793_v36  ;;  %v4797_v38 = vld [vmem:[#allocation11] ss:$16 sps:$4 sm:$0xff]   ;;  %v4799_v39 = vld [vmem:[#allocation11 + $0x8] ss:$16 sps:$4 sm:$0xff]  }
  0x88   :  { %365 = vmatprep.subr.bf16.mxu0 %v4739_v18  ;;  %406 = vmatprep.subr.bf16.mxu1 %v4743_v19  ;;  %v4803_v40 = vld [vmem:[#allocation11 + $0x24] ss:$16 sps:$4 sm:$0xff]   ;;  %v4807_v41 = vld [vmem:[#allocation11 + $0x2c] ss:$16 sps:$4 sm:$0xff]   ;;  %v4809_v42 = vld [vmem:[#allocation11 + $0x20] ss:$16 sps:$4 sm:$0xff]  }
  0x89   :  { %v4813_v43 = vld [vmem:[#allocation11 + $0x28] ss:$16 sps:$4 sm:$0xff]   ;;  %v4817_v44 = vld [vmem:[#allocation11 + $0x44] ss:$16 sps:$4 sm:$0xff]   ;;  %v4819_v45 = vld [vmem:[#allocation11 + $0x4c] ss:$16 sps:$4 sm:$0xff]  }
  0x8a   :  { %v4823_v46 = vld [vmem:[#allocation11 + $0x40] ss:$16 sps:$4 sm:$0xff]   ;;  %v4825_v47 = vld [vmem:[#allocation11 + $0x48] ss:$16 sps:$4 sm:$0xff]   ;;  %v4829_v48 = vld [vmem:[#allocation11 + $0x64] ss:$16 sps:$4 sm:$0xff]  }
  0x8b   :  { %366 = vmatpush1.bf16.msra.mxu0 %v4745_v20  ;;  %407 = vmatpush1.bf16.msra.mxu1 %v4747_v21  ;;  %v4833_v49 = vld [vmem:[#allocation11 + $0x6c] ss:$16 sps:$4 sm:$0xff]   ;;  %v4837_v50 = vld [vmem:[#allocation11 + $0x60] ss:$16 sps:$4 sm:$0xff]   ;;  %v4839_v51 = vld [vmem:[#allocation11 + $0x68] ss:$16 sps:$4 sm:$0xff]  }
  0x8c   :  { %367 = vmatprep.subr.bf16.mxu0 %v4751_v22  ;;  %408 = vmatprep.subr.bf16.mxu1 %v4755_v23  ;;  %v4843_v52 = vld [vmem:[#allocation11 + $0x84] ss:$16 sps:$4 sm:$0xff]   ;;  %v4845_v53 = vld [vmem:[#allocation11 + $0x8c] ss:$16 sps:$4 sm:$0xff]   ;;  %v4849_v54 = vld [vmem:[#allocation11 + $0x80] ss:$16 sps:$4 sm:$0xff]  }
  0x8d   :  { %v4851_v55 = vld [vmem:[#allocation11 + $0x88] ss:$16 sps:$4 sm:$0xff]   ;;  %v4855_v56 = vld [vmem:[#allocation11 + $0xa4] ss:$16 sps:$4 sm:$0xff]   ;;  %v4857_v57 = vld [vmem:[#allocation11 + $0xac] ss:$16 sps:$4 sm:$0xff]  }
  0x8e   :  { %6535 = vst [vmem:[#allocation43_spill] sm:$0xff] %v4857_v57  ;;  %v4861_v58 = vld [vmem:[#allocation11 + $0xa0] ss:$16 sps:$4 sm:$0xff]   ;;  %v4863_v59 = vld [vmem:[#allocation11 + $0xa8] ss:$16 sps:$4 sm:$0xff]  }
  0x8f   :  { %368 = vmatpush1.bf16.msra.mxu0 %v4757_v24  ;;  %409 = vmatpush1.bf16.msra.mxu1 %v4761_v25  ;;  %v4867_v60 = vld [vmem:[#allocation11 + $0xc4] ss:$16 sps:$4 sm:$0xff]   ;;  %v4869_v61 = vld [vmem:[#allocation11 + $0xcc] ss:$16 sps:$4 sm:$0xff]   ;;  %v4873_v62 = vld [vmem:[#allocation11 + $0xc0] ss:$16 sps:$4 sm:$0xff]  }
  0x90   :  { %369 = vmatprep.subr.bf16.mxu0 %v4763_v26  ;;  %410 = vmatprep.subr.bf16.mxu1 %v4767_v27  ;;  %6536 = vst [vmem:[#allocation44_spill] sm:$0xff] %v4869_v61  ;;  %v4875_v63 = vld [vmem:[#allocation11 + $0xc8] ss:$16 sps:$4 sm:$0xff]   ;;  %v4881_v0 = vld [vmem:[#allocation11 + $0xec] ss:$16 sps:$4 sm:$0xff]  }
  0x91   :  { %6537 = vst [vmem:[#allocation45_spill] sm:$0xff] %v4881_v0  ;;  %v4887_v34 = vld [vmem:[#allocation11 + $0xe8] ss:$16 sps:$4 sm:$0xff]  }
  0x93   :  { %370 = vmatpush1.bf16.msra.mxu0 %v4769_v28  ;;  %411 = vmatpush1.bf16.msra.mxu1 %v4771_v29 }
  0x94   :  { %371 = vmatprep.subr.bf16.mxu0 %v4775_v30  ;;  %412 = vmatprep.subr.bf16.mxu1 %v4779_v31 }
  0x97   :  { %372 = vmatpush1.bf16.msra.mxu0 %v4781_v32  ;;  %413 = vmatpush1.bf16.msra.mxu1 %v4783_v33 }
  0x98   :  { %599 = vmatprep.subr.bf16.mxu0 %v4791_v35  ;;  %640 = vmatprep.subr.bf16.mxu1 %v4793_v36 }
  0x9a   :  { %390 = vmatmul.mubr.bf16.vlgmr.msra.gmra.mrb[0].mxu0 %v196_v37  ;;  %431 = vmatmul.mubr.bf16.vlgmr.msra.gmra.mrb[0].mxu1 %v196_v37  ;;  %v4879_v37 = vld [vmem:[#allocation11 + $0xe4] ss:$16 sps:$4 sm:$0xff]  }
  0x9b   :  { %600 = vmatpush1.bf16.msra.mxu0 %v4797_v38  ;;  %641 = vmatpush1.bf16.msra.mxu1 %v4799_v39 }
  0x9c   :  { %601 = vmatprep.subr.bf16.mxu0 %v4803_v40  ;;  %642 = vmatprep.subr.bf16.mxu1 %v4807_v41 }
  0x9d   :  { %631 = vmatprep.mubr.bf16.mxu0 %v6341_v3  ;;  %672 = vmatprep.mubr.bf16.mxu1 %v6341_v3  ;;  %v4885_v3 = vld [vmem:[#allocation11 + $0xe0] ss:$16 sps:$4 sm:$0xff]  }
  0x9f   :  { %602 = vmatpush1.bf16.msra.mxu0 %v4809_v42  ;;  %643 = vmatpush1.bf16.msra.mxu1 %v4813_v43 }
  0xa0   :  { %603 = vmatprep.subr.bf16.mxu0 %v4817_v44  ;;  %644 = vmatprep.subr.bf16.mxu1 %v4819_v45 }
  0xa3   :  { %604 = vmatpush1.bf16.msra.mxu0 %v4823_v46  ;;  %645 = vmatpush1.bf16.msra.mxu1 %v4825_v47 }
  0xa4   :  { %605 = vmatprep.subr.bf16.mxu0 %v4829_v48  ;;  %646 = vmatprep.subr.bf16.mxu1 %v4833_v49 }
  0xa7   :  { %606 = vmatpush1.bf16.msra.mxu0 %v4837_v50  ;;  %647 = vmatpush1.bf16.msra.mxu1 %v4839_v51 }
  0xa8   :  { %607 = vmatprep.subr.bf16.mxu0 %v4843_v52  ;;  %648 = vmatprep.subr.bf16.mxu1 %v4845_v53 }
  0xab   :  { %608 = vmatpush1.bf16.msra.mxu0 %v4849_v54  ;;  %649 = vmatpush1.bf16.msra.mxu1 %v4851_v55 }
  0xac   :  { %609 = vmatprep.subr.bf16.mxu0 %v4855_v56  ;;  %650 = vmatprep.subr.bf16.mxu1 %v4857_v57 }
  0xaf   :  { %610 = vmatpush1.bf16.msra.mxu0 %v4861_v58  ;;  %651 = vmatpush1.bf16.msra.mxu1 %v4863_v59 }
  0xb0   :  { %611 = vmatprep.subr.bf16.mxu0 %v4867_v60  ;;  %652 = vmatprep.subr.bf16.mxu1 %v4869_v61  ;;  %v194_v61 = vld [vmem:[#allocation6] sm:$0xf] }
  0xb3   :  { %612 = vmatpush1.bf16.msra.mxu0 %v4873_v62  ;;  %653 = vmatpush1.bf16.msra.mxu1 %v4875_v63 }
  0xb4   :  { %613 = vmatprep.subr.bf16.mxu0 %v4879_v37  ;;  %654 = vmatprep.subr.bf16.mxu1 %v4881_v0  ;;  %v6538_v0 = vmov 0  }
  0xb7   :  { %614 = vmatpush1.bf16.msra.mxu0 %v4885_v3  ;;  %655 = vmatpush1.bf16.msra.mxu1 %v4887_v34 }
  0xb8   :  { %703 = vmatprep.subr.bf16.mxu0 %v4693_v1  ;;  %744 = vmatprep.subr.bf16.mxu1 %v4695_v2 }
  0xba   :  { %632 = vmatmul.mubr.bf16.vlgmr.msra.gmra.mrb[0].mxu0 %v194_v61  ;;  %673 = vmatmul.mubr.bf16.vlgmr.msra.gmra.mrb[0].mxu1 %v194_v61  ;;  %v4923_v61 = vld [vmem:[#allocation2 + $0x8] sm:$0xff] }
  0xbb   :  { %704 = vmatpush1.bf16.msra.mxu0 %v4700_v4  ;;  %745 = vmatpush1.bf16.msra.mxu1 %v4702_v5  ;;  %6539 = vst [vmem:[#allocation46_spill] sm:$0xff] %v4923_v61 }
  0xbc   :  { %705 = vmatprep.subr.bf16.mxu0 %v4705_v6  ;;  %746 = vmatprep.subr.bf16.mxu1 %v4709_v7 }
  0xbd   :  { %735 = vmatprep.mubr.bf16.mxu0 %v6538_v0  ;;  %776 = vmatprep.mubr.bf16.mxu1 %v6538_v0 }
  0xbf   :  { %706 = vmatpush1.bf16.msra.mxu0 %v4711_v8  ;;  %747 = vmatpush1.bf16.msra.mxu1 %v4714_v9 }
  0xc0   :  { %707 = vmatprep.subr.bf16.mxu0 %v4717_v10  ;;  %748 = vmatprep.subr.bf16.mxu1 %v4719_v11 }
  0xc3   :  { %708 = vmatpush1.bf16.msra.mxu0 %v4721_v12  ;;  %749 = vmatpush1.bf16.msra.mxu1 %v4723_v13 }
  0xc4   :  { %709 = vmatprep.subr.bf16.mxu0 %v4727_v14  ;;  %750 = vmatprep.subr.bf16.mxu1 %v4731_v15 }
  0xc7   :  { %710 = vmatpush1.bf16.msra.mxu0 %v4733_v16  ;;  %751 = vmatpush1.bf16.msra.mxu1 %v4737_v17 }
  0xc8   :  { %711 = vmatprep.subr.bf16.mxu0 %v4739_v18  ;;  %752 = vmatprep.subr.bf16.mxu1 %v4743_v19 }
  0xcb   :  { %712 = vmatpush1.bf16.msra.mxu0 %v4745_v20  ;;  %753 = vmatpush1.bf16.msra.mxu1 %v4747_v21 }
  0xcc   :  { %713 = vmatprep.subr.bf16.mxu0 %v4751_v22  ;;  %754 = vmatprep.subr.bf16.mxu1 %v4755_v23  ;;  %v702_v23 = vpack.c.bf16 %v4923_v61, %v4923_v61  ;;  %v6541_v61 = vld [vmem:[#allocation45_spill] sm:$0xff] }
  0xcf   :  { %714 = vmatpush1.bf16.msra.mxu0 %v4757_v24  ;;  %755 = vmatpush1.bf16.msra.mxu1 %v4761_v25 }
  0xd0   :  { %715 = vmatprep.subr.bf16.mxu0 %v4763_v26  ;;  %756 = vmatprep.subr.bf16.mxu1 %v4767_v27 }
  0xd3   :  { %716 = vmatpush1.bf16.msra.mxu0 %v4769_v28  ;;  %757 = vmatpush1.bf16.msra.mxu1 %v4771_v29 }
  0xd4   :  { %717 = vmatprep.subr.bf16.mxu0 %v4775_v30  ;;  %758 = vmatprep.subr.bf16.mxu1 %v4779_v31 }
  0xd7   :  { %718 = vmatpush1.bf16.msra.mxu0 %v4781_v32  ;;  %759 = vmatpush1.bf16.msra.mxu1 %v4783_v33 }
  0xd8   :  { %785 = vmatprep.subr.bf16.mxu0 %v4791_v35  ;;  %826 = vmatprep.subr.bf16.mxu1 %v4793_v36 }
  0xda   :  { %736 = vmatmul.mubr.bf16.vlgmr.msra.gmra.mrb[4].mxu0 %v702_v23  ;;  %777 = vmatmul.mubr.bf16.vlgmr.msra.gmra.mrb[4].mxu1 %v702_v23  ;;  %v6540_v23 = vld [vmem:[#allocation44_spill] sm:$0xff] }
  0xdb   :  { %786 = vmatpush1.bf16.msra.mxu0 %v4797_v38  ;;  %827 = vmatpush1.bf16.msra.mxu1 %v4799_v39 }
  0xdc   :  { %787 = vmatprep.subr.bf16.mxu0 %v4803_v40  ;;  %828 = vmatprep.subr.bf16.mxu1 %v4807_v41 }
  0xdd   :  { %817 = vmatprep.mubr.bf16.mxu0 %v6538_v0  ;;  %858 = vmatprep.mubr.bf16.mxu1 %v6538_v0 }
  0xdf   :  { %788 = vmatpush1.bf16.msra.mxu0 %v4809_v42  ;;  %829 = vmatpush1.bf16.msra.mxu1 %v4813_v43 }
  0xe0   :  { %789 = vmatprep.subr.bf16.mxu0 %v4817_v44  ;;  %830 = vmatprep.subr.bf16.mxu1 %v4819_v45 }
  0xe3   :  { %790 = vmatpush1.bf16.msra.mxu0 %v4823_v46  ;;  %831 = vmatpush1.bf16.msra.mxu1 %v4825_v47 }
  0xe4   :  { %791 = vmatprep.subr.bf16.mxu0 %v4829_v48  ;;  %832 = vmatprep.subr.bf16.mxu1 %v4833_v49 }
  0xe7   :  { %792 = vmatpush1.bf16.msra.mxu0 %v4837_v50  ;;  %833 = vmatpush1.bf16.msra.mxu1 %v4839_v51 }
  0xe8   :  { %793 = vmatprep.subr.bf16.mxu0 %v4843_v52  ;;  %834 = vmatprep.subr.bf16.mxu1 %v4845_v53 }
  0xeb   :  { %794 = vmatpush1.bf16.msra.mxu0 %v4849_v54  ;;  %835 = vmatpush1.bf16.msra.mxu1 %v4851_v55 }
  0xec   :  { %795 = vmatprep.subr.bf16.mxu0 %v4855_v56  ;;  %836 = vmatprep.subr.bf16.mxu1 %v4857_v57  ;;  %v195_v57 = vld [vmem:[#allocation6 + $0x4] sm:$0xf] }
  0xef   :  { %796 = vmatpush1.bf16.msra.mxu0 %v4861_v58  ;;  %837 = vmatpush1.bf16.msra.mxu1 %v4863_v59 }
  0xf0   :  { %797 = vmatprep.subr.bf16.mxu0 %v4867_v60  ;;  %838 = vmatprep.subr.bf16.mxu1 %v6540_v23 }
  0xf3   :  { %798 = vmatpush1.bf16.msra.mxu0 %v4873_v62  ;;  %839 = vmatpush1.bf16.msra.mxu1 %v4875_v63 }
  0xf4   :  { %799 = vmatprep.subr.bf16.mxu0 %v4879_v37  ;;  %840 = vmatprep.subr.bf16.mxu1 %v6541_v61 }
  0xf7   :  { %800 = vmatpush1.bf16.msra.mxu0 %v4885_v3  ;;  %841 = vmatpush1.bf16.msra.mxu1 %v4887_v34 }
  0xf8   :  { %892 = vmatprep.subr.bf16.mxu0 %v4693_v1  ;;  %933 = vmatprep.subr.bf16.mxu1 %v4695_v2 }
  0xfa   :  { %818 = vmatmul.mubr.bf16.vlgmr.msra.gmra.mrb[4].mxu0 %v195_v57  ;;  %859 = vmatmul.mubr.bf16.vlgmr.msra.gmra.mrb[4].mxu1 %v195_v57  ;;  %v6542_v57 = vld [vmem:[#allocation29_spill] sm:$0xff] }
  0xfb   :  { %893 = vmatpush1.bf16.msra.mxu0 %v4700_v4  ;;  %934 = vmatpush1.bf16.msra.mxu1 %v4702_v5 }
  0xfc   :  { %894 = vmatprep.subr.bf16.mxu0 %v4705_v6  ;;  %935 = vmatprep.subr.bf16.mxu1 %v4709_v7 }
  0xfd   :  { %924 = vmatprep.mubr.bf16.mxu0 %v6538_v0  ;;  %965 = vmatprep.mubr.bf16.mxu1 %v6538_v0 }
  0xff   :  { %895 = vmatpush1.bf16.msra.mxu0 %v4711_v8  ;;  %936 = vmatpush1.bf16.msra.mxu1 %v4714_v9 }
 0x100   :  { %896 = vmatprep.subr.bf16.mxu0 %v4717_v10  ;;  %937 = vmatprep.subr.bf16.mxu1 %v4719_v11 }
 0x103   :  { %897 = vmatpush1.bf16.msra.mxu0 %v4721_v12  ;;  %938 = vmatpush1.bf16.msra.mxu1 %v4723_v13 }
 0x104   :  { %898 = vmatprep.subr.bf16.mxu0 %v4727_v14  ;;  %939 = vmatprep.subr.bf16.mxu1 %v4731_v15 }
 0x107   :  { %899 = vmatpush1.bf16.msra.mxu0 %v4733_v16  ;;  %940 = vmatpush1.bf16.msra.mxu1 %v4737_v17  ;;  %v5001_v17 = vld [vmem:[#allocation9] sm:$0xff] }
 0x108   :  { %900 = vmatprep.subr.bf16.mxu0 %v4739_v18  ;;  %941 = vmatprep.subr.bf16.mxu1 %v4743_v19  ;;  %v191_v19 = vld [vmem:[#allocation3] sm:$0xff]  ;;  %6543 = vst [vmem:[#allocation44_spill] sm:$0xff] %v5001_v17  ;;  %vm699_vm0 = vcmp.gt.s32.totalorder %v5001_v17, 0 }
 0x109   :  { %v6560_v17 = vld [vmem:[#allocation33_spill] sm:$0xff] }
 0x10b   :  { %901 = vmatpush1.bf16.msra.mxu0 %v4745_v20  ;;  %942 = vmatpush1.bf16.msra.mxu1 %v4747_v21 }
 0x10c   :  { %902 = vmatprep.subr.bf16.mxu0 %v4751_v22  ;;  %943 = vmatprep.subr.bf16.mxu1 %v6542_v57 }
 0x10f   :  { %903 = vmatpush1.bf16.msra.mxu0 %v4757_v24  ;;  %944 = vmatpush1.bf16.msra.mxu1 %v4761_v25 }
 0x110   :  { %904 = vmatprep.subr.bf16.mxu0 %v4763_v26  ;;  %945 = vmatprep.subr.bf16.mxu1 %v4767_v27 }
 0x113   :  { %905 = vmatpush1.bf16.msra.mxu0 %v4769_v28  ;;  %946 = vmatpush1.bf16.msra.mxu1 %v4771_v29 }
 0x114   :  { %906 = vmatprep.subr.bf16.mxu0 %v4775_v30  ;;  %947 = vmatprep.subr.bf16.mxu1 %v4779_v31 }
 0x117   :  { %907 = vmatpush1.bf16.msra.mxu0 %v4781_v32  ;;  %948 = vmatpush1.bf16.msra.mxu1 %v4783_v33 }
 0x118   :  { %974 = vmatprep.subr.bf16.mxu0 %v4791_v35  ;;  %1015 = vmatprep.subr.bf16.mxu1 %v4793_v36 }
 0x18d   :  { %v633_v25 = vpop.f32.mrb[0].mxu0  ;;  %v674_v26 = vpop.f32.mrb[0].mxu1 }
 0x18e   :  { %v681_v24 = vmul.f32 0.5, %v633_v25  ;;  %v635_v27 = vpop.f32.mrb[1].mxu0  ;;  %v676_v57 = vpop.f32.mrb[1].mxu1 }
 0x18f   :  { %v685_v28 = vmul.f32 0.5, %v635_v27  ;;  %v637_v22 = vpop.f32.mrb[2].mxu0  ;;  %v678_v29 = vpop.f32.mrb[2].mxu1  ;;  %v690_v32 = vmul.f32 0.5, %v676_v57 }
 0x190   :  { %4021 = vtanh.f32 %v681_v24  ;;  %v638_v30 = vpop.f32.mrb[3].mxu0  ;;  %v679_v21 = vpop.f32.mrb[3].mxu1 }
 0x191   :  { %4023 = vtanh.f32 %v685_v28 }
 0x192   :  { %4025 = vtanh.f32 %v674_v26 }
 0x193   :  { %4027 = vtanh.f32 %v690_v32  ;;  %v6545_v32 = vld [vmem:[#allocation40_spill] sm:$0xff] }
 0x19a   :  { %v4022_v31 = vpop.eup %4021 }
 0x19b   :  { %v4024_v33 = vpop.eup %4023  ;;  %v683_v20 = vmul.f32 0.5, %v4022_v31 }
 0x19c   :  { %v687_v35 = vmul.f32 0.5, %v4024_v33  ;;  %v4026_v18 = vpop.eup %4025 }
 0x19d   :  { %v684_v36 = vadd.f32 0.5, %v683_v20  ;;  %v4028_v26 = vpop.eup %4027 }
 0x19e   :  { %v688_v25 = vadd.f32 0.5, %v687_v35  ;;  %v692_v28 = vmul.f32 0.5, %v4028_v26 }
 0x19f   :  { %v695_v27 = vmul.f32 %v4026_v18, %v684_v36  ;;  %v6547_v18 = vld [vmem:[#allocation43_spill] sm:$0xff] }
 0x1a0   :  { %v694_v22 = vmul.f32 %v688_v25, %v191_v19  ;;  %v693_v29 = vadd.f32 0.5, %v692_v28 }
 0x1a2   :  { %v696_v24 = vadd.f32 %v695_v27, %v694_v22 }
 0x1a4   :  { %4029 = vtanh.f32 %v696_v24  ;;  %v5004_v21 = vsel %vm699_vm0, %v696_v24, %v191_v19 }
 0x1a5   :  { %6544 = vst [vmem:[#allocation45_spill] sm:$0xff] %v5004_v21 }
 0x1ae   :  { %v4030_v30 = vpop.eup %4029 }
 0x1af   :  { %v698_v31 = vmul.f32 %v4030_v30, %v693_v29  ;;  %v889_v29 = vld [vmem:[#allocation6 + $0x8] sm:$0xf] }
 0x1b1   :  { %v5007_v20 = vsel %vm699_vm0, %v698_v31, %v6545_v32 }
 0x1b2   :  { %6546 = vst [vmem:[#allocation40_spill] sm:$0xff] %v5007_v20  ;;  %v891_v33 = vpack.c.bf16 %v5007_v20, %v5007_v20  ;;  %v6559_v20 = vld [vmem:[#allocation32_spill] sm:$0xff] }
 0x1b4   :  { %925 = vmatmul.mubr.bf16.vlgmr.msra.gmra.mrb[8].mxu0 %v891_v33  ;;  %966 = vmatmul.mubr.bf16.vlgmr.msra.gmra.mrb[8].mxu1 %v891_v33 }
 0x1b5   :  { %975 = vmatpush1.bf16.msra.mxu0 %v4797_v38  ;;  %1016 = vmatpush1.bf16.msra.mxu1 %v4799_v39 }
 0x1b6   :  { %976 = vmatprep.subr.bf16.mxu0 %v4803_v40  ;;  %1017 = vmatprep.subr.bf16.mxu1 %v4807_v41 }
 0x1b7   :  { %1006 = vmatprep.mubr.bf16.mxu0 %v6538_v0  ;;  %1047 = vmatprep.mubr.bf16.mxu1 %v6538_v0 }
 0x1b9   :  { %977 = vmatpush1.bf16.msra.mxu0 %v4809_v42  ;;  %1018 = vmatpush1.bf16.msra.mxu1 %v4813_v43 }
 0x1ba   :  { %978 = vmatprep.subr.bf16.mxu0 %v4817_v44  ;;  %1019 = vmatprep.subr.bf16.mxu1 %v4819_v45 }
 0x1bd   :  { %979 = vmatpush1.bf16.msra.mxu0 %v4823_v46  ;;  %1020 = vmatpush1.bf16.msra.mxu1 %v4825_v47 }
 0x1be   :  { %980 = vmatprep.subr.bf16.mxu0 %v4829_v48  ;;  %1021 = vmatprep.subr.bf16.mxu1 %v4833_v49 }
 0x1c1   :  { %981 = vmatpush1.bf16.msra.mxu0 %v4837_v50  ;;  %1022 = vmatpush1.bf16.msra.mxu1 %v4839_v51 }
 0x1c2   :  { %982 = vmatprep.subr.bf16.mxu0 %v4843_v52  ;;  %1023 = vmatprep.subr.bf16.mxu1 %v4845_v53 }
 0x1c5   :  { %983 = vmatpush1.bf16.msra.mxu0 %v4849_v54  ;;  %1024 = vmatpush1.bf16.msra.mxu1 %v4851_v55 }
 0x1c6   :  { %984 = vmatprep.subr.bf16.mxu0 %v4855_v56  ;;  %1025 = vmatprep.subr.bf16.mxu1 %v6547_v18 }
 0x1c9   :  { %985 = vmatpush1.bf16.msra.mxu0 %v4861_v58  ;;  %1026 = vmatpush1.bf16.msra.mxu1 %v4863_v59 }
 0x1ca   :  { %986 = vmatprep.subr.bf16.mxu0 %v4867_v60  ;;  %1027 = vmatprep.subr.bf16.mxu1 %v6540_v23 }
 0x1cd   :  { %987 = vmatpush1.bf16.msra.mxu0 %v4873_v62  ;;  %1028 = vmatpush1.bf16.msra.mxu1 %v4875_v63  ;;  %v819_v19 = vpop.f32.mrb[4].mxu0  ;;  %v860_v35 = vpop.f32.mrb[4].mxu1 }
 0x1ce   :  { %v867_v36 = vmul.f32 0.5, %v819_v19  ;;  %v821_v57 = vpop.f32.mrb[5].mxu0  ;;  %v862_v25 = vpop.f32.mrb[5].mxu1  ;;  %988 = vmatprep.subr.bf16.mxu0 %v4879_v37  ;;  %1029 = vmatprep.subr.bf16.mxu1 %v6541_v61 }
 0x1cf   :  { %v871_v27 = vmul.f32 0.5, %v821_v57  ;;  %v823_v22 = vpop.f32.mrb[6].mxu0  ;;  %v864_v24 = vpop.f32.mrb[6].mxu1  ;;  %v876_v30 = vmul.f32 0.5, %v862_v25 }
 0x1d0   :  { %4031 = vtanh.f32 %v867_v36  ;;  %v824_v26 = vpop.f32.mrb[7].mxu0  ;;  %v865_v28 = vpop.f32.mrb[7].mxu1  ;;  %v193_v36 = vld [vmem:[#allocation3 + $0x8] sm:$0xff] }
 0x1d1   :  { %4033 = vtanh.f32 %v871_v27  ;;  %989 = vmatpush1.bf16.msra.mxu0 %v4885_v3  ;;  %1030 = vmatpush1.bf16.msra.mxu1 %v4887_v34  ;;  %v5059_v27 = vld [vmem:[#allocation9 + $0x8] sm:$0xff] }
 0x1d2   :  { %1078 = vmatprep.subr.bf16.mxu0 %v4693_v1  ;;  %1119 = vmatprep.subr.bf16.mxu1 %v4695_v2  ;;  %4035 = vtanh.f32 %v860_v35  ;;  %6548 = vst [vmem:[#allocation43_spill] sm:$0xff] %v5059_v27  ;;  %v6549_v26 = vld [vmem:[#allocation23_spill] sm:$0xff]  ;;  %vm885_vm1 = vcmp.gt.s32.totalorder %v5059_v27, 0  ;;  %vm1260_vm3 = vcmp.gt.s32.totalorder %v5059_v27, 1 }
 0x1d3   :  { %4037 = vtanh.f32 %v876_v30  ;;  %v6551_v30 = vld [vmem:[#allocation25_spill] sm:$0xff] }
 0x1d4   :  { %1007 = vmatmul.mubr.bf16.vlgmr.msra.gmra.mrb[8].mxu0 %v889_v29  ;;  %1048 = vmatmul.mubr.bf16.vlgmr.msra.gmra.mrb[8].mxu1 %v889_v29  ;;  %v6550_v29 = vld [vmem:[#allocation24_spill] sm:$0xff] }
 0x1d5   :  { %1079 = vmatpush1.bf16.msra.mxu0 %v4700_v4  ;;  %1120 = vmatpush1.bf16.msra.mxu1 %v4702_v5  ;;  %v5395_v27 = vld [vmem:[#allocation11 + $0xc0] ss:$16 sps:$4 sm:$0xff]  }
 0x1d6   :  { %1080 = vmatprep.subr.bf16.mxu0 %v4705_v6  ;;  %1121 = vmatprep.subr.bf16.mxu1 %v4709_v7  ;;  %6609 = vst [vmem:[#allocation51_spill] sm:$0xff] %v5395_v27 }
 0x1d7   :  { %1110 = vmatprep.mubr.bf16.mxu0 %v6538_v0  ;;  %1151 = vmatprep.mubr.bf16.mxu1 %v6538_v0 }
 0x1d9   :  { %1081 = vmatpush1.bf16.msra.mxu0 %v4711_v8  ;;  %1122 = vmatpush1.bf16.msra.mxu1 %v4714_v9 }
 0x1da   :  { %v4032_v31 = vpop.eup %4031  ;;  %1082 = vmatprep.subr.bf16.mxu0 %v4717_v10  ;;  %1123 = vmatprep.subr.bf16.mxu1 %v4719_v11 }
 0x1db   :  { %v4034_v32 = vpop.eup %4033  ;;  %v869_v33 = vmul.f32 0.5, %v4032_v31 }
 0x1dc   :  { %v873_v19 = vmul.f32 0.5, %v4034_v32  ;;  %v4036_v57 = vpop.eup %4035  ;;  %v6553_v32 = vld [vmem:[#allocation26_spill] sm:$0xff] }
 0x1dd   :  { %v870_v35 = vadd.f32 0.5, %v869_v33  ;;  %1083 = vmatpush1.bf16.msra.mxu0 %v4721_v12  ;;  %1124 = vmatpush1.bf16.msra.mxu1 %v4723_v13  ;;  %v6554_v33 = vld [vmem:[#allocation27_spill] sm:$0xff] }
 0x1de   :  { %v874_v25 = vadd.f32 0.5, %v873_v19  ;;  %1084 = vmatprep.subr.bf16.mxu0 %v4727_v14  ;;  %1125 = vmatprep.subr.bf16.mxu1 %v4731_v15  ;;  %v4038_v19 = vpop.eup %4037 }
 0x1df   :  { %v881_v22 = vmul.f32 %v4036_v57, %v870_v35  ;;  %v6555_v35 = vld [vmem:[#allocation28_spill] sm:$0xff]  ;;  %v6556_v57 = vld [vmem:[#allocation29_spill] sm:$0xff] }
 0x1e0   :  { %v880_v24 = vmul.f32 %v874_v25, %v193_v36  ;;  %v878_v25 = vmul.f32 0.5, %v4038_v19  ;;  %v6565_v19 = vld [vmem:[#allocation38_spill] sm:$0xff] }
 0x1e1   :  { %1085 = vmatpush1.bf16.msra.mxu0 %v4733_v16  ;;  %1126 = vmatpush1.bf16.msra.mxu1 %v6549_v26 }
 0x1e2   :  { %v882_v28 = vadd.f32 %v881_v22, %v880_v24  ;;  %1086 = vmatprep.subr.bf16.mxu0 %v6550_v29  ;;  %1127 = vmatprep.subr.bf16.mxu1 %v6551_v30  ;;  %v6557_v22 = vld [vmem:[#allocation30_spill] sm:$0xff]  ;;  %v6558_v24 = vld [vmem:[#allocation31_spill] sm:$0xff] }
 0x1e4   :  { %4039 = vtanh.f32 %v882_v28  ;;  %v5068_v31 = vsel %vm885_vm1, %v882_v28, %v193_v36  ;;  %v879_v36 = vadd.f32 0.5, %v878_v25  ;;  %v6561_v28 = vld [vmem:[#allocation34_spill] sm:$0xff]  ;;  %v6568_v25 = vld [vmem:[#allocation41_spill] sm:$0xff] }
 0x1e5   :  { %6552 = vst [vmem:[#allocation23_spill] sm:$0xff] %v5068_v31  ;;  %1087 = vmatpush1.bf16.msra.mxu0 %v6553_v32  ;;  %1128 = vmatpush1.bf16.msra.mxu1 %v6554_v33  ;;  %v6562_v31 = vld [vmem:[#allocation35_spill] sm:$0xff]  ;;  %v6563_v33 = vld [vmem:[#allocation36_spill] sm:$0xff] }
 0x1e6   :  { %1088 = vmatprep.subr.bf16.mxu0 %v6555_v35  ;;  %1129 = vmatprep.subr.bf16.mxu1 %v6556_v57  ;;  %v6564_v35 = vld [vmem:[#allocation37_spill] sm:$0xff] }
 0x1e9   :  { %1089 = vmatpush1.bf16.msra.mxu0 %v6557_v22  ;;  %1130 = vmatpush1.bf16.msra.mxu1 %v6558_v24  ;;  %v6566_v22 = vld [vmem:[#allocation39_spill] sm:$0xff]  ;;  %v6567_v24 = vld [vmem:[#allocation46_spill] sm:$0xff] }
 0x1ea   :  { %1090 = vmatprep.subr.bf16.mxu0 %v6559_v20  ;;  %1131 = vmatprep.subr.bf16.mxu1 %v6560_v17 }
 0x1ed   :  { %1091 = vmatpush1.bf16.msra.mxu0 %v6561_v28  ;;  %1132 = vmatpush1.bf16.msra.mxu1 %v6562_v31  ;;  %v6569_v28 = vld [vmem:[#allocation42_spill] sm:$0xff] }
 0x1ee   :  { %v4040_v21 = vpop.eup %4039  ;;  %1092 = vmatprep.subr.bf16.mxu0 %v6563_v33  ;;  %1133 = vmatprep.subr.bf16.mxu1 %v6564_v35 }
 0x1ef   :  { %v884_v57 = vmul.f32 %v4040_v21, %v879_v36  ;;  %v890_v21 = vld [vmem:[#allocation6 + $0xc] sm:$0xf] }
 0x1f1   :  { %1093 = vmatpush1.bf16.msra.mxu0 %v6565_v19  ;;  %1134 = vmatpush1.bf16.msra.mxu1 %v6566_v22  ;;  %v5087_v20 = vsel %vm885_vm1, %v884_v57, %v6567_v24 }
 0x1f2   :  { %1160 = vmatprep.subr.bf16.mxu0 %v6568_v25  ;;  %1201 = vmatprep.subr.bf16.mxu1 %v6569_v28  ;;  %v1077_v31 = vpack.c.bf16 %v5087_v20, %v5087_v20 }
 0x1f4   :  { %1111 = vmatmul.mubr.bf16.vlgmr.msra.gmra.mrb[12].mxu0 %v1077_v31  ;;  %1152 = vmatmul.mubr.bf16.vlgmr.msra.gmra.mrb[12].mxu1 %v1077_v31 }
 0x1f5   :  { %1161 = vmatpush1.bf16.msra.mxu0 %v4797_v38  ;;  %1202 = vmatpush1.bf16.msra.mxu1 %v4799_v39 }
 0x1f6   :  { %1162 = vmatprep.subr.bf16.mxu0 %v4803_v40  ;;  %1203 = vmatprep.subr.bf16.mxu1 %v4807_v41 }
 0x1f7   :  { %1192 = vmatprep.mubr.bf16.mxu0 %v6538_v0  ;;  %1233 = vmatprep.mubr.bf16.mxu1 %v6538_v0 }
 0x1f9   :  { %1163 = vmatpush1.bf16.msra.mxu0 %v4809_v42  ;;  %1204 = vmatpush1.bf16.msra.mxu1 %v4813_v43 }
 0x1fa   :  { %1164 = vmatprep.subr.bf16.mxu0 %v4817_v44  ;;  %1205 = vmatprep.subr.bf16.mxu1 %v4819_v45 }
 0x1fd   :  { %1165 = vmatpush1.bf16.msra.mxu0 %v4823_v46  ;;  %1206 = vmatpush1.bf16.msra.mxu1 %v4825_v47 }
 0x1fe   :  { %1166 = vmatprep.subr.bf16.mxu0 %v4829_v48  ;;  %1207 = vmatprep.subr.bf16.mxu1 %v4833_v49 }
 0x201   :  { %1167 = vmatpush1.bf16.msra.mxu0 %v4837_v50  ;;  %1208 = vmatpush1.bf16.msra.mxu1 %v4839_v51 }
 0x202   :  { %1168 = vmatprep.subr.bf16.mxu0 %v4843_v52  ;;  %1209 = vmatprep.subr.bf16.mxu1 %v4845_v53 }
 0x205   :  { %1169 = vmatpush1.bf16.msra.mxu0 %v4849_v54  ;;  %1210 = vmatpush1.bf16.msra.mxu1 %v4851_v55 }
 0x206   :  { %1170 = vmatprep.subr.bf16.mxu0 %v4855_v56  ;;  %1211 = vmatprep.subr.bf16.mxu1 %v6547_v18 }
 0x209   :  { %1171 = vmatpush1.bf16.msra.mxu0 %v4861_v58  ;;  %1212 = vmatpush1.bf16.msra.mxu1 %v4863_v59 }
 0x20a   :  { %1172 = vmatprep.subr.bf16.mxu0 %v4867_v60  ;;  %1213 = vmatprep.subr.bf16.mxu1 %v6540_v23 }
 0x20d   :  { %1173 = vmatpush1.bf16.msra.mxu0 %v4873_v62  ;;  %1214 = vmatpush1.bf16.msra.mxu1 %v4875_v63 }
 0x20e   :  { %1174 = vmatprep.subr.bf16.mxu0 %v4879_v37  ;;  %1215 = vmatprep.subr.bf16.mxu1 %v6541_v61 }
 0x211   :  { %1175 = vmatpush1.bf16.msra.mxu0 %v4885_v3  ;;  %1216 = vmatpush1.bf16.msra.mxu1 %v4887_v34 }
 0x212   :  { %1267 = vmatprep.subr.bf16.mxu0 %v4693_v1  ;;  %1308 = vmatprep.subr.bf16.mxu1 %v4695_v2  ;;  %v6570_v1 = vld [vmem:[#allocation27_spill] sm:$0xff]  ;;  %v6571_v2 = vld [vmem:[#allocation28_spill] sm:$0xff] }
 0x214   :  { %1193 = vmatmul.mubr.bf16.vlgmr.msra.gmra.mrb[12].mxu0 %v890_v21  ;;  %1234 = vmatmul.mubr.bf16.vlgmr.msra.gmra.mrb[12].mxu1 %v890_v21 }
 0x215   :  { %1268 = vmatpush1.bf16.msra.mxu0 %v4700_v4  ;;  %1309 = vmatpush1.bf16.msra.mxu1 %v4702_v5  ;;  %v6572_v4 = vld [vmem:[#allocation29_spill] sm:$0xff]  ;;  %v6573_v5 = vld [vmem:[#allocation30_spill] sm:$0xff] }
 0x216   :  { %1269 = vmatprep.subr.bf16.mxu0 %v4705_v6  ;;  %1310 = vmatprep.subr.bf16.mxu1 %v4709_v7  ;;  %v6574_v6 = vld [vmem:[#allocation31_spill] sm:$0xff]  ;;  %v6575_v7 = vld [vmem:[#allocation32_spill] sm:$0xff] }
 0x217   :  { %1299 = vmatprep.mubr.bf16.mxu0 %v6538_v0  ;;  %1340 = vmatprep.mubr.bf16.mxu1 %v6538_v0 }
 0x219   :  { %1270 = vmatpush1.bf16.msra.mxu0 %v4711_v8  ;;  %1311 = vmatpush1.bf16.msra.mxu1 %v4714_v9  ;;  %v6576_v8 = vld [vmem:[#allocation34_spill] sm:$0xff]  ;;  %v6577_v9 = vld [vmem:[#allocation35_spill] sm:$0xff] }
 0x21a   :  { %1271 = vmatprep.subr.bf16.mxu0 %v4717_v10  ;;  %1312 = vmatprep.subr.bf16.mxu1 %v4719_v11 }
 0x21d   :  { %1272 = vmatpush1.bf16.msra.mxu0 %v4721_v12  ;;  %1313 = vmatpush1.bf16.msra.mxu1 %v4723_v13 }
 0x21e   :  { %1273 = vmatprep.subr.bf16.mxu0 %v4727_v14  ;;  %1314 = vmatprep.subr.bf16.mxu1 %v4731_v15 }
 0x221   :  { %1274 = vmatpush1.bf16.msra.mxu0 %v4733_v16  ;;  %1315 = vmatpush1.bf16.msra.mxu1 %v6549_v26 }
 0x222   :  { %1275 = vmatprep.subr.bf16.mxu0 %v6550_v29  ;;  %1316 = vmatprep.subr.bf16.mxu1 %v6551_v30 }
 0x225   :  { %1276 = vmatpush1.bf16.msra.mxu0 %v6553_v32  ;;  %1317 = vmatpush1.bf16.msra.mxu1 %v6570_v1 }
 0x226   :  { %1277 = vmatprep.subr.bf16.mxu0 %v6571_v2  ;;  %1318 = vmatprep.subr.bf16.mxu1 %v6572_v4 }
 0x229   :  { %1278 = vmatpush1.bf16.msra.mxu0 %v6573_v5  ;;  %1319 = vmatpush1.bf16.msra.mxu1 %v6574_v6 }
 0x22a   :  { %1279 = vmatprep.subr.bf16.mxu0 %v6575_v7  ;;  %1320 = vmatprep.subr.bf16.mxu1 %v6560_v17 }
 0x22d   :  { %1280 = vmatpush1.bf16.msra.mxu0 %v6576_v8  ;;  %1321 = vmatpush1.bf16.msra.mxu1 %v6577_v9  ;;  %v6580_v8 = vld [vmem:[#allocation40_spill] sm:$0xff] }
 0x22e   :  { %1281 = vmatprep.subr.bf16.mxu0 %v6563_v33  ;;  %1322 = vmatprep.subr.bf16.mxu1 %v6564_v35 }
 0x231   :  { %1282 = vmatpush1.bf16.msra.mxu0 %v6565_v19  ;;  %1323 = vmatpush1.bf16.msra.mxu1 %v6566_v22 }
 0x232   :  { %1349 = vmatprep.subr.bf16.mxu0 %v6568_v25  ;;  %1390 = vmatprep.subr.bf16.mxu1 %v6569_v28  ;;  %v6578_v28 = vld [vmem:[#allocation45_spill] sm:$0xff]  ;;  %v6579_v25 = vld [vmem:[#allocation44_spill] sm:$0xff] }
 0x233   :  { %vm1074_vm2 = vcmp.gt.s32.totalorder %v6579_v25, 1  ;;  %vm1449_vm4 = vcmp.gt.s32.totalorder %v6579_v25, 2 }
 0x2a7   :  { %v1008_v10 = vpop.f32.mrb[8].mxu0  ;;  %v1049_v11 = vpop.f32.mrb[8].mxu1 }
 0x2a8   :  { %v1056_v12 = vmul.f32 0.5, %v1008_v10  ;;  %v1010_v13 = vpop.f32.mrb[9].mxu0  ;;  %v1051_v14 = vpop.f32.mrb[9].mxu1 }
 0x2a9   :  { %v1060_v15 = vmul.f32 0.5, %v1010_v13  ;;  %v1012_v16 = vpop.f32.mrb[10].mxu0  ;;  %v1053_v17 = vpop.f32.mrb[10].mxu1  ;;  %v1065_v30 = vmul.f32 0.5, %v1051_v14  ;;  %v5244_v13 = vld [vmem:[#allocation12 + $0x6c] ss:$16 sps:$4 sm:$0xff]  }
 0x2aa   :  { %4041 = vtanh.f32 %v1056_v12  ;;  %v1013_v26 = vpop.f32.mrb[11].mxu0  ;;  %v1054_v29 = vpop.f32.mrb[11].mxu1  ;;  %v5241_v12 = vld [vmem:[#allocation12 + $0x64] ss:$16 sps:$4 sm:$0xff]   ;;  %6581 = vst [vmem:[#allocation24_spill] sm:$0xff] %v5244_v13 }
 0x2ab   :  { %4043 = vtanh.f32 %v1060_v15  ;;  %v6582_v15 = vld [vmem:[#allocation23_spill] sm:$0xff] }
 0x2ac   :  { %4045 = vtanh.f32 %v1049_v11  ;;  %v5248_v17 = vld [vmem:[#allocation12 + $0x60] ss:$16 sps:$4 sm:$0xff]   ;;  %v5251_v26 = vld [vmem:[#allocation12 + $0x68] ss:$16 sps:$4 sm:$0xff]  }
 0x2ad   :  { %4047 = vtanh.f32 %v1065_v30  ;;  %6583 = vst [vmem:[#allocation25_spill] sm:$0xff] %v5248_v17  ;;  %6584 = vst [vmem:[#allocation26_spill] sm:$0xff] %v5251_v26  ;;  %v5255_v30 = vld [vmem:[#allocation12 + $0x84] ss:$16 sps:$4 sm:$0xff]  }
 0x2ae   :  { %6585 = vst [vmem:[#allocation33_spill] sm:$0xff] %v5255_v30 }
 0x2b4   :  { %v4042_v31 = vpop.eup %4041 }
 0x2b5   :  { %v4044_v32 = vpop.eup %4043  ;;  %v1058_v33 = vmul.f32 0.5, %v4042_v31  ;;  %v5258_v31 = vld [vmem:[#allocation12 + $0x8c] ss:$16 sps:$4 sm:$0xff]  }
 0x2b6   :  { %v1062_v35 = vmul.f32 0.5, %v4044_v32  ;;  %v4046_v22 = vpop.eup %4045  ;;  %6586 = vst [vmem:[#allocation36_spill] sm:$0xff] %v5258_v31 }
 0x2b7   :  { %v1059_v57 = vadd.f32 0.5, %v1058_v33  ;;  %v4048_v2 = vpop.eup %4047  ;;  %v5266_v33 = vld [vmem:[#allocation12 + $0x80] ss:$16 sps:$4 sm:$0xff]  }
 0x2b8   :  { %v1063_v24 = vadd.f32 0.5, %v1062_v35  ;;  %v1067_v4 = vmul.f32 0.5, %v4048_v2  ;;  %6588 = vst [vmem:[#allocation38_spill] sm:$0xff] %v5266_v33  ;;  %v5269_v35 = vld [vmem:[#allocation12 + $0x88] ss:$16 sps:$4 sm:$0xff]  }
 0x2b9   :  { %v1070_v36 = vmul.f32 %v4046_v22, %v1059_v57  ;;  %6589 = vst [vmem:[#allocation39_spill] sm:$0xff] %v5269_v35  ;;  %v5272_v22 = vld [vmem:[#allocation12 + $0xa4] ss:$16 sps:$4 sm:$0xff]   ;;  %v5287_v2 = vld [vmem:[#allocation12 + $0xcc] ss:$16 sps:$4 sm:$0xff]  }
 0x2ba   :  { %v1069_v19 = vmul.f32 %v1063_v24, %v6578_v28  ;;  %v1068_v5 = vadd.f32 0.5, %v1067_v4  ;;  %6590 = vst [vmem:[#allocation46_spill] sm:$0xff] %v5272_v22  ;;  %v5275_v24 = vld [vmem:[#allocation12 + $0xac] ss:$16 sps:$4 sm:$0xff]   ;;  %6595 = vst [vmem:[#allocation29_spill] sm:$0xff] %v5287_v2 }
 0x2bb   :  { %6591 = vst [vmem:[#allocation41_spill] sm:$0xff] %v5275_v24 }
 0x2bc   :  { %v1071_v21 = vadd.f32 %v1070_v36, %v1069_v19  ;;  %v5281_v19 = vld [vmem:[#allocation12 + $0xa8] ss:$16 sps:$4 sm:$0xff]  }
 0x2bd   :  { %6593 = vst [vmem:[#allocation27_spill] sm:$0xff] %v5281_v19 }
 0x2be   :  { %4049 = vtanh.f32 %v1071_v21  ;;  %v5164_v1 = vsel %vm1074_vm2, %v1071_v21, %v6578_v28  ;;  %v5278_v28 = vld [vmem:[#allocation12 + $0xa0] ss:$16 sps:$4 sm:$0xff]   ;;  %v5284_v21 = vld [vmem:[#allocation12 + $0xc4] ss:$16 sps:$4 sm:$0xff]  }
 0x2bf   :  { %6592 = vst [vmem:[#allocation42_spill] sm:$0xff] %v5278_v28  ;;  %6594 = vst [vmem:[#allocation28_spill] sm:$0xff] %v5284_v21 }
 0x2c8   :  { %v4050_v6 = vpop.eup %4049 }
 0x2c9   :  { %v1073_v7 = vmul.f32 %v4050_v6, %v1068_v5  ;;  %v5290_v5 = vld [vmem:[#allocation12 + $0xc0] ss:$16 sps:$4 sm:$0xff]   ;;  %v5293_v6 = vld [vmem:[#allocation12 + $0xc8] ss:$16 sps:$4 sm:$0xff]  }
 0x2ca   :  { %6596 = vst [vmem:[#allocation30_spill] sm:$0xff] %v5290_v5  ;;  %6597 = vst [vmem:[#allocation31_spill] sm:$0xff] %v5293_v6 }
 0x2cb   :  { %v5167_v9 = vsel %vm1074_vm2, %v1073_v7, %v6580_v8  ;;  %v5296_v8 = vld [vmem:[#allocation12 + $0xe4] ss:$16 sps:$4 sm:$0xff]  }
 0x2cc   :  { %v1266_v10 = vpack.c.bf16 %v5167_v9, %v5167_v9  ;;  %6598 = vst [vmem:[#allocation32_spill] sm:$0xff] %v5296_v8 }
 0x2ce   :  { %1300 = vmatmul.mubr.bf16.vlgmr.msra.gmra.mrb[16].mxu0 %v1266_v10  ;;  %1341 = vmatmul.mubr.bf16.vlgmr.msra.gmra.mrb[16].mxu1 %v1266_v10  ;;  %v5299_v10 = vld [vmem:[#allocation12 + $0xec] ss:$16 sps:$4 sm:$0xff]  }
 0x2cf   :  { %1350 = vmatpush1.bf16.msra.mxu0 %v4797_v38  ;;  %1391 = vmatpush1.bf16.msra.mxu1 %v4799_v39  ;;  %6599 = vst [vmem:[#allocation34_spill] sm:$0xff] %v5299_v10 }
 0x2d0   :  { %1351 = vmatprep.subr.bf16.mxu0 %v4803_v40  ;;  %1392 = vmatprep.subr.bf16.mxu1 %v4807_v41 }
 0x2d1   :  { %1381 = vmatprep.mubr.bf16.mxu0 %v6538_v0  ;;  %1422 = vmatprep.mubr.bf16.mxu1 %v6538_v0 }
 0x2d3   :  { %1352 = vmatpush1.bf16.msra.mxu0 %v4809_v42  ;;  %1393 = vmatpush1.bf16.msra.mxu1 %v4813_v43 }
 0x2d4   :  { %1353 = vmatprep.subr.bf16.mxu0 %v4817_v44  ;;  %1394 = vmatprep.subr.bf16.mxu1 %v4819_v45 }
 0x2d7   :  { %1354 = vmatpush1.bf16.msra.mxu0 %v4823_v46  ;;  %1395 = vmatpush1.bf16.msra.mxu1 %v4825_v47 }
 0x2d8   :  { %1355 = vmatprep.subr.bf16.mxu0 %v4829_v48  ;;  %1396 = vmatprep.subr.bf16.mxu1 %v4833_v49  ;;  %v1264_v48 = vld [vmem:[#allocation6 + $0x10] sm:$0xf]  ;;  %v5203_v49 = vld [vmem:[#allocation12 + $0x4] ss:$16 sps:$4 sm:$0xff]  }
 0x2db   :  { %1356 = vmatpush1.bf16.msra.mxu0 %v4837_v50  ;;  %1397 = vmatpush1.bf16.msra.mxu1 %v4839_v51  ;;  %v5206_v50 = vld [vmem:[#allocation12 + $0xc] ss:$16 sps:$4 sm:$0xff]   ;;  %v5209_v51 = vld [vmem:[#allocation12] ss:$16 sps:$4 sm:$0xff]  }
 0x2dc   :  { %1357 = vmatprep.subr.bf16.mxu0 %v4843_v52  ;;  %1398 = vmatprep.subr.bf16.mxu1 %v4845_v53  ;;  %v5212_v52 = vld [vmem:[#allocation12 + $0x8] ss:$16 sps:$4 sm:$0xff]  }
 0x2df   :  { %1358 = vmatpush1.bf16.msra.mxu0 %v4849_v54  ;;  %1399 = vmatpush1.bf16.msra.mxu1 %v4851_v55  ;;  %v5223_v54 = vld [vmem:[#allocation12 + $0x20] ss:$16 sps:$4 sm:$0xff]   ;;  %v5226_v55 = vld [vmem:[#allocation12 + $0x28] ss:$16 sps:$4 sm:$0xff]  }
 0x2e0   :  { %1359 = vmatprep.subr.bf16.mxu0 %v4855_v56  ;;  %1400 = vmatprep.subr.bf16.mxu1 %v6547_v18 }
 0x2e3   :  { %1360 = vmatpush1.bf16.msra.mxu0 %v4861_v58  ;;  %1401 = vmatpush1.bf16.msra.mxu1 %v4863_v59  ;;  %v5229_v58 = vld [vmem:[#allocation12 + $0x44] ss:$16 sps:$4 sm:$0xff]   ;;  %v5232_v59 = vld [vmem:[#allocation12 + $0x4c] ss:$16 sps:$4 sm:$0xff]  }
 0x2e4   :  { %1361 = vmatprep.subr.bf16.mxu0 %v4867_v60  ;;  %1402 = vmatprep.subr.bf16.mxu1 %v6540_v23  ;;  %v5238_v23 = vld [vmem:[#allocation12 + $0x48] ss:$16 sps:$4 sm:$0xff]  }
 0x2e7   :  { %1362 = vmatpush1.bf16.msra.mxu0 %v4873_v62  ;;  %1403 = vmatpush1.bf16.msra.mxu1 %v4875_v63  ;;  %v1194_v38 = vpop.f32.mrb[12].mxu0  ;;  %v1235_v39 = vpop.f32.mrb[12].mxu1 }
 0x2e8   :  { %v1242_v40 = vmul.f32 0.5, %v1194_v38  ;;  %v1196_v41 = vpop.f32.mrb[13].mxu0  ;;  %v1237_v42 = vpop.f32.mrb[13].mxu1  ;;  %1363 = vmatprep.subr.bf16.mxu0 %v4879_v37  ;;  %1404 = vmatprep.subr.bf16.mxu1 %v6541_v61  ;;  %v5235_v61 = vld [vmem:[#allocation12 + $0x40] ss:$16 sps:$4 sm:$0xff]  }
 0x2e9   :  { %v1246_v43 = vmul.f32 0.5, %v1196_v41  ;;  %v1198_v44 = vpop.f32.mrb[14].mxu0  ;;  %v1239_v45 = vpop.f32.mrb[14].mxu1  ;;  %v1251_v53 = vmul.f32 0.5, %v1237_v42  ;;  %v5313_v42 = vld [vmem:[#allocation11 + $0x4] ss:$16 sps:$4 sm:$0xff]  }
 0x2ea   :  { %4051 = vtanh.f32 %v1242_v40  ;;  %v1199_v46 = vpop.f32.mrb[15].mxu0  ;;  %v1240_v47 = vpop.f32.mrb[15].mxu1  ;;  %v5305_v40 = vld [vmem:[#allocation12 + $0xe8] ss:$16 sps:$4 sm:$0xff]   ;;  %6603 = vst [vmem:[#allocation40_spill] sm:$0xff] %v5313_v42 }
 0x2eb   :  { %4053 = vtanh.f32 %v1246_v43  ;;  %1364 = vmatpush1.bf16.msra.mxu0 %v4885_v3  ;;  %1405 = vmatpush1.bf16.msra.mxu1 %v4887_v34  ;;  %v5215_v3 = vld [vmem:[#allocation12 + $0x24] ss:$16 sps:$4 sm:$0xff]   ;;  %v5218_v34 = vld [vmem:[#allocation12 + $0x2c] ss:$16 sps:$4 sm:$0xff]   ;;  %6601 = vst [vmem:[#allocation45_spill] sm:$0xff] %v5305_v40 }
 0x2ec   :  { %1453 = vmatprep.subr.bf16.mxu0 %v5203_v49  ;;  %1494 = vmatprep.subr.bf16.mxu1 %v5206_v50  ;;  %4055 = vtanh.f32 %v1235_v39  ;;  %v5302_v39 = vld [vmem:[#allocation12 + $0xe0] ss:$16 sps:$4 sm:$0xff]   ;;  %v5316_v43 = vld [vmem:[#allocation11 + $0xc] ss:$16 sps:$4 sm:$0xff]   ;;  %v5324_v46 = vld [vmem:[#allocation11 + $0x8] ss:$16 sps:$4 sm:$0xff]  }
 0x2ed   :  { %4057 = vtanh.f32 %v1251_v53  ;;  %6600 = vst [vmem:[#allocation35_spill] sm:$0xff] %v5302_v39  ;;  %6604 = vst [vmem:[#allocation23_spill] sm:$0xff] %v5316_v43  ;;  %v5321_v45 = vld [vmem:[#allocation11] ss:$16 sps:$4 sm:$0xff]   ;;  %v5330_v47 = vld [vmem:[#allocation11 + $0x2c] ss:$16 sps:$4 sm:$0xff]  }
 0x2ee   :  { %1382 = vmatmul.mubr.bf16.vlgmr.msra.gmra.mrb[16].mxu0 %v1264_v48  ;;  %1423 = vmatmul.mubr.bf16.vlgmr.msra.gmra.mrb[16].mxu1 %v1264_v48  ;;  %v5335_v48 = vld [vmem:[#allocation11 + $0x20] ss:$16 sps:$4 sm:$0xff]   ;;  %v5338_v53 = vld [vmem:[#allocation11 + $0x28] ss:$16 sps:$4 sm:$0xff]  }
 0x2ef   :  { %1454 = vmatpush1.bf16.msra.mxu0 %v5209_v51  ;;  %1495 = vmatpush1.bf16.msra.mxu1 %v5212_v52 }
 0x2f0   :  { %1455 = vmatprep.subr.bf16.mxu0 %v5215_v3  ;;  %1496 = vmatprep.subr.bf16.mxu1 %v5218_v34 }
 0x2f1   :  { %1485 = vmatprep.mubr.bf16.mxu0 %v6538_v0  ;;  %1526 = vmatprep.mubr.bf16.mxu1 %v6538_v0 }
 0x2f3   :  { %1456 = vmatpush1.bf16.msra.mxu0 %v5223_v54  ;;  %1497 = vmatpush1.bf16.msra.mxu1 %v5226_v55 }
 0x2f4   :  { %v4052_v56 = vpop.eup %4051  ;;  %1457 = vmatprep.subr.bf16.mxu0 %v5229_v58  ;;  %1498 = vmatprep.subr.bf16.mxu1 %v5232_v59 }
 0x2f5   :  { %v4054_v60 = vpop.eup %4053  ;;  %v1244_v62 = vmul.f32 0.5, %v4052_v56  ;;  %v5341_v56 = vld [vmem:[#allocation11 + $0x44] ss:$16 sps:$4 sm:$0xff]  }
 0x2f6   :  { %v1248_v63 = vmul.f32 0.5, %v4054_v60  ;;  %v4056_v18 = vpop.eup %4055  ;;  %v5344_v60 = vld [vmem:[#allocation11 + $0x4c] ss:$16 sps:$4 sm:$0xff]  }
 0x2f7   :  { %v1245_v37 = vadd.f32 0.5, %v1244_v62  ;;  %1458 = vmatpush1.bf16.msra.mxu0 %v5235_v61  ;;  %1499 = vmatpush1.bf16.msra.mxu1 %v5238_v23  ;;  %v4058_v57 = vpop.eup %4057  ;;  %v5347_v62 = vld [vmem:[#allocation11 + $0x40] ss:$16 sps:$4 sm:$0xff]  }
 0x2f8   :  { %v1249_v11 = vadd.f32 0.5, %v1248_v63  ;;  %1459 = vmatprep.subr.bf16.mxu0 %v5241_v12  ;;  %1500 = vmatprep.subr.bf16.mxu1 %v5244_v13  ;;  %v1253_v36 = vmul.f32 0.5, %v4058_v57  ;;  %v5350_v63 = vld [vmem:[#allocation11 + $0x48] ss:$16 sps:$4 sm:$0xff]  }
 0x2f9   :  { %v1256_v14 = vmul.f32 %v4056_v18, %v1245_v37  ;;  %v5353_v37 = vld [vmem:[#allocation11 + $0x64] ss:$16 sps:$4 sm:$0xff]   ;;  %v5356_v18 = vld [vmem:[#allocation11 + $0x6c] ss:$16 sps:$4 sm:$0xff]   ;;  %v5374_v57 = vld [vmem:[#allocation11 + $0x88] ss:$16 sps:$4 sm:$0xff]  }
 0x2fa   :  { %v1255_v16 = vmul.f32 %v1249_v11, %v6582_v15  ;;  %v1254_v4 = vadd.f32 0.5, %v1253_v36  ;;  %v5359_v11 = vld [vmem:[#allocation11 + $0x60] ss:$16 sps:$4 sm:$0xff]   ;;  %v5377_v36 = vld [vmem:[#allocation11 + $0xa4] ss:$16 sps:$4 sm:$0xff]  }
 0x2fb   :  { %1460 = vmatpush1.bf16.msra.mxu0 %v5248_v17  ;;  %1501 = vmatpush1.bf16.msra.mxu1 %v5251_v26 }
 0x2fc   :  { %v1257_v29 = vadd.f32 %v1256_v14, %v1255_v16  ;;  %1461 = vmatprep.subr.bf16.mxu0 %v5255_v30  ;;  %1502 = vmatprep.subr.bf16.mxu1 %v5258_v31  ;;  %v5362_v14 = vld [vmem:[#allocation11 + $0x68] ss:$16 sps:$4 sm:$0xff]   ;;  %v5368_v16 = vld [vmem:[#allocation11 + $0x8c] ss:$16 sps:$4 sm:$0xff]  }
 0x2fe   :  { %4059 = vtanh.f32 %v1257_v29  ;;  %v5264_v32 = vsel %vm1260_vm3, %v1257_v29, %v6582_v15  ;;  %v5365_v15 = vld [vmem:[#allocation11 + $0x84] ss:$16 sps:$4 sm:$0xff]   ;;  %v5371_v29 = vld [vmem:[#allocation11 + $0x80] ss:$16 sps:$4 sm:$0xff]  }
 0x2ff   :  { %6587 = vst [vmem:[#allocation37_spill] sm:$0xff] %v5264_v32  ;;  %1462 = vmatpush1.bf16.msra.mxu0 %v5266_v33  ;;  %1503 = vmatpush1.bf16.msra.mxu1 %v5269_v35  ;;  %v5398_v32 = vld [vmem:[#allocation11 + $0xc8] ss:$16 sps:$4 sm:$0xff]  }
 0x300   :  { %1463 = vmatprep.subr.bf16.mxu0 %v5272_v22  ;;  %1504 = vmatprep.subr.bf16.mxu1 %v5275_v24 }
 0x303   :  { %1464 = vmatpush1.bf16.msra.mxu0 %v5278_v28  ;;  %1505 = vmatpush1.bf16.msra.mxu1 %v5281_v19 }
 0x304   :  { %1465 = vmatprep.subr.bf16.mxu0 %v5284_v21  ;;  %1506 = vmatprep.subr.bf16.mxu1 %v5287_v2 }
 0x307   :  { %1466 = vmatpush1.bf16.msra.mxu0 %v5290_v5  ;;  %1507 = vmatpush1.bf16.msra.mxu1 %v5293_v6 }
 0x308   :  { %v4060_v7 = vpop.eup %4059  ;;  %1467 = vmatprep.subr.bf16.mxu0 %v5296_v8  ;;  %1508 = vmatprep.subr.bf16.mxu1 %v5299_v10 }
 0x309   :  { %v1259_v38 = vmul.f32 %v4060_v7, %v1254_v4  ;;  %v5380_v4 = vld [vmem:[#allocation11 + $0xac] ss:$16 sps:$4 sm:$0xff]   ;;  %v5383_v7 = vld [vmem:[#allocation11 + $0xa0] ss:$16 sps:$4 sm:$0xff]  }
 0x30a   :  { %6605 = vst [vmem:[#allocation47_spill] sm:$0xff] %v5383_v7 }
 0x30b   :  { %1468 = vmatpush1.bf16.msra.mxu0 %v5302_v39  ;;  %1509 = vmatpush1.bf16.msra.mxu1 %v5305_v40  ;;  %v5311_v41 = vsel %vm1260_vm3, %v1259_v38, %v5087_v20  ;;  %v5327_v20 = vld [vmem:[#allocation11 + $0x24] ss:$16 sps:$4 sm:$0xff]   ;;  %v5386_v38 = vld [vmem:[#allocation11 + $0xa8] ss:$16 sps:$4 sm:$0xff]  }
 0x30c   :  { %6602 = vst [vmem:[#allocation44_spill] sm:$0xff] %v5311_v41  ;;  %1535 = vmatprep.subr.bf16.mxu0 %v5313_v42  ;;  %1576 = vmatprep.subr.bf16.mxu1 %v5316_v43  ;;  %v1452_v44 = vpack.c.bf16 %v5311_v41, %v5311_v41  ;;  %6606 = vst [vmem:[#allocation48_spill] sm:$0xff] %v5386_v38  ;;  %v5392_v41 = vld [vmem:[#allocation11 + $0xcc] ss:$16 sps:$4 sm:$0xff]  }
 0x30d   :  { %6608 = vst [vmem:[#allocation50_spill] sm:$0xff] %v5392_v41 }
 0x30e   :  { %1486 = vmatmul.mubr.bf16.vlgmr.msra.gmra.mrb[20].mxu0 %v1452_v44  ;;  %1527 = vmatmul.mubr.bf16.vlgmr.msra.gmra.mrb[20].mxu1 %v1452_v44  ;;  %v5389_v44 = vld [vmem:[#allocation11 + $0xc4] ss:$16 sps:$4 sm:$0xff]  }
 0x30f   :  { %1536 = vmatpush1.bf16.msra.mxu0 %v5321_v45  ;;  %1577 = vmatpush1.bf16.msra.mxu1 %v5324_v46  ;;  %6607 = vst [vmem:[#allocation49_spill] sm:$0xff] %v5389_v44 }
 0x310   :  { %1537 = vmatprep.subr.bf16.mxu0 %v5327_v20  ;;  %1578 = vmatprep.subr.bf16.mxu1 %v5330_v47 }
 0x311   :  { %1567 = vmatprep.mubr.bf16.mxu0 %v6538_v0  ;;  %1608 = vmatprep.mubr.bf16.mxu1 %v6538_v0  ;;  %v6612_v25 = vld [vmem:[#allocation47_spill] sm:$0xff] }
 0x313   :  { %1538 = vmatpush1.bf16.msra.mxu0 %v5335_v48  ;;  %1579 = vmatpush1.bf16.msra.mxu1 %v5338_v53 }
 0x314   :  { %1539 = vmatprep.subr.bf16.mxu0 %v5341_v56  ;;  %1580 = vmatprep.subr.bf16.mxu1 %v5344_v60 }
 0x317   :  { %1540 = vmatpush1.bf16.msra.mxu0 %v5347_v62  ;;  %1581 = vmatpush1.bf16.msra.mxu1 %v5350_v63 }
 0x318   :  { %1541 = vmatprep.subr.bf16.mxu0 %v5353_v37  ;;  %1582 = vmatprep.subr.bf16.mxu1 %v5356_v18 }
 0x31b   :  { %1542 = vmatpush1.bf16.msra.mxu0 %v5359_v11  ;;  %1583 = vmatpush1.bf16.msra.mxu1 %v5362_v14 }
 0x31c   :  { %1543 = vmatprep.subr.bf16.mxu0 %v5365_v15  ;;  %1584 = vmatprep.subr.bf16.mxu1 %v5368_v16 }
 0x31f   :  { %1544 = vmatpush1.bf16.msra.mxu0 %v5371_v29  ;;  %1585 = vmatpush1.bf16.msra.mxu1 %v5374_v57 }
 0x320   :  { %1545 = vmatprep.subr.bf16.mxu0 %v5377_v36  ;;  %1586 = vmatprep.subr.bf16.mxu1 %v5380_v4 }
 0x323   :  { %1546 = vmatpush1.bf16.msra.mxu0 %v5383_v7  ;;  %1587 = vmatpush1.bf16.msra.mxu1 %v5386_v38  ;;  %v5401_v7 = vld [vmem:[#allocation11 + $0xe4] ss:$16 sps:$4 sm:$0xff]   ;;  %v5404_v38 = vld [vmem:[#allocation11 + $0xec] ss:$16 sps:$4 sm:$0xff]  }
 0x324   :  { %1547 = vmatprep.subr.bf16.mxu0 %v5389_v44  ;;  %1588 = vmatprep.subr.bf16.mxu1 %v5392_v41  ;;  %v5407_v44 = vld [vmem:[#allocation11 + $0xe0] ss:$16 sps:$4 sm:$0xff]   ;;  %v5410_v41 = vld [vmem:[#allocation11 + $0xe8] ss:$16 sps:$4 sm:$0xff]  }
 0x327   :  { %1548 = vmatpush1.bf16.msra.mxu0 %v5395_v27  ;;  %1589 = vmatpush1.bf16.msra.mxu1 %v5398_v32  ;;  %v1265_v27 = vld [vmem:[#allocation6 + $0x14] sm:$0xf] }
 0x328   :  { %1549 = vmatprep.subr.bf16.mxu0 %v5401_v7  ;;  %1590 = vmatprep.subr.bf16.mxu1 %v5404_v38 }
 0x32b   :  { %1550 = vmatpush1.bf16.msra.mxu0 %v5407_v44  ;;  %1591 = vmatpush1.bf16.msra.mxu1 %v5410_v41 }
 0x32c   :  { %1642 = vmatprep.subr.bf16.mxu0 %v5203_v49  ;;  %1683 = vmatprep.subr.bf16.mxu1 %v5206_v50 }
 0x32e   :  { %1568 = vmatmul.mubr.bf16.vlgmr.msra.gmra.mrb[20].mxu0 %v1265_v27  ;;  %1609 = vmatmul.mubr.bf16.vlgmr.msra.gmra.mrb[20].mxu1 %v1265_v27 }
 0x32f   :  { %1643 = vmatpush1.bf16.msra.mxu0 %v5209_v51  ;;  %1684 = vmatpush1.bf16.msra.mxu1 %v5212_v52 }
 0x330   :  { %1644 = vmatprep.subr.bf16.mxu0 %v5215_v3  ;;  %1685 = vmatprep.subr.bf16.mxu1 %v5218_v34 }
 0x331   :  { %1674 = vmatprep.mubr.bf16.mxu0 %v6538_v0  ;;  %1715 = vmatprep.mubr.bf16.mxu1 %v6538_v0 }
 0x333   :  { %1645 = vmatpush1.bf16.msra.mxu0 %v5223_v54  ;;  %1686 = vmatpush1.bf16.msra.mxu1 %v5226_v55 }
 0x334   :  { %1646 = vmatprep.subr.bf16.mxu0 %v5229_v58  ;;  %1687 = vmatprep.subr.bf16.mxu1 %v5232_v59 }
 0x337   :  { %1647 = vmatpush1.bf16.msra.mxu0 %v5235_v61  ;;  %1688 = vmatpush1.bf16.msra.mxu1 %v5238_v23 }
 0x338   :  { %1648 = vmatprep.subr.bf16.mxu0 %v5241_v12  ;;  %1689 = vmatprep.subr.bf16.mxu1 %v5244_v13 }
 0x33b   :  { %1649 = vmatpush1.bf16.msra.mxu0 %v5248_v17  ;;  %1690 = vmatpush1.bf16.msra.mxu1 %v5251_v26 }
 0x33c   :  { %1650 = vmatprep.subr.bf16.mxu0 %v5255_v30  ;;  %1691 = vmatprep.subr.bf16.mxu1 %v5258_v31 }
 0x33f   :  { %1651 = vmatpush1.bf16.msra.mxu0 %v5266_v33  ;;  %1692 = vmatpush1.bf16.msra.mxu1 %v5269_v35 }
 0x340   :  { %1652 = vmatprep.subr.bf16.mxu0 %v5272_v22  ;;  %1693 = vmatprep.subr.bf16.mxu1 %v5275_v24 }
 0x343   :  { %1653 = vmatpush1.bf16.msra.mxu0 %v5278_v28  ;;  %1694 = vmatpush1.bf16.msra.mxu1 %v5281_v19 }
 0x344   :  { %1654 = vmatprep.subr.bf16.mxu0 %v5284_v21  ;;  %1695 = vmatprep.subr.bf16.mxu1 %v5287_v2 }
 0x347   :  { %1655 = vmatpush1.bf16.msra.mxu0 %v5290_v5  ;;  %1696 = vmatpush1.bf16.msra.mxu1 %v5293_v6 }
 0x348   :  { %1656 = vmatprep.subr.bf16.mxu0 %v5296_v8  ;;  %1697 = vmatprep.subr.bf16.mxu1 %v5299_v10 }
 0x34b   :  { %1657 = vmatpush1.bf16.msra.mxu0 %v5302_v39  ;;  %1698 = vmatpush1.bf16.msra.mxu1 %v5305_v40 }
 0x34c   :  { %1724 = vmatprep.subr.bf16.mxu0 %v5313_v42  ;;  %1765 = vmatprep.subr.bf16.mxu1 %v5316_v43 }
 0x3c1   :  { %v1383_v27 = vpop.f32.mrb[16].mxu0  ;;  %v1424_v21 = vpop.f32.mrb[16].mxu1 }
 0x3c2   :  { %v1431_v19 = vmul.f32 0.5, %v1383_v27  ;;  %v1385_v2 = vpop.f32.mrb[17].mxu0  ;;  %v1426_v28 = vpop.f32.mrb[17].mxu1 }
 0x3c3   :  { %v1435_v5 = vmul.f32 0.5, %v1385_v2  ;;  %v1387_v24 = vpop.f32.mrb[18].mxu0  ;;  %v1428_v6 = vpop.f32.mrb[18].mxu1  ;;  %v1440_v39 = vmul.f32 0.5, %v1426_v28 }
 0x3c4   :  { %4061 = vtanh.f32 %v1431_v19  ;;  %v1388_v8 = vpop.f32.mrb[19].mxu0  ;;  %v1429_v22 = vpop.f32.mrb[19].mxu1 }
 0x3c5   :  { %4063 = vtanh.f32 %v1435_v5 }
 0x3c6   :  { %4065 = vtanh.f32 %v1424_v21 }
 0x3c7   :  { %4067 = vtanh.f32 %v1440_v39 }
 0x3ce   :  { %v4062_v10 = vpop.eup %4061 }
 0x3cf   :  { %v4064_v40 = vpop.eup %4063  ;;  %v1433_v35 = vmul.f32 0.5, %v4062_v10 }
 0x3d0   :  { %v1437_v42 = vmul.f32 0.5, %v4064_v40  ;;  %v4066_v33 = vpop.eup %4065 }
 0x3d1   :  { %v1434_v43 = vadd.f32 0.5, %v1433_v35  ;;  %v4068_v19 = vpop.eup %4067 }
 0x3d2   :  { %v1438_v31 = vadd.f32 0.5, %v1437_v42  ;;  %v1442_v28 = vmul.f32 0.5, %v4068_v19 }
 0x3d3   :  { %v1445_v27 = vmul.f32 %v4066_v33, %v1434_v43 }
 0x3d4   :  { %v1444_v30 = vmul.f32 %v1438_v31, %v5164_v1  ;;  %v1443_v21 = vadd.f32 0.5, %v1442_v28  ;;  %v6616_v31 = vld [vmem:[#allocation51_spill] sm:$0xff]  ;;  %v1639_v28 = vld [vmem:[#allocation6 + $0x18] sm:$0xf] }
 0x3d6   :  { %v1446_v24 = vadd.f32 %v1445_v27, %v1444_v30  ;;  %v6615_v30 = vld [vmem:[#allocation50_spill] sm:$0xff] }
 0x3d8   :  { %4069 = vtanh.f32 %v1446_v24  ;;  %v5452_v22 = vsel %vm1449_vm4, %v1446_v24, %v5164_v1  ;;  %v6613_v1 = vld [vmem:[#allocation48_spill] sm:$0xff] }
 0x3d9   :  { %6610 = vst [vmem:[#allocation52_spill] sm:$0xff] %v5452_v22 }
 0x3e2   :  { %v4070_v2 = vpop.eup %4069 }
 0x3e3   :  { %v1448_v5 = vmul.f32 %v4070_v2, %v1443_v21 }
 0x3e5   :  { %v5455_v6 = vsel %vm1449_vm4, %v1448_v5, %v5167_v9  ;;  %v6614_v9 = vld [vmem:[#allocation49_spill] sm:$0xff] }
 0x3e6   :  { %6611 = vst [vmem:[#allocation53_spill] sm:$0xff] %v5455_v6  ;;  %v1641_v33 = vpack.c.bf16 %v5455_v6, %v5455_v6  ;;  %v6629_v6 = vld [vmem:[#allocation29_spill] sm:$0xff] }
 0x3e8   :  { %1675 = vmatmul.mubr.bf16.vlgmr.msra.gmra.mrb[24].mxu0 %v1641_v33  ;;  %1716 = vmatmul.mubr.bf16.vlgmr.msra.gmra.mrb[24].mxu1 %v1641_v33 }
 0x3e9   :  { %1725 = vmatpush1.bf16.msra.mxu0 %v5321_v45  ;;  %1766 = vmatpush1.bf16.msra.mxu1 %v5324_v46 }
 0x3ea   :  { %1726 = vmatprep.subr.bf16.mxu0 %v5327_v20  ;;  %1767 = vmatprep.subr.bf16.mxu1 %v5330_v47 }
 0x3eb   :  { %1756 = vmatprep.mubr.bf16.mxu0 %v6538_v0  ;;  %1797 = vmatprep.mubr.bf16.mxu1 %v6538_v0 }
 0x3ed   :  { %1727 = vmatpush1.bf16.msra.mxu0 %v5335_v48  ;;  %1768 = vmatpush1.bf16.msra.mxu1 %v5338_v53 }
 0x3ee   :  { %1728 = vmatprep.subr.bf16.mxu0 %v5341_v56  ;;  %1769 = vmatprep.subr.bf16.mxu1 %v5344_v60 }
 0x3f1   :  { %1729 = vmatpush1.bf16.msra.mxu0 %v5347_v62  ;;  %1770 = vmatpush1.bf16.msra.mxu1 %v5350_v63 }
 0x3f2   :  { %1730 = vmatprep.subr.bf16.mxu0 %v5353_v37  ;;  %1771 = vmatprep.subr.bf16.mxu1 %v5356_v18 }
 0x3f5   :  { %1731 = vmatpush1.bf16.msra.mxu0 %v5359_v11  ;;  %1772 = vmatpush1.bf16.msra.mxu1 %v5362_v14 }
 0x3f6   :  { %1732 = vmatprep.subr.bf16.mxu0 %v5365_v15  ;;  %1773 = vmatprep.subr.bf16.mxu1 %v5368_v16 }
 0x3f9   :  { %1733 = vmatpush1.bf16.msra.mxu0 %v5371_v29  ;;  %1774 = vmatpush1.bf16.msra.mxu1 %v5374_v57 }
 0x3fa   :  { %1734 = vmatprep.subr.bf16.mxu0 %v5377_v36  ;;  %1775 = vmatprep.subr.bf16.mxu1 %v5380_v4 }
 0x3fd   :  { %1735 = vmatpush1.bf16.msra.mxu0 %v6612_v25  ;;  %1776 = vmatpush1.bf16.msra.mxu1 %v6613_v1 }
 0x3fe   :  { %1736 = vmatprep.subr.bf16.mxu0 %v6614_v9  ;;  %1777 = vmatprep.subr.bf16.mxu1 %v6615_v30 }
 0x401   :  { %1737 = vmatpush1.bf16.msra.mxu0 %v6616_v31  ;;  %1778 = vmatpush1.bf16.msra.mxu1 %v5398_v32  ;;  %v1569_v35 = vpop.f32.mrb[20].mxu0  ;;  %v1610_v8 = vpop.f32.mrb[20].mxu1 }
 0x402   :  { %v1617_v10 = vmul.f32 0.5, %v1569_v35  ;;  %v1571_v39 = vpop.f32.mrb[21].mxu0  ;;  %v1612_v40 = vpop.f32.mrb[21].mxu1  ;;  %1738 = vmatprep.subr.bf16.mxu0 %v5401_v7  ;;  %1779 = vmatprep.subr.bf16.mxu1 %v5404_v38 }
 0x403   :  { %v1621_v42 = vmul.f32 0.5, %v1571_v39  ;;  %v1573_v43 = vpop.f32.mrb[22].mxu0  ;;  %v1614_v27 = vpop.f32.mrb[22].mxu1  ;;  %v1626_v21 = vmul.f32 0.5, %v1612_v40 }
 0x404   :  { %4071 = vtanh.f32 %v1617_v10  ;;  %v1574_v24 = vpop.f32.mrb[23].mxu0  ;;  %v1615_v19 = vpop.f32.mrb[23].mxu1  ;;  %v6618_v27 = vld [vmem:[#allocation43_spill] sm:$0xff] }
 0x405   :  { %4073 = vtanh.f32 %v1621_v42  ;;  %1739 = vmatpush1.bf16.msra.mxu0 %v5407_v44  ;;  %1780 = vmatpush1.bf16.msra.mxu1 %v5410_v41  ;;  %v6617_v42 = vld [vmem:[#allocation37_spill] sm:$0xff]  ;;  %vm1635_vm5 = vcmp.gt.s32.totalorder %v6618_v27, 2  ;;  %v6640_v27 = vld [vmem:[#allocation39_spill] sm:$0xff] }
 0x406   :  { %1828 = vmatprep.subr.bf16.mxu0 %v5203_v49  ;;  %1869 = vmatprep.subr.bf16.mxu1 %v5206_v50  ;;  %4075 = vtanh.f32 %v1610_v8  ;;  %v6619_v19 = vld [vmem:[#allocation33_spill] sm:$0xff] }
 0x407   :  { %4077 = vtanh.f32 %v1626_v21 }
 0x408   :  { %1757 = vmatmul.mubr.bf16.vlgmr.msra.gmra.mrb[24].mxu0 %v1639_v28  ;;  %1798 = vmatmul.mubr.bf16.vlgmr.msra.gmra.mrb[24].mxu1 %v1639_v28  ;;  %v6620_v28 = vld [vmem:[#allocation36_spill] sm:$0xff] }
 0x409   :  { %1829 = vmatpush1.bf16.msra.mxu0 %v5209_v51  ;;  %1870 = vmatpush1.bf16.msra.mxu1 %v5212_v52 }
 0x40a   :  { %1830 = vmatprep.subr.bf16.mxu0 %v5215_v3  ;;  %1871 = vmatprep.subr.bf16.mxu1 %v5218_v34 }
 0x40b   :  { %1860 = vmatprep.mubr.bf16.mxu0 %v6538_v0  ;;  %1901 = vmatprep.mubr.bf16.mxu1 %v6538_v0 }
 0x40d   :  { %1831 = vmatpush1.bf16.msra.mxu0 %v5223_v54  ;;  %1872 = vmatpush1.bf16.msra.mxu1 %v5226_v55 }
 0x40e   :  { %v4072_v2 = vpop.eup %4071  ;;  %1832 = vmatprep.subr.bf16.mxu0 %v5229_v58  ;;  %1873 = vmatprep.subr.bf16.mxu1 %v5232_v59 }
 0x40f   :  { %v4074_v5 = vpop.eup %4073  ;;  %v1619_v33 = vmul.f32 0.5, %v4072_v2  ;;  %v6622_v2 = vld [vmem:[#allocation38_spill] sm:$0xff] }
 0x410   :  { %v1623_v35 = vmul.f32 0.5, %v4074_v5  ;;  %v4076_v10 = vpop.eup %4075  ;;  %v6623_v5 = vld [vmem:[#allocation39_spill] sm:$0xff] }
 0x411   :  { %v1620_v8 = vadd.f32 0.5, %v1619_v33  ;;  %1833 = vmatpush1.bf16.msra.mxu0 %v5235_v61  ;;  %1874 = vmatpush1.bf16.msra.mxu1 %v5238_v23  ;;  %v4078_v33 = vpop.eup %4077 }
 0x412   :  { %v1624_v39 = vadd.f32 0.5, %v1623_v35  ;;  %1834 = vmatprep.subr.bf16.mxu0 %v5241_v12  ;;  %1875 = vmatprep.subr.bf16.mxu1 %v5244_v13  ;;  %v6624_v35 = vld [vmem:[#allocation46_spill] sm:$0xff] }
 0x413   :  { %v1631_v40 = vmul.f32 %v4076_v10, %v1620_v8  ;;  %v6625_v8 = vld [vmem:[#allocation41_spill] sm:$0xff]  ;;  %v1628_v10 = vmul.f32 0.5, %v4078_v33  ;;  %v6634_v33 = vld [vmem:[#allocation35_spill] sm:$0xff] }
 0x414   :  { %v1630_v43 = vmul.f32 %v1624_v39, %v6617_v42  ;;  %v6626_v39 = vld [vmem:[#allocation42_spill] sm:$0xff] }
 0x415   :  { %1835 = vmatpush1.bf16.msra.mxu0 %v5248_v17  ;;  %1876 = vmatpush1.bf16.msra.mxu1 %v5251_v26 }
 0x416   :  { %v1632_v24 = vadd.f32 %v1631_v40, %v1630_v43  ;;  %1836 = vmatprep.subr.bf16.mxu0 %v6619_v19  ;;  %1877 = vmatprep.subr.bf16.mxu1 %v6620_v28  ;;  %v6627_v40 = vld [vmem:[#allocation27_spill] sm:$0xff]  ;;  %v6628_v43 = vld [vmem:[#allocation28_spill] sm:$0xff] }
 0x418   :  { %4079 = vtanh.f32 %v1632_v24  ;;  %v5516_v21 = vsel %vm1635_vm5, %v1632_v24, %v6617_v42  ;;  %v1629_v42 = vadd.f32 0.5, %v1628_v10  ;;  %v6630_v24 = vld [vmem:[#allocation30_spill] sm:$0xff]  ;;  %v6638_v10 = vld [vmem:[#allocation40_spill] sm:$0xff] }
 0x419   :  { %6621 = vst [vmem:[#allocation47_spill] sm:$0xff] %v5516_v21  ;;  %1837 = vmatpush1.bf16.msra.mxu0 %v6622_v2  ;;  %1878 = vmatpush1.bf16.msra.mxu1 %v6623_v5  ;;  %v6631_v21 = vld [vmem:[#allocation31_spill] sm:$0xff]  ;;  %v6632_v5 = vld [vmem:[#allocation32_spill] sm:$0xff] }
 0x41a   :  { %1838 = vmatprep.subr.bf16.mxu0 %v6624_v35  ;;  %1879 = vmatprep.subr.bf16.mxu1 %v6625_v8  ;;  %v6633_v35 = vld [vmem:[#allocation34_spill] sm:$0xff] }
 0x41d   :  { %1839 = vmatpush1.bf16.msra.mxu0 %v6626_v39  ;;  %1880 = vmatpush1.bf16.msra.mxu1 %v6627_v40  ;;  %v6635_v39 = vld [vmem:[#allocation45_spill] sm:$0xff]  ;;  %v6636_v40 = vld [vmem:[#allocation44_spill] sm:$0xff] }
 0x41e   :  { %1840 = vmatprep.subr.bf16.mxu0 %v6628_v43  ;;  %1881 = vmatprep.subr.bf16.mxu1 %v6629_v6 }
 0x421   :  { %1841 = vmatpush1.bf16.msra.mxu0 %v6630_v24  ;;  %1882 = vmatpush1.bf16.msra.mxu1 %v6631_v21  ;;  %v6639_v24 = vld [vmem:[#allocation23_spill] sm:$0xff] }
 0x422   :  { %v4080_v22 = vpop.eup %4079  ;;  %1842 = vmatprep.subr.bf16.mxu0 %v6632_v5  ;;  %1883 = vmatprep.subr.bf16.mxu1 %v6633_v35 }
 0x423   :  { %v1634_v8 = vmul.f32 %v4080_v22, %v1629_v42  ;;  %v1640_v22 = vld [vmem:[#allocation6 + $0x1c] sm:$0xf]  ;;  %v6644_v42 = vld [vmem:[#allocation27_spill] sm:$0xff] }
 0x425   :  { %1843 = vmatpush1.bf16.msra.mxu0 %v6634_v33  ;;  %1884 = vmatpush1.bf16.msra.mxu1 %v6635_v39  ;;  %v5535_v43 = vsel %vm1635_vm5, %v1634_v8, %v6636_v40  ;;  %v6642_v8 = vld [vmem:[#allocation41_spill] sm:$0xff]  ;;  %v6643_v40 = vld [vmem:[#allocation42_spill] sm:$0xff] }
 0x426   :  { %6637 = vst [vmem:[#allocation48_spill] sm:$0xff] %v5535_v43  ;;  %1910 = vmatprep.subr.bf16.mxu0 %v6638_v10  ;;  %1951 = vmatprep.subr.bf16.mxu1 %v6639_v24  ;;  %v1827_v21 = vpack.c.bf16 %v5535_v43, %v5535_v43  ;;  %v6646_v43 = vld [vmem:[#allocation30_spill] sm:$0xff] }
 0x428   :  { %1861 = vmatmul.mubr.bf16.vlgmr.msra.gmra.mrb[28].mxu0 %v1827_v21  ;;  %1902 = vmatmul.mubr.bf16.vlgmr.msra.gmra.mrb[28].mxu1 %v1827_v21  ;;  %v6641_v21 = vld [vmem:[#allocation46_spill] sm:$0xff] }
 0x429   :  { %1911 = vmatpush1.bf16.msra.mxu0 %v5321_v45  ;;  %1952 = vmatpush1.bf16.msra.mxu1 %v5324_v46 }
 0x42a   :  { %1912 = vmatprep.subr.bf16.mxu0 %v5327_v20  ;;  %1953 = vmatprep.subr.bf16.mxu1 %v5330_v47 }
 0x42b   :  { %1942 = vmatprep.mubr.bf16.mxu0 %v6538_v0  ;;  %1983 = vmatprep.mubr.bf16.mxu1 %v6538_v0 }
 0x42d   :  { %1913 = vmatpush1.bf16.msra.mxu0 %v5335_v48  ;;  %1954 = vmatpush1.bf16.msra.mxu1 %v5338_v53 }
 0x42e   :  { %1914 = vmatprep.subr.bf16.mxu0 %v5341_v56  ;;  %1955 = vmatprep.subr.bf16.mxu1 %v5344_v60 }
 0x431   :  { %1915 = vmatpush1.bf16.msra.mxu0 %v5347_v62  ;;  %1956 = vmatpush1.bf16.msra.mxu1 %v5350_v63 }
 0x432   :  { %1916 = vmatprep.subr.bf16.mxu0 %v5353_v37  ;;  %1957 = vmatprep.subr.bf16.mxu1 %v5356_v18 }
 0x435   :  { %1917 = vmatpush1.bf16.msra.mxu0 %v5359_v11  ;;  %1958 = vmatpush1.bf16.msra.mxu1 %v5362_v14 }
 0x436   :  { %1918 = vmatprep.subr.bf16.mxu0 %v5365_v15  ;;  %1959 = vmatprep.subr.bf16.mxu1 %v5368_v16 }
 0x439   :  { %1919 = vmatpush1.bf16.msra.mxu0 %v5371_v29  ;;  %1960 = vmatpush1.bf16.msra.mxu1 %v5374_v57 }
 0x43a   :  { %1920 = vmatprep.subr.bf16.mxu0 %v5377_v36  ;;  %1961 = vmatprep.subr.bf16.mxu1 %v5380_v4 }
 0x43d   :  { %1921 = vmatpush1.bf16.msra.mxu0 %v6612_v25  ;;  %1962 = vmatpush1.bf16.msra.mxu1 %v6613_v1 }
 0x43e   :  { %1922 = vmatprep.subr.bf16.mxu0 %v6614_v9  ;;  %1963 = vmatprep.subr.bf16.mxu1 %v6615_v30 }
 0x441   :  { %1923 = vmatpush1.bf16.msra.mxu0 %v6616_v31  ;;  %1964 = vmatpush1.bf16.msra.mxu1 %v5398_v32 }
 0x442   :  { %1924 = vmatprep.subr.bf16.mxu0 %v5401_v7  ;;  %1965 = vmatprep.subr.bf16.mxu1 %v5404_v38 }
 0x445   :  { %1925 = vmatpush1.bf16.msra.mxu0 %v5407_v44  ;;  %1966 = vmatpush1.bf16.msra.mxu1 %v5410_v41 }
 0x446   :  { %2017 = vmatprep.subr.bf16.mxu0 %v5203_v49  ;;  %2058 = vmatprep.subr.bf16.mxu1 %v5206_v50 }
 0x448   :  { %1943 = vmatmul.mubr.bf16.vlgmr.msra.gmra.mrb[28].mxu0 %v1640_v22  ;;  %1984 = vmatmul.mubr.bf16.vlgmr.msra.gmra.mrb[28].mxu1 %v1640_v22  ;;  %v6645_v22 = vld [vmem:[#allocation28_spill] sm:$0xff] }
 0x449   :  { %2018 = vmatpush1.bf16.msra.mxu0 %v5209_v51  ;;  %2059 = vmatpush1.bf16.msra.mxu1 %v5212_v52 }
 0x44a   :  { %2019 = vmatprep.subr.bf16.mxu0 %v5215_v3  ;;  %2060 = vmatprep.subr.bf16.mxu1 %v5218_v34 }
 0x44b   :  { %2049 = vmatprep.mubr.bf16.mxu0 %v6538_v0  ;;  %2090 = vmatprep.mubr.bf16.mxu1 %v6538_v0 }
 0x44d   :  { %2020 = vmatpush1.bf16.msra.mxu0 %v5223_v54  ;;  %2061 = vmatpush1.bf16.msra.mxu1 %v5226_v55 }
 0x44e   :  { %2021 = vmatprep.subr.bf16.mxu0 %v5229_v58  ;;  %2062 = vmatprep.subr.bf16.mxu1 %v5232_v59 }
 0x451   :  { %2022 = vmatpush1.bf16.msra.mxu0 %v5235_v61  ;;  %2063 = vmatpush1.bf16.msra.mxu1 %v5238_v23 }
 0x452   :  { %2023 = vmatprep.subr.bf16.mxu0 %v5241_v12  ;;  %2064 = vmatprep.subr.bf16.mxu1 %v5244_v13 }
 0x455   :  { %2024 = vmatpush1.bf16.msra.mxu0 %v5248_v17  ;;  %2065 = vmatpush1.bf16.msra.mxu1 %v5251_v26  ;;  %v6648_v17 = vld [vmem:[#allocation52_spill] sm:$0xff] }
 0x456   :  { %2025 = vmatprep.subr.bf16.mxu0 %v6619_v19  ;;  %2066 = vmatprep.subr.bf16.mxu1 %v6620_v28  ;;  %v6647_v19 = vld [vmem:[#allocation31_spill] sm:$0xff] }
 0x459   :  { %2026 = vmatpush1.bf16.msra.mxu0 %v6622_v2  ;;  %2067 = vmatpush1.bf16.msra.mxu1 %v6640_v27 }
 0x45a   :  { %2027 = vmatprep.subr.bf16.mxu0 %v6641_v21  ;;  %2068 = vmatprep.subr.bf16.mxu1 %v6642_v8 }
 0x45d   :  { %2028 = vmatpush1.bf16.msra.mxu0 %v6643_v40  ;;  %2069 = vmatpush1.bf16.msra.mxu1 %v6644_v42 }
 0x45e   :  { %2029 = vmatprep.subr.bf16.mxu0 %v6645_v22  ;;  %2070 = vmatprep.subr.bf16.mxu1 %v6629_v6 }
 0x461   :  { %2030 = vmatpush1.bf16.msra.mxu0 %v6646_v43  ;;  %2071 = vmatpush1.bf16.msra.mxu1 %v6647_v19 }
 0x462   :  { %2031 = vmatprep.subr.bf16.mxu0 %v6632_v5  ;;  %2072 = vmatprep.subr.bf16.mxu1 %v6633_v35 }
 0x465   :  { %2032 = vmatpush1.bf16.msra.mxu0 %v6634_v33  ;;  %2073 = vmatpush1.bf16.msra.mxu1 %v6635_v39 }
 0x466   :  { %2099 = vmatprep.subr.bf16.mxu0 %v6638_v10  ;;  %2140 = vmatprep.subr.bf16.mxu1 %v6639_v24 }
 0x4db   :  { %v1758_v42 = vpop.f32.mrb[24].mxu0  ;;  %v1799_v22 = vpop.f32.mrb[24].mxu1 }
 0x4dc   :  { %v1806_v40 = vmul.f32 0.5, %v1758_v42  ;;  %v1760_v6 = vpop.f32.mrb[25].mxu0  ;;  %v1801_v8 = vpop.f32.mrb[25].mxu1 }
 0x4dd   :  { %v1810_v43 = vmul.f32 0.5, %v1760_v6  ;;  %v1762_v21 = vpop.f32.mrb[26].mxu0  ;;  %v1803_v19 = vpop.f32.mrb[26].mxu1  ;;  %v1815_v33 = vmul.f32 0.5, %v1801_v8  ;;  %v5610_v6 = vld [vmem:[#allocation9] sm:$0xff] }
 0x4de   :  { %4081 = vtanh.f32 %v1806_v40  ;;  %v1763_v5 = vpop.f32.mrb[27].mxu0  ;;  %v1804_v27 = vpop.f32.mrb[27].mxu1  ;;  %6649 = vst [vmem:[#allocation49_spill] sm:$0xff] %v5610_v6  ;;  %vm1824_vm6 = vcmp.gt.s32.totalorder %v5610_v6, 3  ;;  %vm2199_vm8 = vcmp.gt.s32.totalorder %v5610_v6, 4 }
 0x4df   :  { %4083 = vtanh.f32 %v1810_v43  ;;  %v5909_v6 = vld [vmem:[#allocation11 + $0xe0] ss:$16 sps:$4 sm:$0xff]  }
 0x4e0   :  { %4085 = vtanh.f32 %v1799_v22 }
 0x4e1   :  { %4087 = vtanh.f32 %v1815_v33 }
 0x4e8   :  { %v4082_v35 = vpop.eup %4081 }
 0x4e9   :  { %v4084_v39 = vpop.eup %4083  ;;  %v1808_v2 = vmul.f32 0.5, %v4082_v35 }
 0x4ea   :  { %v1812_v10 = vmul.f32 0.5, %v4084_v39  ;;  %v4086_v28 = vpop.eup %4085 }
 0x4eb   :  { %v1809_v24 = vadd.f32 0.5, %v1808_v2  ;;  %v4088_v43 = vpop.eup %4087  ;;  %v6650_v2 = vld [vmem:[#allocation53_spill] sm:$0xff] }
 0x4ec   :  { %v1813_v26 = vadd.f32 0.5, %v1812_v10  ;;  %v1817_v27 = vmul.f32 0.5, %v4088_v43  ;;  %v2014_v43 = vld [vmem:[#allocation6 + $0x20] sm:$0xf] }
 0x4ed   :  { %v1820_v42 = vmul.f32 %v4086_v28, %v1809_v24 }
 0x4ee   :  { %v1819_v13 = vmul.f32 %v1813_v26, %v6648_v17  ;;  %v1818_v35 = vadd.f32 0.5, %v1817_v27 }
 0x4f0   :  { %v1821_v19 = vadd.f32 %v1820_v42, %v1819_v13 }
 0x4f2   :  { %4089 = vtanh.f32 %v1821_v19  ;;  %v5614_v5 = vsel %vm1824_vm6, %v1821_v19, %v6648_v17 }
 0x4fc   :  { %v4090_v39 = vpop.eup %4089 }
 0x4fd   :  { %v1823_v33 = vmul.f32 %v4090_v39, %v1818_v35  ;;  %v6652_v39 = vld [vmem:[#allocation47_spill] sm:$0xff] }
 0x4ff   :  { %v5617_v21 = vsel %vm1824_vm6, %v1823_v33, %v6650_v2  ;;  %v6653_v33 = vld [vmem:[#allocation25_spill] sm:$0xff]  ;;  %v5672_v2 = vld [vmem:[#allocation9 + $0x8] sm:$0xff] }
 0x500   :  { %v2016_v26 = vpack.c.bf16 %v5617_v21, %v5617_v21  ;;  %6655 = vst [vmem:[#allocation50_spill] sm:$0xff] %v5672_v2  ;;  %vm2010_vm7 = vcmp.gt.s32.totalorder %v5672_v2, 3  ;;  %vm2385_vm9 = vcmp.gt.s32.totalorder %v5672_v2, 4 }
 0x502   :  { %2050 = vmatmul.mubr.bf16.vlgmr.msra.gmra.mrb[32].mxu0 %v2016_v26  ;;  %2091 = vmatmul.mubr.bf16.vlgmr.msra.gmra.mrb[32].mxu1 %v2016_v26  ;;  %v6656_v26 = vld [vmem:[#allocation33_spill] sm:$0xff] }
 0x503   :  { %2100 = vmatpush1.bf16.msra.mxu0 %v5321_v45  ;;  %2141 = vmatpush1.bf16.msra.mxu1 %v5324_v46 }
 0x504   :  { %2101 = vmatprep.subr.bf16.mxu0 %v5327_v20  ;;  %2142 = vmatprep.subr.bf16.mxu1 %v5330_v47 }
 0x505   :  { %2131 = vmatprep.mubr.bf16.mxu0 %v6538_v0  ;;  %2172 = vmatprep.mubr.bf16.mxu1 %v6538_v0 }
 0x507   :  { %2102 = vmatpush1.bf16.msra.mxu0 %v5335_v48  ;;  %2143 = vmatpush1.bf16.msra.mxu1 %v5338_v53 }
 0x508   :  { %2103 = vmatprep.subr.bf16.mxu0 %v5341_v56  ;;  %2144 = vmatprep.subr.bf16.mxu1 %v5344_v60 }
 0x50b   :  { %2104 = vmatpush1.bf16.msra.mxu0 %v5347_v62  ;;  %2145 = vmatpush1.bf16.msra.mxu1 %v5350_v63 }
 0x50c   :  { %2105 = vmatprep.subr.bf16.mxu0 %v5353_v37  ;;  %2146 = vmatprep.subr.bf16.mxu1 %v5356_v18 }
 0x50f   :  { %2106 = vmatpush1.bf16.msra.mxu0 %v5359_v11  ;;  %2147 = vmatpush1.bf16.msra.mxu1 %v5362_v14 }
 0x510   :  { %2107 = vmatprep.subr.bf16.mxu0 %v5365_v15  ;;  %2148 = vmatprep.subr.bf16.mxu1 %v5368_v16 }
 0x513   :  { %2108 = vmatpush1.bf16.msra.mxu0 %v5371_v29  ;;  %2149 = vmatpush1.bf16.msra.mxu1 %v5374_v57 }
 0x514   :  { %2109 = vmatprep.subr.bf16.mxu0 %v5377_v36  ;;  %2150 = vmatprep.subr.bf16.mxu1 %v5380_v4 }
 0x517   :  { %2110 = vmatpush1.bf16.msra.mxu0 %v6612_v25  ;;  %2151 = vmatpush1.bf16.msra.mxu1 %v6613_v1 }
 0x518   :  { %2111 = vmatprep.subr.bf16.mxu0 %v6614_v9  ;;  %2152 = vmatprep.subr.bf16.mxu1 %v6615_v30 }
 0x51b   :  { %2112 = vmatpush1.bf16.msra.mxu0 %v6616_v31  ;;  %2153 = vmatpush1.bf16.msra.mxu1 %v5398_v32  ;;  %v1944_v13 = vpop.f32.mrb[28].mxu0  ;;  %v1985_v17 = vpop.f32.mrb[28].mxu1 }
 0x51c   :  { %v1992_v28 = vmul.f32 0.5, %v1944_v13  ;;  %v1946_v24 = vpop.f32.mrb[29].mxu0  ;;  %v1987_v10 = vpop.f32.mrb[29].mxu1  ;;  %2113 = vmatprep.subr.bf16.mxu0 %v5401_v7  ;;  %2154 = vmatprep.subr.bf16.mxu1 %v5404_v38  ;;  %v6658_v13 = vld [vmem:[#allocation38_spill] sm:$0xff] }
 0x51d   :  { %v1996_v8 = vmul.f32 0.5, %v1946_v24  ;;  %v1948_v40 = vpop.f32.mrb[30].mxu0  ;;  %v1989_v22 = vpop.f32.mrb[30].mxu1  ;;  %v2001_v27 = vmul.f32 0.5, %v1987_v10  ;;  %v6660_v24 = vld [vmem:[#allocation46_spill] sm:$0xff]  ;;  %v6661_v10 = vld [vmem:[#allocation41_spill] sm:$0xff] }
 0x51e   :  { %4091 = vtanh.f32 %v1992_v28  ;;  %v1949_v42 = vpop.f32.mrb[31].mxu0  ;;  %v1990_v19 = vpop.f32.mrb[31].mxu1  ;;  %v6662_v40 = vld [vmem:[#allocation42_spill] sm:$0xff]  ;;  %v6663_v22 = vld [vmem:[#allocation27_spill] sm:$0xff] }
 0x51f   :  { %4093 = vtanh.f32 %v1996_v8  ;;  %2114 = vmatpush1.bf16.msra.mxu0 %v5407_v44  ;;  %2155 = vmatpush1.bf16.msra.mxu1 %v5410_v41  ;;  %v6664_v42 = vld [vmem:[#allocation28_spill] sm:$0xff]  ;;  %v6665_v19 = vld [vmem:[#allocation29_spill] sm:$0xff] }
 0x520   :  { %2203 = vmatprep.subr.bf16.mxu0 %v5203_v49  ;;  %2244 = vmatprep.subr.bf16.mxu1 %v5206_v50  ;;  %4095 = vtanh.f32 %v1985_v17  ;;  %v6659_v17 = vld [vmem:[#allocation39_spill] sm:$0xff] }
 0x521   :  { %4097 = vtanh.f32 %v2001_v27  ;;  %v6666_v27 = vld [vmem:[#allocation30_spill] sm:$0xff] }
 0x522   :  { %2132 = vmatmul.mubr.bf16.vlgmr.msra.gmra.mrb[32].mxu0 %v2014_v43  ;;  %2173 = vmatmul.mubr.bf16.vlgmr.msra.gmra.mrb[32].mxu1 %v2014_v43 }
 0x523   :  { %2204 = vmatpush1.bf16.msra.mxu0 %v5209_v51  ;;  %2245 = vmatpush1.bf16.msra.mxu1 %v5212_v52 }
 0x524   :  { %2205 = vmatprep.subr.bf16.mxu0 %v5215_v3  ;;  %2246 = vmatprep.subr.bf16.mxu1 %v5218_v34 }
 0x525   :  { %2235 = vmatprep.mubr.bf16.mxu0 %v6538_v0  ;;  %2276 = vmatprep.mubr.bf16.mxu1 %v6538_v0 }
 0x527   :  { %2206 = vmatpush1.bf16.msra.mxu0 %v5223_v54  ;;  %2247 = vmatpush1.bf16.msra.mxu1 %v5226_v55  ;;  %v6651_v54 = vld [vmem:[#allocation24_spill] sm:$0xff] }
 0x528   :  { %v4092_v49 = vpop.eup %4091  ;;  %2207 = vmatprep.subr.bf16.mxu0 %v5229_v58  ;;  %2248 = vmatprep.subr.bf16.mxu1 %v5232_v59  ;;  %v6654_v59 = vld [vmem:[#allocation26_spill] sm:$0xff] }
 0x529   :  { %v4094_v50 = vpop.eup %4093  ;;  %v1994_v51 = vmul.f32 0.5, %v4092_v49  ;;  %v6667_v49 = vld [vmem:[#allocation31_spill] sm:$0xff] }
 0x52a   :  { %v1998_v52 = vmul.f32 0.5, %v4094_v50  ;;  %v4096_v34 = vpop.eup %4095 }
 0x52b   :  { %v1995_v3 = vadd.f32 0.5, %v1994_v51  ;;  %2208 = vmatpush1.bf16.msra.mxu0 %v5235_v61  ;;  %2249 = vmatpush1.bf16.msra.mxu1 %v5238_v23  ;;  %v6657_v23 = vld [vmem:[#allocation36_spill] sm:$0xff]  ;;  %v4098_v28 = vpop.eup %4097 }
 0x52c   :  { %v1999_v35 = vadd.f32 0.5, %v1998_v52  ;;  %2209 = vmatprep.subr.bf16.mxu0 %v5241_v12  ;;  %2250 = vmatprep.subr.bf16.mxu1 %v6651_v54  ;;  %v2003_v8 = vmul.f32 0.5, %v4098_v28  ;;  %v6668_v51 = vld [vmem:[#allocation32_spill] sm:$0xff]  ;;  %v6669_v52 = vld [vmem:[#allocation34_spill] sm:$0xff] }
 0x52d   :  { %v2006_v55 = vmul.f32 %v4096_v34, %v1995_v3  ;;  %v6670_v34 = vld [vmem:[#allocation35_spill] sm:$0xff]  ;;  %v6672_v54 = vld [vmem:[#allocation48_spill] sm:$0xff] }
 0x52e   :  { %v2005_v58 = vmul.f32 %v1999_v35, %v6652_v39  ;;  %v2004_v43 = vadd.f32 0.5, %v2003_v8  ;;  %v6671_v35 = vld [vmem:[#allocation45_spill] sm:$0xff] }
 0x52f   :  { %2210 = vmatpush1.bf16.msra.mxu0 %v6653_v33  ;;  %2251 = vmatpush1.bf16.msra.mxu1 %v6654_v59 }
 0x530   :  { %v2007_v61 = vadd.f32 %v2006_v55, %v2005_v58  ;;  %2211 = vmatprep.subr.bf16.mxu0 %v6656_v26  ;;  %2252 = vmatprep.subr.bf16.mxu1 %v6657_v23  ;;  %v6674_v58 = vld [vmem:[#allocation23_spill] sm:$0xff] }
 0x532   :  { %4099 = vtanh.f32 %v2007_v61  ;;  %v5680_v12 = vsel %vm2010_vm7, %v2007_v61, %v6652_v39  ;;  %v6673_v39 = vld [vmem:[#allocation40_spill] sm:$0xff] }
 0x533   :  { %2212 = vmatpush1.bf16.msra.mxu0 %v6658_v13  ;;  %2253 = vmatpush1.bf16.msra.mxu1 %v6659_v17 }
 0x534   :  { %2213 = vmatprep.subr.bf16.mxu0 %v6660_v24  ;;  %2254 = vmatprep.subr.bf16.mxu1 %v6661_v10 }
 0x537   :  { %2214 = vmatpush1.bf16.msra.mxu0 %v6662_v40  ;;  %2255 = vmatpush1.bf16.msra.mxu1 %v6663_v22 }
 0x538   :  { %2215 = vmatprep.subr.bf16.mxu0 %v6664_v42  ;;  %2256 = vmatprep.subr.bf16.mxu1 %v6665_v19 }
 0x53b   :  { %2216 = vmatpush1.bf16.msra.mxu0 %v6666_v27  ;;  %2257 = vmatpush1.bf16.msra.mxu1 %v6667_v49 }
 0x53c   :  { %v4100_v50 = vpop.eup %4099  ;;  %2217 = vmatprep.subr.bf16.mxu0 %v6668_v51  ;;  %2258 = vmatprep.subr.bf16.mxu1 %v6669_v52 }
 0x53d   :  { %v2009_v3 = vmul.f32 %v4100_v50, %v2004_v43 }
 0x53f   :  { %2218 = vmatpush1.bf16.msra.mxu0 %v6670_v34  ;;  %2259 = vmatpush1.bf16.msra.mxu1 %v6671_v35  ;;  %v5699_v55 = vsel %vm2010_vm7, %v2009_v3, %v6672_v54  ;;  %v5823_v3 = vld [vmem:[#allocation11] ss:$16 sps:$4 sm:$0xff]   ;;  %v5840_v54 = vld [vmem:[#allocation11 + $0x28] ss:$16 sps:$4 sm:$0xff]  }
 0x540   :  { %2285 = vmatprep.subr.bf16.mxu0 %v6673_v39  ;;  %2326 = vmatprep.subr.bf16.mxu1 %v6674_v58  ;;  %v2202_v33 = vpack.c.bf16 %v5699_v55, %v5699_v55 }
 0x542   :  { %2236 = vmatmul.mubr.bf16.vlgmr.msra.gmra.mrb[36].mxu0 %v2202_v33  ;;  %2277 = vmatmul.mubr.bf16.vlgmr.msra.gmra.mrb[36].mxu1 %v2202_v33  ;;  %v5849_v33 = vld [vmem:[#allocation11 + $0x40] ss:$16 sps:$4 sm:$0xff]  }
 0x543   :  { %2286 = vmatpush1.bf16.msra.mxu0 %v5321_v45  ;;  %2327 = vmatpush1.bf16.msra.mxu1 %v5324_v46  ;;  %v2015_v45 = vld [vmem:[#allocation6 + $0x24] sm:$0xf] }
 0x544   :  { %2287 = vmatprep.subr.bf16.mxu0 %v5327_v20  ;;  %2328 = vmatprep.subr.bf16.mxu1 %v5330_v47  ;;  %v5737_v46 = vld [vmem:[#allocation12 + $0x4] ss:$16 sps:$4 sm:$0xff]   ;;  %v5740_v20 = vld [vmem:[#allocation12 + $0xc] ss:$16 sps:$4 sm:$0xff]   ;;  %v5746_v47 = vld [vmem:[#allocation12 + $0x8] ss:$16 sps:$4 sm:$0xff]  }
 0x545   :  { %2317 = vmatprep.mubr.bf16.mxu0 %v6538_v0  ;;  %2358 = vmatprep.mubr.bf16.mxu1 %v6538_v0 }
 0x547   :  { %2288 = vmatpush1.bf16.msra.mxu0 %v5335_v48  ;;  %2329 = vmatpush1.bf16.msra.mxu1 %v5338_v53  ;;  %v5752_v48 = vld [vmem:[#allocation12 + $0x2c] ss:$16 sps:$4 sm:$0xff]   ;;  %v5757_v53 = vld [vmem:[#allocation12 + $0x20] ss:$16 sps:$4 sm:$0xff]  }
 0x548   :  { %2289 = vmatprep.subr.bf16.mxu0 %v5341_v56  ;;  %2330 = vmatprep.subr.bf16.mxu1 %v5344_v60  ;;  %v5760_v56 = vld [vmem:[#allocation12 + $0x28] ss:$16 sps:$4 sm:$0xff]   ;;  %v5763_v60 = vld [vmem:[#allocation12 + $0x44] ss:$16 sps:$4 sm:$0xff]  }
 0x54b   :  { %2290 = vmatpush1.bf16.msra.mxu0 %v5347_v62  ;;  %2331 = vmatpush1.bf16.msra.mxu1 %v5350_v63  ;;  %v5766_v62 = vld [vmem:[#allocation12 + $0x4c] ss:$16 sps:$4 sm:$0xff]   ;;  %v5769_v63 = vld [vmem:[#allocation12 + $0x40] ss:$16 sps:$4 sm:$0xff]  }
 0x54c   :  { %2291 = vmatprep.subr.bf16.mxu0 %v5353_v37  ;;  %2332 = vmatprep.subr.bf16.mxu1 %v5356_v18  ;;  %v5772_v37 = vld [vmem:[#allocation12 + $0x48] ss:$16 sps:$4 sm:$0xff]   ;;  %v5775_v18 = vld [vmem:[#allocation12 + $0x64] ss:$16 sps:$4 sm:$0xff]  }
 0x54f   :  { %2292 = vmatpush1.bf16.msra.mxu0 %v5359_v11  ;;  %2333 = vmatpush1.bf16.msra.mxu1 %v5362_v14  ;;  %v5778_v11 = vld [vmem:[#allocation12 + $0x6c] ss:$16 sps:$4 sm:$0xff]   ;;  %v5781_v14 = vld [vmem:[#allocation12 + $0x60] ss:$16 sps:$4 sm:$0xff]  }
 0x550   :  { %2293 = vmatprep.subr.bf16.mxu0 %v5365_v15  ;;  %2334 = vmatprep.subr.bf16.mxu1 %v5368_v16  ;;  %6675 = vst [vmem:[#allocation51_spill] sm:$0xff] %v5778_v11  ;;  %6676 = vst [vmem:[#allocation37_spill] sm:$0xff] %v5781_v14  ;;  %v5784_v15 = vld [vmem:[#allocation12 + $0x68] ss:$16 sps:$4 sm:$0xff]   ;;  %v5787_v16 = vld [vmem:[#allocation12 + $0x84] ss:$16 sps:$4 sm:$0xff]  }
 0x551   :  { %6677 = vst [vmem:[#allocation43_spill] sm:$0xff] %v5784_v15  ;;  %6678 = vst [vmem:[#allocation44_spill] sm:$0xff] %v5787_v16 }
 0x553   :  { %2294 = vmatpush1.bf16.msra.mxu0 %v5371_v29  ;;  %2335 = vmatpush1.bf16.msra.mxu1 %v5374_v57  ;;  %v5790_v29 = vld [vmem:[#allocation12 + $0x8c] ss:$16 sps:$4 sm:$0xff]   ;;  %v5793_v57 = vld [vmem:[#allocation12 + $0x80] ss:$16 sps:$4 sm:$0xff]  }
 0x554   :  { %2295 = vmatprep.subr.bf16.mxu0 %v5377_v36  ;;  %2336 = vmatprep.subr.bf16.mxu1 %v5380_v4  ;;  %6679 = vst [vmem:[#allocation52_spill] sm:$0xff] %v5790_v29  ;;  %6680 = vst [vmem:[#allocation53_spill] sm:$0xff] %v5793_v57  ;;  %v5796_v36 = vld [vmem:[#allocation12 + $0x88] ss:$16 sps:$4 sm:$0xff]  }
 0x555   :  { %6681 = vst [vmem:[#allocation24_spill] sm:$0xff] %v5796_v36 }
 0x557   :  { %2296 = vmatpush1.bf16.msra.mxu0 %v6612_v25  ;;  %2337 = vmatpush1.bf16.msra.mxu1 %v6613_v1 }
 0x558   :  { %2297 = vmatprep.subr.bf16.mxu0 %v6614_v9  ;;  %2338 = vmatprep.subr.bf16.mxu1 %v6615_v30 }
 0x55b   :  { %2298 = vmatpush1.bf16.msra.mxu0 %v6616_v31  ;;  %2339 = vmatpush1.bf16.msra.mxu1 %v5398_v32  ;;  %v5743_v32 = vld [vmem:[#allocation12] ss:$16 sps:$4 sm:$0xff]  }
 0x55c   :  { %2299 = vmatprep.subr.bf16.mxu0 %v5401_v7  ;;  %2340 = vmatprep.subr.bf16.mxu1 %v5404_v38 }
 0x55f   :  { %2300 = vmatpush1.bf16.msra.mxu0 %v5407_v44  ;;  %2341 = vmatpush1.bf16.msra.mxu1 %v5410_v41  ;;  %v5749_v41 = vld [vmem:[#allocation12 + $0x24] ss:$16 sps:$4 sm:$0xff]  }
 0x560   :  { %2392 = vmatprep.subr.bf16.mxu0 %v5737_v46  ;;  %2433 = vmatprep.subr.bf16.mxu1 %v5740_v20 }
 0x562   :  { %2318 = vmatmul.mubr.bf16.vlgmr.msra.gmra.mrb[36].mxu0 %v2015_v45  ;;  %2359 = vmatmul.mubr.bf16.vlgmr.msra.gmra.mrb[36].mxu1 %v2015_v45  ;;  %v5852_v45 = vld [vmem:[#allocation11 + $0x48] ss:$16 sps:$4 sm:$0xff]  }
 0x563   :  { %2393 = vmatpush1.bf16.msra.mxu0 %v5743_v32  ;;  %2434 = vmatpush1.bf16.msra.mxu1 %v5746_v47 }
 0x564   :  { %2394 = vmatprep.subr.bf16.mxu0 %v5749_v41  ;;  %2435 = vmatprep.subr.bf16.mxu1 %v5752_v48 }
 0x565   :  { %2424 = vmatprep.mubr.bf16.mxu0 %v6538_v0  ;;  %2465 = vmatprep.mubr.bf16.mxu1 %v6538_v0 }
 0x567   :  { %2395 = vmatpush1.bf16.msra.mxu0 %v5757_v53  ;;  %2436 = vmatpush1.bf16.msra.mxu1 %v5760_v56 }
 0x568   :  { %2396 = vmatprep.subr.bf16.mxu0 %v5763_v60  ;;  %2437 = vmatprep.subr.bf16.mxu1 %v5766_v62 }
 0x56b   :  { %2397 = vmatpush1.bf16.msra.mxu0 %v5769_v63  ;;  %2438 = vmatpush1.bf16.msra.mxu1 %v5772_v37 }
 0x56c   :  { %2398 = vmatprep.subr.bf16.mxu0 %v5775_v18  ;;  %2439 = vmatprep.subr.bf16.mxu1 %v5778_v11 }
 0x56f   :  { %2399 = vmatpush1.bf16.msra.mxu0 %v5781_v14  ;;  %2440 = vmatpush1.bf16.msra.mxu1 %v5784_v15 }
 0x570   :  { %2400 = vmatprep.subr.bf16.mxu0 %v5787_v16  ;;  %2441 = vmatprep.subr.bf16.mxu1 %v5790_v29 }
 0x573   :  { %2401 = vmatpush1.bf16.msra.mxu0 %v5793_v57  ;;  %2442 = vmatpush1.bf16.msra.mxu1 %v5796_v36 }
 0x574   :  { %2402 = vmatprep.subr.bf16.mxu0 %v6660_v24  ;;  %2443 = vmatprep.subr.bf16.mxu1 %v6661_v10 }
 0x577   :  { %2403 = vmatpush1.bf16.msra.mxu0 %v6662_v40  ;;  %2444 = vmatpush1.bf16.msra.mxu1 %v6663_v22 }
 0x578   :  { %2404 = vmatprep.subr.bf16.mxu0 %v6664_v42  ;;  %2445 = vmatprep.subr.bf16.mxu1 %v6665_v19 }
 0x57b   :  { %2405 = vmatpush1.bf16.msra.mxu0 %v6666_v27  ;;  %2446 = vmatpush1.bf16.msra.mxu1 %v6667_v49 }
 0x57c   :  { %2406 = vmatprep.subr.bf16.mxu0 %v6668_v51  ;;  %2447 = vmatprep.subr.bf16.mxu1 %v6669_v52 }
 0x57f   :  { %2407 = vmatpush1.bf16.msra.mxu0 %v6670_v34  ;;  %2448 = vmatpush1.bf16.msra.mxu1 %v6671_v35  ;;  %v5826_v34 = vld [vmem:[#allocation11 + $0x8] ss:$16 sps:$4 sm:$0xff]   ;;  %v5832_v35 = vld [vmem:[#allocation11 + $0x2c] ss:$16 sps:$4 sm:$0xff]  }
 0x580   :  { %2474 = vmatprep.subr.bf16.mxu0 %v6673_v39  ;;  %2515 = vmatprep.subr.bf16.mxu1 %v6674_v58  ;;  %v5843_v39 = vld [vmem:[#allocation11 + $0x44] ss:$16 sps:$4 sm:$0xff]   ;;  %v5846_v58 = vld [vmem:[#allocation11 + $0x4c] ss:$16 sps:$4 sm:$0xff]  }
 0x5f5   :  { %v2133_v4 = vpop.f32.mrb[32].mxu0  ;;  %v2174_v7 = vpop.f32.mrb[32].mxu1 }
 0x5f6   :  { %v2181_v38 = vmul.f32 0.5, %v2133_v4  ;;  %v2135_v44 = vpop.f32.mrb[33].mxu0  ;;  %v2176_v25 = vpop.f32.mrb[33].mxu1  ;;  %v5855_v4 = vld [vmem:[#allocation11 + $0x64] ss:$16 sps:$4 sm:$0xff]  }
 0x5f7   :  { %v2185_v1 = vmul.f32 0.5, %v2135_v44  ;;  %v2137_v9 = vpop.f32.mrb[34].mxu0  ;;  %v2178_v30 = vpop.f32.mrb[34].mxu1  ;;  %v2190_v61 = vmul.f32 0.5, %v2176_v25  ;;  %v5864_v44 = vld [vmem:[#allocation11 + $0x68] ss:$16 sps:$4 sm:$0xff]  }
 0x5f8   :  { %4101 = vtanh.f32 %v2181_v38  ;;  %v2138_v31 = vpop.f32.mrb[35].mxu0  ;;  %v2179_v59 = vpop.f32.mrb[35].mxu1  ;;  %v5861_v38 = vld [vmem:[#allocation11 + $0x60] ss:$16 sps:$4 sm:$0xff]   ;;  %v5867_v25 = vld [vmem:[#allocation11 + $0x84] ss:$16 sps:$4 sm:$0xff]  }
 0x5f9   :  { %4103 = vtanh.f32 %v2185_v1  ;;  %v5870_v1 = vld [vmem:[#allocation11 + $0x8c] ss:$16 sps:$4 sm:$0xff]   ;;  %v5873_v9 = vld [vmem:[#allocation11 + $0x80] ss:$16 sps:$4 sm:$0xff]   ;;  %v5876_v30 = vld [vmem:[#allocation11 + $0x88] ss:$16 sps:$4 sm:$0xff]  }
 0x5fa   :  { %4105 = vtanh.f32 %v2174_v7  ;;  %v5858_v7 = vld [vmem:[#allocation11 + $0x6c] ss:$16 sps:$4 sm:$0xff]   ;;  %v5879_v31 = vld [vmem:[#allocation11 + $0xa4] ss:$16 sps:$4 sm:$0xff]  }
 0x5fb   :  { %4107 = vtanh.f32 %v2190_v61  ;;  %v5882_v59 = vld [vmem:[#allocation11 + $0xac] ss:$16 sps:$4 sm:$0xff]   ;;  %v5885_v61 = vld [vmem:[#allocation11 + $0xa0] ss:$16 sps:$4 sm:$0xff]  }
 0x602   :  { %v4102_v26 = vpop.eup %4101 }
 0x603   :  { %v4104_v23 = vpop.eup %4103  ;;  %v2183_v13 = vmul.f32 0.5, %v4102_v26  ;;  %v5888_v26 = vld [vmem:[#allocation11 + $0xa8] ss:$16 sps:$4 sm:$0xff]  }
 0x604   :  { %v2187_v17 = vmul.f32 0.5, %v4104_v23  ;;  %v4106_v24 = vpop.eup %4105  ;;  %v5891_v23 = vld [vmem:[#allocation11 + $0xc4] ss:$16 sps:$4 sm:$0xff]  }
 0x605   :  { %v2184_v28 = vadd.f32 0.5, %v2183_v13  ;;  %v4108_v19 = vpop.eup %4107  ;;  %v5894_v13 = vld [vmem:[#allocation11 + $0xcc] ss:$16 sps:$4 sm:$0xff]  }
 0x606   :  { %v2188_v10 = vadd.f32 0.5, %v2187_v17  ;;  %v2192_v43 = vmul.f32 0.5, %v4108_v19  ;;  %v5897_v17 = vld [vmem:[#allocation11 + $0xc0] ss:$16 sps:$4 sm:$0xff]   ;;  %v5903_v19 = vld [vmem:[#allocation11 + $0xe4] ss:$16 sps:$4 sm:$0xff]  }
 0x607   :  { %v2195_v8 = vmul.f32 %v4106_v24, %v2184_v28  ;;  %v5900_v28 = vld [vmem:[#allocation11 + $0xc8] ss:$16 sps:$4 sm:$0xff]  }
 0x608   :  { %v2194_v40 = vmul.f32 %v2188_v10, %v5614_v5  ;;  %v2193_v27 = vadd.f32 0.5, %v2192_v43  ;;  %v5906_v43 = vld [vmem:[#allocation11 + $0xec] ss:$16 sps:$4 sm:$0xff]  }
 0x60a   :  { %v2196_v22 = vadd.f32 %v2195_v8, %v2194_v40 }
 0x60c   :  { %4109 = vtanh.f32 %v2196_v22  ;;  %v5816_v42 = vsel %vm2199_vm8, %v2196_v22, %v5614_v5  ;;  %v5829_v5 = vld [vmem:[#allocation11 + $0x24] ss:$16 sps:$4 sm:$0xff]  }
 0x60d   :  { %6682 = vst [vmem:[#allocation47_spill] sm:$0xff] %v5816_v42  ;;  %v2389_v42 = vld [vmem:[#allocation6 + $0x28] sm:$0xf] }
 0x616   :  { %v4110_v49 = vpop.eup %4109 }
 0x617   :  { %v2198_v50 = vmul.f32 %v4110_v49, %v2193_v27 }
 0x619   :  { %v5819_v51 = vsel %vm2199_vm8, %v2198_v50, %v5617_v21  ;;  %v5837_v21 = vld [vmem:[#allocation11 + $0x20] ss:$16 sps:$4 sm:$0xff]  }
 0x61a   :  { %6683 = vst [vmem:[#allocation25_spill] sm:$0xff] %v5819_v51  ;;  %v2391_v52 = vpack.c.bf16 %v5819_v51, %v5819_v51 }
 0x61c   :  { %2425 = vmatmul.mubr.bf16.vlgmr.msra.gmra.mrb[40].mxu0 %v2391_v52  ;;  %2466 = vmatmul.mubr.bf16.vlgmr.msra.gmra.mrb[40].mxu1 %v2391_v52 }
 0x61d   :  { %2475 = vmatpush1.bf16.msra.mxu0 %v5823_v3  ;;  %2516 = vmatpush1.bf16.msra.mxu1 %v5826_v34 }
 0x61e   :  { %2476 = vmatprep.subr.bf16.mxu0 %v5829_v5  ;;  %2517 = vmatprep.subr.bf16.mxu1 %v5832_v35 }
 0x61f   :  { %2506 = vmatprep.mubr.bf16.mxu0 %v6538_v0  ;;  %2547 = vmatprep.mubr.bf16.mxu1 %v6538_v0 }
 0x621   :  { %2477 = vmatpush1.bf16.msra.mxu0 %v5837_v21  ;;  %2518 = vmatpush1.bf16.msra.mxu1 %v5840_v54 }
 0x622   :  { %2478 = vmatprep.subr.bf16.mxu0 %v5843_v39  ;;  %2519 = vmatprep.subr.bf16.mxu1 %v5846_v58 }
 0x625   :  { %2479 = vmatpush1.bf16.msra.mxu0 %v5849_v33  ;;  %2520 = vmatpush1.bf16.msra.mxu1 %v5852_v45 }
 0x626   :  { %2480 = vmatprep.subr.bf16.mxu0 %v5855_v4  ;;  %2521 = vmatprep.subr.bf16.mxu1 %v5858_v7 }
 0x629   :  { %2481 = vmatpush1.bf16.msra.mxu0 %v5861_v38  ;;  %2522 = vmatpush1.bf16.msra.mxu1 %v5864_v44 }
 0x62a   :  { %2482 = vmatprep.subr.bf16.mxu0 %v5867_v25  ;;  %2523 = vmatprep.subr.bf16.mxu1 %v5870_v1 }
 0x62d   :  { %2483 = vmatpush1.bf16.msra.mxu0 %v5873_v9  ;;  %2524 = vmatpush1.bf16.msra.mxu1 %v5876_v30 }
 0x62e   :  { %2484 = vmatprep.subr.bf16.mxu0 %v5879_v31  ;;  %2525 = vmatprep.subr.bf16.mxu1 %v5882_v59 }
 0x631   :  { %2485 = vmatpush1.bf16.msra.mxu0 %v5885_v61  ;;  %2526 = vmatpush1.bf16.msra.mxu1 %v5888_v26 }
 0x632   :  { %2486 = vmatprep.subr.bf16.mxu0 %v5891_v23  ;;  %2527 = vmatprep.subr.bf16.mxu1 %v5894_v13 }
 0x635   :  { %2487 = vmatpush1.bf16.msra.mxu0 %v5897_v17  ;;  %2528 = vmatpush1.bf16.msra.mxu1 %v5900_v28  ;;  %v2319_v24 = vpop.f32.mrb[36].mxu0  ;;  %v2360_v10 = vpop.f32.mrb[36].mxu1 }
 0x636   :  { %v2367_v8 = vmul.f32 0.5, %v2319_v24  ;;  %v2321_v40 = vpop.f32.mrb[37].mxu0  ;;  %v2362_v22 = vpop.f32.mrb[37].mxu1  ;;  %2488 = vmatprep.subr.bf16.mxu0 %v5903_v19  ;;  %2529 = vmatprep.subr.bf16.mxu1 %v5906_v43  ;;  %v5912_v24 = vld [vmem:[#allocation11 + $0xe8] ss:$16 sps:$4 sm:$0xff]  }
 0x637   :  { %v2371_v27 = vmul.f32 0.5, %v2321_v40  ;;  %v2323_v49 = vpop.f32.mrb[38].mxu0  ;;  %v2364_v50 = vpop.f32.mrb[38].mxu1 }
 0x638   :  { %4111 = vtanh.f32 %v2367_v8  ;;  %v2324_v52 = vpop.f32.mrb[39].mxu0  ;;  %v2365_v51 = vpop.f32.mrb[39].mxu1 }
 0x639   :  { %4113 = vtanh.f32 %v2371_v27  ;;  %2489 = vmatpush1.bf16.msra.mxu0 %v5909_v6  ;;  %2530 = vmatpush1.bf16.msra.mxu1 %v5912_v24  ;;  %v2376_v51 = vmul.f32 0.5, %v2362_v22 }
 0x63a   :  { %2578 = vmatprep.subr.bf16.mxu0 %v5737_v46  ;;  %2619 = vmatprep.subr.bf16.mxu1 %v5740_v20  ;;  %4115 = vtanh.f32 %v2360_v10 }
 0x63b   :  { %4117 = vtanh.f32 %v2376_v51 }
 0x63c   :  { %2507 = vmatmul.mubr.bf16.vlgmr.msra.gmra.mrb[40].mxu0 %v2389_v42  ;;  %2548 = vmatmul.mubr.bf16.vlgmr.msra.gmra.mrb[40].mxu1 %v2389_v42 }
 0x63d   :  { %2579 = vmatpush1.bf16.msra.mxu0 %v5743_v32  ;;  %2620 = vmatpush1.bf16.msra.mxu1 %v5746_v47 }
 0x63e   :  { %2580 = vmatprep.subr.bf16.mxu0 %v5749_v41  ;;  %2621 = vmatprep.subr.bf16.mxu1 %v5752_v48 }
 0x63f   :  { %2610 = vmatprep.mubr.bf16.mxu0 %v6538_v0  ;;  %2651 = vmatprep.mubr.bf16.mxu1 %v6538_v0 }
 0x641   :  { %2581 = vmatpush1.bf16.msra.mxu0 %v5757_v53  ;;  %2622 = vmatpush1.bf16.msra.mxu1 %v5760_v56 }
 0x642   :  { %v4112_v10 = vpop.eup %4111  ;;  %2582 = vmatprep.subr.bf16.mxu0 %v5763_v60  ;;  %2623 = vmatprep.subr.bf16.mxu1 %v5766_v62 }
 0x643   :  { %v4114_v42 = vpop.eup %4113  ;;  %v2369_v8 = vmul.f32 0.5, %v4112_v10 }
 0x644   :  { %v2373_v40 = vmul.f32 0.5, %v4114_v42  ;;  %v4116_v49 = vpop.eup %4115 }
 0x645   :  { %v2370_v27 = vadd.f32 0.5, %v2369_v8  ;;  %2583 = vmatpush1.bf16.msra.mxu0 %v5769_v63  ;;  %2624 = vmatpush1.bf16.msra.mxu1 %v5772_v37  ;;  %v4118_v42 = vpop.eup %4117  ;;  %v5944_v8 = vld [vmem:[#allocation12 + $0xa4] ss:$16 sps:$4 sm:$0xff]  }
 0x646   :  { %v2374_v22 = vadd.f32 0.5, %v2373_v40  ;;  %2584 = vmatprep.subr.bf16.mxu0 %v5775_v18  ;;  %2625 = vmatprep.subr.bf16.mxu1 %v5778_v11  ;;  %6685 = vst [vmem:[#allocation33_spill] sm:$0xff] %v5944_v8  ;;  %v5947_v40 = vld [vmem:[#allocation12 + $0xac] ss:$16 sps:$4 sm:$0xff]  }
 0x647   :  { %v2381_v50 = vmul.f32 %v4116_v49, %v2370_v27  ;;  %6686 = vst [vmem:[#allocation36_spill] sm:$0xff] %v5947_v40  ;;  %v2378_v27 = vmul.f32 0.5, %v4118_v42  ;;  %v5950_v49 = vld [vmem:[#allocation12 + $0xa0] ss:$16 sps:$4 sm:$0xff]   ;;  %v5965_v42 = vld [vmem:[#allocation12 + $0xc8] ss:$16 sps:$4 sm:$0xff]  }
 0x648   :  { %v2380_v52 = vmul.f32 %v2374_v22, %v5680_v12  ;;  %6687 = vst [vmem:[#allocation38_spill] sm:$0xff] %v5950_v49  ;;  %v5956_v22 = vld [vmem:[#allocation12 + $0xc4] ss:$16 sps:$4 sm:$0xff]   ;;  %6692 = vst [vmem:[#allocation27_spill] sm:$0xff] %v5965_v42 }
 0x649   :  { %2585 = vmatpush1.bf16.msra.mxu0 %v5781_v14  ;;  %2626 = vmatpush1.bf16.msra.mxu1 %v5784_v15  ;;  %6689 = vst [vmem:[#allocation46_spill] sm:$0xff] %v5956_v22 }
 0x64a   :  { %v2382_v51 = vadd.f32 %v2381_v50, %v2380_v52  ;;  %2586 = vmatprep.subr.bf16.mxu0 %v5787_v16  ;;  %2627 = vmatprep.subr.bf16.mxu1 %v5790_v29  ;;  %v5959_v50 = vld [vmem:[#allocation12 + $0xcc] ss:$16 sps:$4 sm:$0xff]   ;;  %v2379_v52 = vadd.f32 0.5, %v2378_v27  ;;  %v5977_v27 = vld [vmem:[#allocation12 + $0xe8] ss:$16 sps:$4 sm:$0xff]  }
 0x64b   :  { %6690 = vst [vmem:[#allocation41_spill] sm:$0xff] %v5959_v50  ;;  %6696 = vst [vmem:[#allocation31_spill] sm:$0xff] %v5977_v27 }
 0x64c   :  { %4119 = vtanh.f32 %v2382_v51  ;;  %v5940_v10 = vsel %vm2385_vm9, %v2382_v51, %v5680_v12  ;;  %v5953_v12 = vld [vmem:[#allocation12 + $0xa8] ss:$16 sps:$4 sm:$0xff]   ;;  %v5962_v51 = vld [vmem:[#allocation12 + $0xc0] ss:$16 sps:$4 sm:$0xff]  }
 0x64d   :  { %6684 = vst [vmem:[#allocation26_spill] sm:$0xff] %v5940_v10  ;;  %2587 = vmatpush1.bf16.msra.mxu0 %v5793_v57  ;;  %2628 = vmatpush1.bf16.msra.mxu1 %v5796_v36  ;;  %6688 = vst [vmem:[#allocation39_spill] sm:$0xff] %v5953_v12 }
 0x64e   :  { %2588 = vmatprep.subr.bf16.mxu0 %v5944_v8  ;;  %2629 = vmatprep.subr.bf16.mxu1 %v5947_v40  ;;  %6691 = vst [vmem:[#allocation42_spill] sm:$0xff] %v5962_v51 }
 0x651   :  { %2589 = vmatpush1.bf16.msra.mxu0 %v5950_v49  ;;  %2630 = vmatpush1.bf16.msra.mxu1 %v5953_v12  ;;  %v5968_v49 = vld [vmem:[#allocation12 + $0xe4] ss:$16 sps:$4 sm:$0xff]   ;;  %v5971_v12 = vld [vmem:[#allocation12 + $0xec] ss:$16 sps:$4 sm:$0xff]  }
 0x652   :  { %2590 = vmatprep.subr.bf16.mxu0 %v5956_v22  ;;  %2631 = vmatprep.subr.bf16.mxu1 %v5959_v50  ;;  %6693 = vst [vmem:[#allocation28_spill] sm:$0xff] %v5968_v49  ;;  %6694 = vst [vmem:[#allocation29_spill] sm:$0xff] %v5971_v12  ;;  %v5974_v50 = vld [vmem:[#allocation12 + $0xe0] ss:$16 sps:$4 sm:$0xff]  }
 0x653   :  { %6695 = vst [vmem:[#allocation30_spill] sm:$0xff] %v5974_v50 }
 0x655   :  { %2591 = vmatpush1.bf16.msra.mxu0 %v5962_v51  ;;  %2632 = vmatpush1.bf16.msra.mxu1 %v5965_v42  ;;  %v5985_v51 = vld [vmem:[#allocation11 + $0x4] ss:$16 sps:$4 sm:$0xff]  }
 0x656   :  { %v4120_v10 = vpop.eup %4119  ;;  %2592 = vmatprep.subr.bf16.mxu0 %v5968_v49  ;;  %2633 = vmatprep.subr.bf16.mxu1 %v5971_v12  ;;  %6698 = vst [vmem:[#allocation34_spill] sm:$0xff] %v5985_v51  ;;  %v5988_v49 = vld [vmem:[#allocation11 + $0xc] ss:$16 sps:$4 sm:$0xff]  }
 0x657   :  { %v2384_v22 = vmul.f32 %v4120_v10, %v2379_v52  ;;  %6699 = vst [vmem:[#allocation35_spill] sm:$0xff] %v5988_v49  ;;  %v6701_v52 = vld [vmem:[#allocation39_spill] sm:$0xff] }
 0x659   :  { %2593 = vmatpush1.bf16.msra.mxu0 %v5974_v50  ;;  %2634 = vmatpush1.bf16.msra.mxu1 %v5977_v27  ;;  %v5983_v42 = vsel %vm2385_vm9, %v2384_v22, %v5699_v55  ;;  %v2390_v55 = vld [vmem:[#allocation6 + $0x2c] sm:$0xf]  ;;  %v6700_v22 = vld [vmem:[#allocation38_spill] sm:$0xff] }
 0x65a   :  { %6697 = vst [vmem:[#allocation32_spill] sm:$0xff] %v5983_v42  ;;  %2660 = vmatprep.subr.bf16.mxu0 %v5985_v51  ;;  %2701 = vmatprep.subr.bf16.mxu1 %v5988_v49  ;;  %v2577_v10 = vpack.c.bf16 %v5983_v42, %v5983_v42  ;;  %v6704_v42 = vld [vmem:[#allocation42_spill] sm:$0xff] }
 0x65c   :  { %2611 = vmatmul.mubr.bf16.vlgmr.msra.gmra.mrb[44].mxu0 %v2577_v10  ;;  %2652 = vmatmul.mubr.bf16.vlgmr.msra.gmra.mrb[44].mxu1 %v2577_v10  ;;  %v6702_v10 = vld [vmem:[#allocation46_spill] sm:$0xff] }
 0x65d   :  { %2661 = vmatpush1.bf16.msra.mxu0 %v5823_v3  ;;  %2702 = vmatpush1.bf16.msra.mxu1 %v5826_v34 }
 0x65e   :  { %2662 = vmatprep.subr.bf16.mxu0 %v5829_v5  ;;  %2703 = vmatprep.subr.bf16.mxu1 %v5832_v35 }
 0x65f   :  { %2692 = vmatprep.mubr.bf16.mxu0 %v6538_v0  ;;  %2733 = vmatprep.mubr.bf16.mxu1 %v6538_v0 }
 0x661   :  { %2663 = vmatpush1.bf16.msra.mxu0 %v5837_v21  ;;  %2704 = vmatpush1.bf16.msra.mxu1 %v5840_v54 }
 0x662   :  { %2664 = vmatprep.subr.bf16.mxu0 %v5843_v39  ;;  %2705 = vmatprep.subr.bf16.mxu1 %v5846_v58 }
 0x665   :  { %2665 = vmatpush1.bf16.msra.mxu0 %v5849_v33  ;;  %2706 = vmatpush1.bf16.msra.mxu1 %v5852_v45 }
 0x666   :  { %2666 = vmatprep.subr.bf16.mxu0 %v5855_v4  ;;  %2707 = vmatprep.subr.bf16.mxu1 %v5858_v7 }
 0x669   :  { %2667 = vmatpush1.bf16.msra.mxu0 %v5861_v38  ;;  %2708 = vmatpush1.bf16.msra.mxu1 %v5864_v44 }
 0x66a   :  { %2668 = vmatprep.subr.bf16.mxu0 %v5867_v25  ;;  %2709 = vmatprep.subr.bf16.mxu1 %v5870_v1 }
 0x66d   :  { %2669 = vmatpush1.bf16.msra.mxu0 %v5873_v9  ;;  %2710 = vmatpush1.bf16.msra.mxu1 %v5876_v30 }
 0x66e   :  { %2670 = vmatprep.subr.bf16.mxu0 %v5879_v31  ;;  %2711 = vmatprep.subr.bf16.mxu1 %v5882_v59 }
 0x671   :  { %2671 = vmatpush1.bf16.msra.mxu0 %v5885_v61  ;;  %2712 = vmatpush1.bf16.msra.mxu1 %v5888_v26 }
 0x672   :  { %2672 = vmatprep.subr.bf16.mxu0 %v5891_v23  ;;  %2713 = vmatprep.subr.bf16.mxu1 %v5894_v13 }
 0x675   :  { %2673 = vmatpush1.bf16.msra.mxu0 %v5897_v17  ;;  %2714 = vmatpush1.bf16.msra.mxu1 %v5900_v28 }
 0x676   :  { %2674 = vmatprep.subr.bf16.mxu0 %v5903_v19  ;;  %2715 = vmatprep.subr.bf16.mxu1 %v5906_v43 }
 0x679   :  { %2675 = vmatpush1.bf16.msra.mxu0 %v5909_v6  ;;  %2716 = vmatpush1.bf16.msra.mxu1 %v5912_v24 }
 0x67a   :  { %2767 = vmatprep.subr.bf16.mxu0 %v5737_v46  ;;  %2808 = vmatprep.subr.bf16.mxu1 %v5740_v20 }
 0x67c   :  { %2693 = vmatmul.mubr.bf16.vlgmr.msra.gmra.mrb[44].mxu0 %v2390_v55  ;;  %2734 = vmatmul.mubr.bf16.vlgmr.msra.gmra.mrb[44].mxu1 %v2390_v55  ;;  %v6703_v55 = vld [vmem:[#allocation41_spill] sm:$0xff] }
 0x67d   :  { %2768 = vmatpush1.bf16.msra.mxu0 %v5743_v32  ;;  %2809 = vmatpush1.bf16.msra.mxu1 %v5746_v47 }
 0x67e   :  { %2769 = vmatprep.subr.bf16.mxu0 %v5749_v41  ;;  %2810 = vmatprep.subr.bf16.mxu1 %v5752_v48 }
 0x67f   :  { %2799 = vmatprep.mubr.bf16.mxu0 %v6538_v0  ;;  %2840 = vmatprep.mubr.bf16.mxu1 %v6538_v0 }
 0x681   :  { %2770 = vmatpush1.bf16.msra.mxu0 %v5757_v53  ;;  %2811 = vmatpush1.bf16.msra.mxu1 %v5760_v56 }
 0x682   :  { %2771 = vmatprep.subr.bf16.mxu0 %v5763_v60  ;;  %2812 = vmatprep.subr.bf16.mxu1 %v5766_v62 }
 0x685   :  { %2772 = vmatpush1.bf16.msra.mxu0 %v5769_v63  ;;  %2813 = vmatpush1.bf16.msra.mxu1 %v5772_v37 }
 0x686   :  { %2773 = vmatprep.subr.bf16.mxu0 %v5775_v18  ;;  %2814 = vmatprep.subr.bf16.mxu1 %v5778_v11 }
 0x689   :  { %2774 = vmatpush1.bf16.msra.mxu0 %v5781_v14  ;;  %2815 = vmatpush1.bf16.msra.mxu1 %v5784_v15  ;;  %v6707_v14 = vld [vmem:[#allocation47_spill] sm:$0xff] }
 0x68a   :  { %2775 = vmatprep.subr.bf16.mxu0 %v5787_v16  ;;  %2816 = vmatprep.subr.bf16.mxu1 %v5790_v29  ;;  %v6705_v16 = vld [vmem:[#allocation27_spill] sm:$0xff]  ;;  %v6706_v29 = vld [vmem:[#allocation28_spill] sm:$0xff] }
 0x68d   :  { %2776 = vmatpush1.bf16.msra.mxu0 %v5793_v57  ;;  %2817 = vmatpush1.bf16.msra.mxu1 %v5796_v36 }
 0x68e   :  { %2777 = vmatprep.subr.bf16.mxu0 %v5944_v8  ;;  %2818 = vmatprep.subr.bf16.mxu1 %v5947_v40 }
 0x691   :  { %2778 = vmatpush1.bf16.msra.mxu0 %v6700_v22  ;;  %2819 = vmatpush1.bf16.msra.mxu1 %v6701_v52 }
 0x692   :  { %2779 = vmatprep.subr.bf16.mxu0 %v6702_v10  ;;  %2820 = vmatprep.subr.bf16.mxu1 %v6703_v55 }
 0x695   :  { %2780 = vmatpush1.bf16.msra.mxu0 %v6704_v42  ;;  %2821 = vmatpush1.bf16.msra.mxu1 %v6705_v16 }
 0x696   :  { %2781 = vmatprep.subr.bf16.mxu0 %v6706_v29  ;;  %2822 = vmatprep.subr.bf16.mxu1 %v5971_v12 }
 0x699   :  { %2782 = vmatpush1.bf16.msra.mxu0 %v5974_v50  ;;  %2823 = vmatpush1.bf16.msra.mxu1 %v5977_v27 }
 0x69a   :  { %2849 = vmatprep.subr.bf16.mxu0 %v5985_v51  ;;  %2890 = vmatprep.subr.bf16.mxu1 %v5988_v49 }
 0x70f   :  { %v2508_v52 = vpop.f32.mrb[40].mxu0  ;;  %v2549_v10 = vpop.f32.mrb[40].mxu1 }
 0x710   :  { %v2556_v22 = vmul.f32 0.5, %v2508_v52  ;;  %v2510_v55 = vpop.f32.mrb[41].mxu0  ;;  %v2551_v40 = vpop.f32.mrb[41].mxu1 }
 0x711   :  { %v2560_v42 = vmul.f32 0.5, %v2510_v55  ;;  %v2512_v8 = vpop.f32.mrb[42].mxu0  ;;  %v2553_v16 = vpop.f32.mrb[42].mxu1  ;;  %v2565_v50 = vmul.f32 0.5, %v2551_v40  ;;  %v6708_v55 = vld [vmem:[#allocation49_spill] sm:$0xff] }
 0x712   :  { %4121 = vtanh.f32 %v2556_v22  ;;  %v2513_v29 = vpop.f32.mrb[43].mxu0  ;;  %v2554_v36 = vpop.f32.mrb[43].mxu1  ;;  %vm2574_vm10 = vcmp.gt.s32.totalorder %v6708_v55, 5 }
 0x713   :  { %4123 = vtanh.f32 %v2560_v42 }
 0x714   :  { %4125 = vtanh.f32 %v2549_v10 }
 0x715   :  { %4127 = vtanh.f32 %v2565_v50 }
 0x71c   :  { %v4122_v12 = vpop.eup %4121 }
 0x71d   :  { %v4124_v27 = vpop.eup %4123  ;;  %v2558_v57 = vmul.f32 0.5, %v4122_v12 }
 0x71e   :  { %v2562_v51 = vmul.f32 0.5, %v4124_v27  ;;  %v4126_v2 = vpop.eup %4125  ;;  %v6710_v27 = vld [vmem:[#allocation25_spill] sm:$0xff] }
 0x71f   :  { %v2559_v49 = vadd.f32 0.5, %v2558_v57  ;;  %v4128_v36 = vpop.eup %4127 }
 0x720   :  { %v2563_v15 = vadd.f32 0.5, %v2562_v51  ;;  %v2567_v8 = vmul.f32 0.5, %v4128_v36 }
 0x721   :  { %v2570_v52 = vmul.f32 %v4126_v2, %v2559_v49 }
 0x722   :  { %v2569_v11 = vmul.f32 %v2563_v15, %v6707_v14  ;;  %v2568_v40 = vadd.f32 0.5, %v2567_v8 }
 0x724   :  { %v2571_v16 = vadd.f32 %v2570_v52, %v2569_v11 }
 0x726   :  { %4129 = vtanh.f32 %v2571_v16  ;;  %v6064_v29 = vsel %vm2574_vm10, %v2571_v16, %v6707_v14  ;;  %v2764_v16 = vld [vmem:[#allocation6 + $0x30] sm:$0xf] }
 0x727   :  { %6709 = vst [vmem:[#allocation45_spill] sm:$0xff] %v6064_v29 }
 0x730   :  { %v4130_v42 = vpop.eup %4129 }
 0x731   :  { %v2573_v12 = vmul.f32 %v4130_v42, %v2568_v40 }
 0x733   :  { %v6067_v50 = vsel %vm2574_vm10, %v2573_v12, %v6710_v27 }
 0x734   :  { %6711 = vst [vmem:[#allocation48_spill] sm:$0xff] %v6067_v50  ;;  %v2766_v2 = vpack.c.bf16 %v6067_v50, %v6067_v50  ;;  %v6727_v50 = vld [vmem:[#allocation41_spill] sm:$0xff] }
 0x736   :  { %2800 = vmatmul.mubr.bf16.vlgmr.msra.gmra.mrb[48].mxu0 %v2766_v2  ;;  %2841 = vmatmul.mubr.bf16.vlgmr.msra.gmra.mrb[48].mxu1 %v2766_v2 }
 0x737   :  { %2850 = vmatpush1.bf16.msra.mxu0 %v5823_v3  ;;  %2891 = vmatpush1.bf16.msra.mxu1 %v5826_v34 }
 0x738   :  { %2851 = vmatprep.subr.bf16.mxu0 %v5829_v5  ;;  %2892 = vmatprep.subr.bf16.mxu1 %v5832_v35 }
 0x739   :  { %2881 = vmatprep.mubr.bf16.mxu0 %v6538_v0  ;;  %2922 = vmatprep.mubr.bf16.mxu1 %v6538_v0 }
 0x73b   :  { %2852 = vmatpush1.bf16.msra.mxu0 %v5837_v21  ;;  %2893 = vmatpush1.bf16.msra.mxu1 %v5840_v54 }
 0x73c   :  { %2853 = vmatprep.subr.bf16.mxu0 %v5843_v39  ;;  %2894 = vmatprep.subr.bf16.mxu1 %v5846_v58 }
 0x73f   :  { %2854 = vmatpush1.bf16.msra.mxu0 %v5849_v33  ;;  %2895 = vmatpush1.bf16.msra.mxu1 %v5852_v45 }
 0x740   :  { %2855 = vmatprep.subr.bf16.mxu0 %v5855_v4  ;;  %2896 = vmatprep.subr.bf16.mxu1 %v5858_v7 }
 0x743   :  { %2856 = vmatpush1.bf16.msra.mxu0 %v5861_v38  ;;  %2897 = vmatpush1.bf16.msra.mxu1 %v5864_v44 }
 0x744   :  { %2857 = vmatprep.subr.bf16.mxu0 %v5867_v25  ;;  %2898 = vmatprep.subr.bf16.mxu1 %v5870_v1 }
 0x747   :  { %2858 = vmatpush1.bf16.msra.mxu0 %v5873_v9  ;;  %2899 = vmatpush1.bf16.msra.mxu1 %v5876_v30 }
 0x748   :  { %2859 = vmatprep.subr.bf16.mxu0 %v5879_v31  ;;  %2900 = vmatprep.subr.bf16.mxu1 %v5882_v59 }
 0x74b   :  { %2860 = vmatpush1.bf16.msra.mxu0 %v5885_v61  ;;  %2901 = vmatpush1.bf16.msra.mxu1 %v5888_v26 }
 0x74c   :  { %2861 = vmatprep.subr.bf16.mxu0 %v5891_v23  ;;  %2902 = vmatprep.subr.bf16.mxu1 %v5894_v13 }
 0x74f   :  { %2862 = vmatpush1.bf16.msra.mxu0 %v5897_v17  ;;  %2903 = vmatpush1.bf16.msra.mxu1 %v5900_v28  ;;  %v2694_v11 = vpop.f32.mrb[44].mxu0  ;;  %v2735_v14 = vpop.f32.mrb[44].mxu1 }
 0x750   :  { %v2742_v15 = vmul.f32 0.5, %v2694_v11  ;;  %v2696_v57 = vpop.f32.mrb[45].mxu0  ;;  %v2737_v49 = vpop.f32.mrb[45].mxu1  ;;  %2863 = vmatprep.subr.bf16.mxu0 %v5903_v19  ;;  %2904 = vmatprep.subr.bf16.mxu1 %v5906_v43 }
 0x751   :  { %v2746_v51 = vmul.f32 0.5, %v2696_v57  ;;  %v2698_v22 = vpop.f32.mrb[46].mxu0  ;;  %v2739_v10 = vpop.f32.mrb[46].mxu1  ;;  %v2751_v36 = vmul.f32 0.5, %v2737_v49  ;;  %v6713_v57 = vld [vmem:[#allocation26_spill] sm:$0xff] }
 0x752   :  { %4131 = vtanh.f32 %v2742_v15  ;;  %v2699_v52 = vpop.f32.mrb[47].mxu0  ;;  %v2740_v55 = vpop.f32.mrb[47].mxu1  ;;  %v6715_v22 = vld [vmem:[#allocation43_spill] sm:$0xff]  ;;  %v6716_v10 = vld [vmem:[#allocation50_spill] sm:$0xff] }
 0x753   :  { %4133 = vtanh.f32 %v2746_v51  ;;  %2864 = vmatpush1.bf16.msra.mxu0 %v5909_v6  ;;  %2905 = vmatpush1.bf16.msra.mxu1 %v5912_v24  ;;  %v6714_v51 = vld [vmem:[#allocation37_spill] sm:$0xff]  ;;  %vm2760_vm11 = vcmp.gt.s32.totalorder %v6716_v10, 5  ;;  %v6717_v55 = vld [vmem:[#allocation44_spill] sm:$0xff] }
 0x754   :  { %2953 = vmatprep.subr.bf16.mxu0 %v5737_v46  ;;  %2994 = vmatprep.subr.bf16.mxu1 %v5740_v20  ;;  %4135 = vtanh.f32 %v2735_v14  ;;  %v6712_v14 = vld [vmem:[#allocation51_spill] sm:$0xff] }
 0x755   :  { %4137 = vtanh.f32 %v2751_v36 }
 0x756   :  { %2882 = vmatmul.mubr.bf16.vlgmr.msra.gmra.mrb[48].mxu0 %v2764_v16  ;;  %2923 = vmatmul.mubr.bf16.vlgmr.msra.gmra.mrb[48].mxu1 %v2764_v16  ;;  %v6718_v16 = vld [vmem:[#allocation52_spill] sm:$0xff] }
 0x757   :  { %2954 = vmatpush1.bf16.msra.mxu0 %v5743_v32  ;;  %2995 = vmatpush1.bf16.msra.mxu1 %v5746_v47 }
 0x758   :  { %2955 = vmatprep.subr.bf16.mxu0 %v5749_v41  ;;  %2996 = vmatprep.subr.bf16.mxu1 %v5752_v48 }
 0x759   :  { %2985 = vmatprep.mubr.bf16.mxu0 %v6538_v0  ;;  %3026 = vmatprep.mubr.bf16.mxu1 %v6538_v0 }
 0x75b   :  { %2956 = vmatpush1.bf16.msra.mxu0 %v5757_v53  ;;  %2997 = vmatpush1.bf16.msra.mxu1 %v5760_v56 }
 0x75c   :  { %v4132_v8 = vpop.eup %4131  ;;  %2957 = vmatprep.subr.bf16.mxu0 %v5763_v60  ;;  %2998 = vmatprep.subr.bf16.mxu1 %v5766_v62 }
 0x75d   :  { %v4134_v40 = vpop.eup %4133  ;;  %v2744_v42 = vmul.f32 0.5, %v4132_v8  ;;  %v6720_v8 = vld [vmem:[#allocation53_spill] sm:$0xff] }
 0x75e   :  { %v2748_v12 = vmul.f32 0.5, %v4134_v40  ;;  %v4136_v2 = vpop.eup %4135  ;;  %v6721_v40 = vld [vmem:[#allocation24_spill] sm:$0xff] }
 0x75f   :  { %v2745_v27 = vadd.f32 0.5, %v2744_v42  ;;  %2958 = vmatpush1.bf16.msra.mxu0 %v5769_v63  ;;  %2999 = vmatpush1.bf16.msra.mxu1 %v5772_v37  ;;  %v4138_v42 = vpop.eup %4137 }
 0x760   :  { %v2749_v11 = vadd.f32 0.5, %v2748_v12  ;;  %2959 = vmatprep.subr.bf16.mxu0 %v5775_v18  ;;  %3000 = vmatprep.subr.bf16.mxu1 %v6712_v14  ;;  %v6722_v12 = vld [vmem:[#allocation33_spill] sm:$0xff] }
 0x761   :  { %v2756_v15 = vmul.f32 %v4136_v2, %v2745_v27  ;;  %v6723_v27 = vld [vmem:[#allocation36_spill] sm:$0xff]  ;;  %v2753_v2 = vmul.f32 0.5, %v4138_v42  ;;  %v6732_v42 = vld [vmem:[#allocation30_spill] sm:$0xff] }
 0x762   :  { %v2755_v49 = vmul.f32 %v2749_v11, %v6713_v57  ;;  %v6724_v11 = vld [vmem:[#allocation38_spill] sm:$0xff] }
 0x763   :  { %2960 = vmatpush1.bf16.msra.mxu0 %v6714_v51  ;;  %3001 = vmatpush1.bf16.msra.mxu1 %v6715_v22 }
 0x764   :  { %v2757_v52 = vadd.f32 %v2756_v15, %v2755_v49  ;;  %2961 = vmatprep.subr.bf16.mxu0 %v6717_v55  ;;  %3002 = vmatprep.subr.bf16.mxu1 %v6718_v16  ;;  %v6725_v15 = vld [vmem:[#allocation39_spill] sm:$0xff]  ;;  %v6726_v49 = vld [vmem:[#allocation46_spill] sm:$0xff] }
 0x766   :  { %4139 = vtanh.f32 %v2757_v52  ;;  %v6128_v36 = vsel %vm2760_vm11, %v2757_v52, %v6713_v57  ;;  %v2754_v57 = vadd.f32 0.5, %v2753_v2  ;;  %v6728_v52 = vld [vmem:[#allocation42_spill] sm:$0xff] }
 0x767   :  { %6719 = vst [vmem:[#allocation40_spill] sm:$0xff] %v6128_v36  ;;  %2962 = vmatpush1.bf16.msra.mxu0 %v6720_v8  ;;  %3003 = vmatpush1.bf16.msra.mxu1 %v6721_v40  ;;  %v6729_v36 = vld [vmem:[#allocation27_spill] sm:$0xff]  ;;  %v6730_v40 = vld [vmem:[#allocation28_spill] sm:$0xff]  ;;  %v6735_v2 = vld [vmem:[#allocation34_spill] sm:$0xff] }
 0x768   :  { %2963 = vmatprep.subr.bf16.mxu0 %v6722_v12  ;;  %3004 = vmatprep.subr.bf16.mxu1 %v6723_v27  ;;  %v6731_v12 = vld [vmem:[#allocation29_spill] sm:$0xff] }
 0x76b   :  { %2964 = vmatpush1.bf16.msra.mxu0 %v6724_v11  ;;  %3005 = vmatpush1.bf16.msra.mxu1 %v6725_v15  ;;  %v6733_v11 = vld [vmem:[#allocation31_spill] sm:$0xff]  ;;  %v6734_v15 = vld [vmem:[#allocation32_spill] sm:$0xff] }
 0x76c   :  { %2965 = vmatprep.subr.bf16.mxu0 %v6726_v49  ;;  %3006 = vmatprep.subr.bf16.mxu1 %v6727_v50 }
 0x76f   :  { %2966 = vmatpush1.bf16.msra.mxu0 %v6728_v52  ;;  %3007 = vmatpush1.bf16.msra.mxu1 %v6729_v36  ;;  %v6736_v52 = vld [vmem:[#allocation35_spill] sm:$0xff] }
 0x770   :  { %v4140_v29 = vpop.eup %4139  ;;  %2967 = vmatprep.subr.bf16.mxu0 %v6730_v40  ;;  %3008 = vmatprep.subr.bf16.mxu1 %v6731_v12 }
 0x771   :  { %v2759_v27 = vmul.f32 %v4140_v29, %v2754_v57  ;;  %v2765_v29 = vld [vmem:[#allocation6 + $0x34] sm:$0xf] }
 0x773   :  { %2968 = vmatpush1.bf16.msra.mxu0 %v6732_v42  ;;  %3009 = vmatpush1.bf16.msra.mxu1 %v6733_v11  ;;  %v6147_v49 = vsel %vm2760_vm11, %v2759_v27, %v6734_v15 }
 0x774   :  { %3035 = vmatprep.subr.bf16.mxu0 %v6735_v2  ;;  %3076 = vmatprep.subr.bf16.mxu1 %v6736_v52  ;;  %v2952_v36 = vpack.c.bf16 %v6147_v49, %v6147_v49 }
 0x776   :  { %2986 = vmatmul.mubr.bf16.vlgmr.msra.gmra.mrb[52].mxu0 %v2952_v36  ;;  %3027 = vmatmul.mubr.bf16.vlgmr.msra.gmra.mrb[52].mxu1 %v2952_v36 }
 0x777   :  { %3036 = vmatpush1.bf16.msra.mxu0 %v5823_v3  ;;  %3077 = vmatpush1.bf16.msra.mxu1 %v5826_v34 }
 0x778   :  { %3037 = vmatprep.subr.bf16.mxu0 %v5829_v5  ;;  %3078 = vmatprep.subr.bf16.mxu1 %v5832_v35 }
 0x779   :  { %3067 = vmatprep.mubr.bf16.mxu0 %v6538_v0  ;;  %3108 = vmatprep.mubr.bf16.mxu1 %v6538_v0 }
 0x77b   :  { %3038 = vmatpush1.bf16.msra.mxu0 %v5837_v21  ;;  %3079 = vmatpush1.bf16.msra.mxu1 %v5840_v54 }
 0x77c   :  { %3039 = vmatprep.subr.bf16.mxu0 %v5843_v39  ;;  %3080 = vmatprep.subr.bf16.mxu1 %v5846_v58 }
 0x77f   :  { %3040 = vmatpush1.bf16.msra.mxu0 %v5849_v33  ;;  %3081 = vmatpush1.bf16.msra.mxu1 %v5852_v45 }
 0x780   :  { %3041 = vmatprep.subr.bf16.mxu0 %v5855_v4  ;;  %3082 = vmatprep.subr.bf16.mxu1 %v5858_v7 }
 0x783   :  { %3042 = vmatpush1.bf16.msra.mxu0 %v5861_v38  ;;  %3083 = vmatpush1.bf16.msra.mxu1 %v5864_v44 }
 0x784   :  { %3043 = vmatprep.subr.bf16.mxu0 %v5867_v25  ;;  %3084 = vmatprep.subr.bf16.mxu1 %v5870_v1 }
 0x787   :  { %3044 = vmatpush1.bf16.msra.mxu0 %v5873_v9  ;;  %3085 = vmatpush1.bf16.msra.mxu1 %v5876_v30 }
 0x788   :  { %3045 = vmatprep.subr.bf16.mxu0 %v5879_v31  ;;  %3086 = vmatprep.subr.bf16.mxu1 %v5882_v59 }
 0x78b   :  { %3046 = vmatpush1.bf16.msra.mxu0 %v5885_v61  ;;  %3087 = vmatpush1.bf16.msra.mxu1 %v5888_v26 }
 0x78c   :  { %3047 = vmatprep.subr.bf16.mxu0 %v5891_v23  ;;  %3088 = vmatprep.subr.bf16.mxu1 %v5894_v13 }
 0x78f   :  { %3048 = vmatpush1.bf16.msra.mxu0 %v5897_v17  ;;  %3089 = vmatpush1.bf16.msra.mxu1 %v5900_v28 }
 0x790   :  { %3049 = vmatprep.subr.bf16.mxu0 %v5903_v19  ;;  %3090 = vmatprep.subr.bf16.mxu1 %v5906_v43 }
 0x793   :  { %3050 = vmatpush1.bf16.msra.mxu0 %v5909_v6  ;;  %3091 = vmatpush1.bf16.msra.mxu1 %v5912_v24 }
 0x794   :  { %3142 = vmatprep.subr.bf16.mxu0 %v5737_v46  ;;  %3183 = vmatprep.subr.bf16.mxu1 %v5740_v20  ;;  %v6737_v46 = vld [vmem:[#allocation24_spill] sm:$0xff]  ;;  %v6738_v20 = vld [vmem:[#allocation33_spill] sm:$0xff] }
 0x796   :  { %3068 = vmatmul.mubr.bf16.vlgmr.msra.gmra.mrb[52].mxu0 %v2765_v29  ;;  %3109 = vmatmul.mubr.bf16.vlgmr.msra.gmra.mrb[52].mxu1 %v2765_v29 }
 0x797   :  { %3143 = vmatpush1.bf16.msra.mxu0 %v5743_v32  ;;  %3184 = vmatpush1.bf16.msra.mxu1 %v5746_v47  ;;  %v6739_v32 = vld [vmem:[#allocation36_spill] sm:$0xff]  ;;  %v6740_v47 = vld [vmem:[#allocation38_spill] sm:$0xff] }
 0x798   :  { %3144 = vmatprep.subr.bf16.mxu0 %v5749_v41  ;;  %3185 = vmatprep.subr.bf16.mxu1 %v5752_v48  ;;  %v6741_v41 = vld [vmem:[#allocation39_spill] sm:$0xff]  ;;  %v6742_v48 = vld [vmem:[#allocation46_spill] sm:$0xff] }
 0x799   :  { %3174 = vmatprep.mubr.bf16.mxu0 %v6538_v0  ;;  %3215 = vmatprep.mubr.bf16.mxu1 %v6538_v0 }
 0x79b   :  { %3145 = vmatpush1.bf16.msra.mxu0 %v5757_v53  ;;  %3186 = vmatpush1.bf16.msra.mxu1 %v5760_v56  ;;  %v6743_v53 = vld [vmem:[#allocation42_spill] sm:$0xff]  ;;  %v6744_v56 = vld [vmem:[#allocation27_spill] sm:$0xff] }
 0x79c   :  { %3146 = vmatprep.subr.bf16.mxu0 %v5763_v60  ;;  %3187 = vmatprep.subr.bf16.mxu1 %v5766_v62 }
 0x79f   :  { %3147 = vmatpush1.bf16.msra.mxu0 %v5769_v63  ;;  %3188 = vmatpush1.bf16.msra.mxu1 %v5772_v37 }
 0x7a0   :  { %3148 = vmatprep.subr.bf16.mxu0 %v5775_v18  ;;  %3189 = vmatprep.subr.bf16.mxu1 %v6712_v14 }
 0x7a3   :  { %3149 = vmatpush1.bf16.msra.mxu0 %v6714_v51  ;;  %3190 = vmatpush1.bf16.msra.mxu1 %v6715_v22 }
 0x7a4   :  { %3150 = vmatprep.subr.bf16.mxu0 %v6717_v55  ;;  %3191 = vmatprep.subr.bf16.mxu1 %v6718_v16 }
 0x7a7   :  { %3151 = vmatpush1.bf16.msra.mxu0 %v6720_v8  ;;  %3192 = vmatpush1.bf16.msra.mxu1 %v6737_v46 }
 0x7a8   :  { %3152 = vmatprep.subr.bf16.mxu0 %v6738_v20  ;;  %3193 = vmatprep.subr.bf16.mxu1 %v6739_v32 }
 0x7ab   :  { %3153 = vmatpush1.bf16.msra.mxu0 %v6740_v47  ;;  %3194 = vmatpush1.bf16.msra.mxu1 %v6741_v41 }
 0x7ac   :  { %3154 = vmatprep.subr.bf16.mxu0 %v6742_v48  ;;  %3195 = vmatprep.subr.bf16.mxu1 %v6727_v50 }
 0x7af   :  { %3155 = vmatpush1.bf16.msra.mxu0 %v6743_v53  ;;  %3196 = vmatpush1.bf16.msra.mxu1 %v6744_v56 }
 0x7b0   :  { %3156 = vmatprep.subr.bf16.mxu0 %v6730_v40  ;;  %3197 = vmatprep.subr.bf16.mxu1 %v6731_v12 }
 0x7b3   :  { %3157 = vmatpush1.bf16.msra.mxu0 %v6732_v42  ;;  %3198 = vmatpush1.bf16.msra.mxu1 %v6733_v11 }
 0x7b4   :  { %3224 = vmatprep.subr.bf16.mxu0 %v6735_v2  ;;  %3265 = vmatprep.subr.bf16.mxu1 %v6736_v52  ;;  %v6745_v52 = vld [vmem:[#allocation45_spill] sm:$0xff] }
 0x829   :  { %v2883_v60 = vpop.f32.mrb[48].mxu0  ;;  %v2924_v62 = vpop.f32.mrb[48].mxu1 }
 0x82a   :  { %v2931_v63 = vmul.f32 0.5, %v2883_v60  ;;  %v2885_v37 = vpop.f32.mrb[49].mxu0  ;;  %v2926_v18 = vpop.f32.mrb[49].mxu1 }
 0x82b   :  { %v2935_v14 = vmul.f32 0.5, %v2885_v37  ;;  %v2887_v51 = vpop.f32.mrb[50].mxu0  ;;  %v2928_v22 = vpop.f32.mrb[50].mxu1  ;;  %v2940_v16 = vmul.f32 0.5, %v2926_v18  ;;  %v6222_v37 = vld [vmem:[#allocation9] sm:$0xff] }
 0x82c   :  { %4141 = vtanh.f32 %v2931_v63  ;;  %v2888_v10 = vpop.f32.mrb[51].mxu0  ;;  %v2929_v55 = vpop.f32.mrb[51].mxu1  ;;  %vm2949_vm12 = vcmp.gt.s32.totalorder %v6222_v37, 6  ;;  %vm3324_vm14 = vcmp.gt.s32.totalorder %v6222_v37, 7 }
 0x82d   :  { %4143 = vtanh.f32 %v2935_v14  ;;  %v6746_v55 = vld [vmem:[#allocation48_spill] sm:$0xff] }
 0x82e   :  { %4145 = vtanh.f32 %v2924_v62 }
 0x82f   :  { %4147 = vtanh.f32 %v2940_v16 }
 0x836   :  { %v4142_v36 = vpop.eup %4141 }
 0x837   :  { %v4144_v8 = vpop.eup %4143  ;;  %v2933_v27 = vmul.f32 0.5, %v4142_v36 }
 0x838   :  { %v2937_v15 = vmul.f32 0.5, %v4144_v8  ;;  %v4146_v29 = vpop.eup %4145  ;;  %v4325_v8 = vld [vmem:[#allocation12 + $0x6c] ss:$16 sps:$4 sm:$0xff]  }
 0x839   :  { %v2934_v57 = vadd.f32 0.5, %v2933_v27  ;;  %v4148_v18 = vpop.eup %4147 }
 0x83a   :  { %v2938_v46 = vadd.f32 0.5, %v2937_v15  ;;  %v2942_v14 = vmul.f32 0.5, %v4148_v18  ;;  %v6747_v15 = vld [vmem:[#allocation40_spill] sm:$0xff]  ;;  %v4329_v18 = vld [vmem:[#allocation12 + $0x84] ss:$16 sps:$4 sm:$0xff]  }
 0x83b   :  { %v2945_v60 = vmul.f32 %v4146_v29, %v2934_v57  ;;  %v4326_v29 = vld [vmem:[#allocation12 + $0x60] ss:$16 sps:$4 sm:$0xff]  }
 0x83c   :  { %v2944_v2 = vmul.f32 %v2938_v46, %v6745_v52  ;;  %v2943_v51 = vadd.f32 0.5, %v2942_v14  ;;  %v4327_v46 = vld [vmem:[#allocation12 + $0x68] ss:$16 sps:$4 sm:$0xff]   ;;  %v4330_v14 = vld [vmem:[#allocation12 + $0x8c] ss:$16 sps:$4 sm:$0xff]  }
 0x83e   :  { %v2946_v63 = vadd.f32 %v2945_v60, %v2944_v2  ;;  %v4324_v2 = vld [vmem:[#allocation12 + $0x64] ss:$16 sps:$4 sm:$0xff]   ;;  %v6268_v60 = vld [vmem:[#allocation9 + $0x8] sm:$0xff] }
 0x83f   :  { %vm3135_vm13 = vcmp.gt.s32.totalorder %v6268_v60, 6  ;;  %vm3510_vm15 = vcmp.gt.s32.totalorder %v6268_v60, 7 }
 0x840   :  { %4149 = vtanh.f32 %v2946_v63  ;;  %v6226_v62 = vsel %vm2949_vm12, %v2946_v63, %v6745_v52 }
 0x84a   :  { %v4150_v22 = vpop.eup %4149 }
 0x84b   :  { %v2948_v10 = vmul.f32 %v4150_v22, %v2943_v51  ;;  %v4331_v22 = vld [vmem:[#allocation12 + $0x80] ss:$16 sps:$4 sm:$0xff]  }
 0x84d   :  { %v6229_v16 = vsel %vm2949_vm12, %v2948_v10, %v6746_v55  ;;  %v4332_v10 = vld [vmem:[#allocation12 + $0x88] ss:$16 sps:$4 sm:$0xff]  }
 0x84e   :  { %v3141_v36 = vpack.c.bf16 %v6229_v16, %v6229_v16 }
 0x850   :  { %3175 = vmatmul.mubr.bf16.vlgmr.msra.gmra.mrb[56].mxu0 %v3141_v36  ;;  %3216 = vmatmul.mubr.bf16.vlgmr.msra.gmra.mrb[56].mxu1 %v3141_v36 }
 0x851   :  { %3225 = vmatpush1.bf16.msra.mxu0 %v5823_v3  ;;  %3266 = vmatpush1.bf16.msra.mxu1 %v5826_v34 }
 0x852   :  { %3226 = vmatprep.subr.bf16.mxu0 %v5829_v5  ;;  %3267 = vmatprep.subr.bf16.mxu1 %v5832_v35 }
 0x853   :  { %3256 = vmatprep.mubr.bf16.mxu0 %v6538_v0  ;;  %3297 = vmatprep.mubr.bf16.mxu1 %v6538_v0 }
 0x855   :  { %3227 = vmatpush1.bf16.msra.mxu0 %v5837_v21  ;;  %3268 = vmatpush1.bf16.msra.mxu1 %v5840_v54 }
 0x856   :  { %3228 = vmatprep.subr.bf16.mxu0 %v5843_v39  ;;  %3269 = vmatprep.subr.bf16.mxu1 %v5846_v58 }
 0x859   :  { %3229 = vmatpush1.bf16.msra.mxu0 %v5849_v33  ;;  %3270 = vmatpush1.bf16.msra.mxu1 %v5852_v45 }
 0x85a   :  { %3230 = vmatprep.subr.bf16.mxu0 %v5855_v4  ;;  %3271 = vmatprep.subr.bf16.mxu1 %v5858_v7  ;;  %v3139_v4 = vld [vmem:[#allocation6 + $0x38] sm:$0xf]  ;;  %v4312_v7 = vld [vmem:[#allocation12 + $0x4] ss:$16 sps:$4 sm:$0xff]  }
 0x85d   :  { %3231 = vmatpush1.bf16.msra.mxu0 %v5861_v38  ;;  %3272 = vmatpush1.bf16.msra.mxu1 %v5864_v44  ;;  %v4313_v38 = vld [vmem:[#allocation12 + $0xc] ss:$16 sps:$4 sm:$0xff]   ;;  %v4314_v44 = vld [vmem:[#allocation12] ss:$16 sps:$4 sm:$0xff]  }
 0x85e   :  { %3232 = vmatprep.subr.bf16.mxu0 %v5867_v25  ;;  %3273 = vmatprep.subr.bf16.mxu1 %v5870_v1  ;;  %v4315_v25 = vld [vmem:[#allocation12 + $0x8] ss:$16 sps:$4 sm:$0xff]   ;;  %v4316_v1 = vld [vmem:[#allocation12 + $0x24] ss:$16 sps:$4 sm:$0xff]  }
 0x861   :  { %3233 = vmatpush1.bf16.msra.mxu0 %v5873_v9  ;;  %3274 = vmatpush1.bf16.msra.mxu1 %v5876_v30  ;;  %v4317_v9 = vld [vmem:[#allocation12 + $0x2c] ss:$16 sps:$4 sm:$0xff]   ;;  %v4318_v30 = vld [vmem:[#allocation12 + $0x20] ss:$16 sps:$4 sm:$0xff]  }
 0x862   :  { %3234 = vmatprep.subr.bf16.mxu0 %v5879_v31  ;;  %3275 = vmatprep.subr.bf16.mxu1 %v5882_v59  ;;  %v4319_v31 = vld [vmem:[#allocation12 + $0x28] ss:$16 sps:$4 sm:$0xff]  }
 0x865   :  { %3235 = vmatpush1.bf16.msra.mxu0 %v5885_v61  ;;  %3276 = vmatpush1.bf16.msra.mxu1 %v5888_v26  ;;  %v4320_v61 = vld [vmem:[#allocation12 + $0x44] ss:$16 sps:$4 sm:$0xff]   ;;  %v4321_v26 = vld [vmem:[#allocation12 + $0x4c] ss:$16 sps:$4 sm:$0xff]  }
 0x866   :  { %3236 = vmatprep.subr.bf16.mxu0 %v5891_v23  ;;  %3277 = vmatprep.subr.bf16.mxu1 %v5894_v13 }
 0x869   :  { %3237 = vmatpush1.bf16.msra.mxu0 %v5897_v17  ;;  %3278 = vmatpush1.bf16.msra.mxu1 %v5900_v28  ;;  %v3069_v3 = vpop.f32.mrb[52].mxu0  ;;  %v3110_v34 = vpop.f32.mrb[52].mxu1 }
 0x86a   :  { %v3117_v5 = vmul.f32 0.5, %v3069_v3  ;;  %v3071_v35 = vpop.f32.mrb[53].mxu0  ;;  %v3112_v21 = vpop.f32.mrb[53].mxu1  ;;  %3238 = vmatprep.subr.bf16.mxu0 %v5903_v19  ;;  %3279 = vmatprep.subr.bf16.mxu1 %v5906_v43  ;;  %v4322_v19 = vld [vmem:[#allocation12 + $0x40] ss:$16 sps:$4 sm:$0xff]  }
 0x86b   :  { %v3121_v54 = vmul.f32 0.5, %v3071_v35  ;;  %v3073_v39 = vpop.f32.mrb[54].mxu0  ;;  %v3114_v58 = vpop.f32.mrb[54].mxu1  ;;  %v4323_v43 = vld [vmem:[#allocation12 + $0x48] ss:$16 sps:$4 sm:$0xff]  }
 0x86c   :  { %4151 = vtanh.f32 %v3117_v5  ;;  %v3074_v33 = vpop.f32.mrb[55].mxu0  ;;  %v3115_v45 = vpop.f32.mrb[55].mxu1  ;;  %v4341_v5 = vld [vmem:[#allocation11 + $0x40] ss:$16 sps:$4 sm:$0xff]   ;;  %v4342_v35 = vld [vmem:[#allocation11 + $0x48] ss:$16 sps:$4 sm:$0xff]  }
 0x86d   :  { %4153 = vtanh.f32 %v3121_v54  ;;  %3239 = vmatpush1.bf16.msra.mxu0 %v5909_v6  ;;  %3280 = vmatpush1.bf16.msra.mxu1 %v5912_v24  ;;  %v3126_v6 = vmul.f32 0.5, %v3112_v21  ;;  %v4343_v21 = vld [vmem:[#allocation11 + $0x64] ss:$16 sps:$4 sm:$0xff]   ;;  %v4344_v54 = vld [vmem:[#allocation11 + $0x6c] ss:$16 sps:$4 sm:$0xff]  }
 0x86e   :  { %3328 = vmatprep.subr.bf16.mxu0 %v4312_v7  ;;  %3369 = vmatprep.subr.bf16.mxu1 %v4313_v38  ;;  %4155 = vtanh.f32 %v3110_v34  ;;  %v4345_v39 = vld [vmem:[#allocation11 + $0x60] ss:$16 sps:$4 sm:$0xff]   ;;  %v4346_v58 = vld [vmem:[#allocation11 + $0x68] ss:$16 sps:$4 sm:$0xff]   ;;  %v4348_v33 = vld [vmem:[#allocation11 + $0x8c] ss:$16 sps:$4 sm:$0xff]  }
 0x86f   :  { %4157 = vtanh.f32 %v3126_v6  ;;  %v4349_v45 = vld [vmem:[#allocation11 + $0x80] ss:$16 sps:$4 sm:$0xff]   ;;  %v4351_v7 = vld [vmem:[#allocation11 + $0xa4] ss:$16 sps:$4 sm:$0xff]   ;;  %v4352_v38 = vld [vmem:[#allocation11 + $0xac] ss:$16 sps:$4 sm:$0xff]  }
 0x870   :  { %3257 = vmatmul.mubr.bf16.vlgmr.msra.gmra.mrb[56].mxu0 %v3139_v4  ;;  %3298 = vmatmul.mubr.bf16.vlgmr.msra.gmra.mrb[56].mxu1 %v3139_v4  ;;  %v4350_v4 = vld [vmem:[#allocation11 + $0x88] ss:$16 sps:$4 sm:$0xff]   ;;  %v4357_v6 = vld [vmem:[#allocation11 + $0xc0] ss:$16 sps:$4 sm:$0xff]  }
 0x871   :  { %3329 = vmatpush1.bf16.msra.mxu0 %v4314_v44  ;;  %3370 = vmatpush1.bf16.msra.mxu1 %v4315_v25  ;;  %v4353_v44 = vld [vmem:[#allocation11 + $0xa0] ss:$16 sps:$4 sm:$0xff]   ;;  %v4354_v25 = vld [vmem:[#allocation11 + $0xa8] ss:$16 sps:$4 sm:$0xff]  }
 0x872   :  { %3330 = vmatprep.subr.bf16.mxu0 %v4316_v1  ;;  %3371 = vmatprep.subr.bf16.mxu1 %v4317_v9  ;;  %v4355_v1 = vld [vmem:[#allocation11 + $0xc4] ss:$16 sps:$4 sm:$0xff]   ;;  %v4356_v9 = vld [vmem:[#allocation11 + $0xcc] ss:$16 sps:$4 sm:$0xff]  }
 0x873   :  { %3360 = vmatprep.mubr.bf16.mxu0 %v6538_v0  ;;  %3401 = vmatprep.mubr.bf16.mxu1 %v6538_v0 }
 0x875   :  { %3331 = vmatpush1.bf16.msra.mxu0 %v4318_v30  ;;  %3372 = vmatpush1.bf16.msra.mxu1 %v4319_v31  ;;  %v4358_v30 = vld [vmem:[#allocation11 + $0xc8] ss:$16 sps:$4 sm:$0xff]   ;;  %v4359_v31 = vld [vmem:[#allocation11 + $0xe4] ss:$16 sps:$4 sm:$0xff]  }
 0x876   :  { %v4152_v59 = vpop.eup %4151  ;;  %3332 = vmatprep.subr.bf16.mxu0 %v4320_v61  ;;  %3373 = vmatprep.subr.bf16.mxu1 %v4321_v26  ;;  %v4361_v61 = vld [vmem:[#allocation11 + $0xe0] ss:$16 sps:$4 sm:$0xff]   ;;  %v4362_v26 = vld [vmem:[#allocation11 + $0xe8] ss:$16 sps:$4 sm:$0xff]  }
 0x877   :  { %v4154_v23 = vpop.eup %4153  ;;  %v3119_v13 = vmul.f32 0.5, %v4152_v59  ;;  %v4360_v59 = vld [vmem:[#allocation11 + $0xec] ss:$16 sps:$4 sm:$0xff]  }
 0x878   :  { %v3123_v17 = vmul.f32 0.5, %v4154_v23  ;;  %v4156_v24 = vpop.eup %4155  ;;  %v3140_v23 = vld [vmem:[#allocation6 + $0x3c] sm:$0xf] }
 0x879   :  { %v3120_v28 = vadd.f32 0.5, %v3119_v13  ;;  %3333 = vmatpush1.bf16.msra.mxu0 %v4322_v19  ;;  %3374 = vmatpush1.bf16.msra.mxu1 %v4323_v43  ;;  %v4158_v55 = vpop.eup %4157 }
 0x87a   :  { %v3124_v52 = vadd.f32 0.5, %v3123_v17  ;;  %3334 = vmatprep.subr.bf16.mxu0 %v4324_v2  ;;  %3375 = vmatprep.subr.bf16.mxu1 %v4325_v8  ;;  %v3128_v36 = vmul.f32 0.5, %v4158_v55 }
 0x87b   :  { %v3131_v27 = vmul.f32 %v4156_v24, %v3120_v28 }
 0x87c   :  { %v3130_v57 = vmul.f32 %v3124_v52, %v6747_v15  ;;  %v3129_v3 = vadd.f32 0.5, %v3128_v36 }
 0x87d   :  { %3335 = vmatpush1.bf16.msra.mxu0 %v4326_v29  ;;  %3376 = vmatpush1.bf16.msra.mxu1 %v4327_v46 }
 0x87e   :  { %v3132_v63 = vadd.f32 %v3131_v27, %v3130_v57  ;;  %3336 = vmatprep.subr.bf16.mxu0 %v4329_v18  ;;  %3377 = vmatprep.subr.bf16.mxu1 %v4330_v14 }
 0x880   :  { %4159 = vtanh.f32 %v3132_v63  ;;  %v6274_v51 = vsel %vm3135_vm13, %v3132_v63, %v6747_v15 }
 0x881   :  { %3337 = vmatpush1.bf16.msra.mxu0 %v4331_v22  ;;  %3378 = vmatpush1.bf16.msra.mxu1 %v4332_v10 }
 0x882   :  { %3338 = vmatprep.subr.bf16.mxu0 %v6738_v20  ;;  %3379 = vmatprep.subr.bf16.mxu1 %v6739_v32 }
 0x885   :  { %3339 = vmatpush1.bf16.msra.mxu0 %v6740_v47  ;;  %3380 = vmatpush1.bf16.msra.mxu1 %v6741_v41  ;;  %v6749_v47 = vld [vmem:[#allocation35_spill] sm:$0xff] }
 0x886   :  { %3340 = vmatprep.subr.bf16.mxu0 %v6742_v48  ;;  %3381 = vmatprep.subr.bf16.mxu1 %v6727_v50  ;;  %v6748_v50 = vld [vmem:[#allocation34_spill] sm:$0xff] }
 0x887   :  { %v4338_v48 = vld [vmem:[#allocation11 + $0x28] ss:$16 sps:$4 sm:$0xff]  }
 0x889   :  { %3341 = vmatpush1.bf16.msra.mxu0 %v6743_v53  ;;  %3382 = vmatpush1.bf16.msra.mxu1 %v6744_v56  ;;  %v4339_v53 = vld [vmem:[#allocation11 + $0x44] ss:$16 sps:$4 sm:$0xff]   ;;  %v4340_v56 = vld [vmem:[#allocation11 + $0x4c] ss:$16 sps:$4 sm:$0xff]  }
 0x88a   :  { %v4160_v34 = vpop.eup %4159  ;;  %3342 = vmatprep.subr.bf16.mxu0 %v6730_v40  ;;  %3383 = vmatprep.subr.bf16.mxu1 %v6731_v12  ;;  %v4333_v40 = vld [vmem:[#allocation11] ss:$16 sps:$4 sm:$0xff]   ;;  %v4334_v12 = vld [vmem:[#allocation11 + $0x8] ss:$16 sps:$4 sm:$0xff]  }
 0x88b   :  { %v3134_v20 = vmul.f32 %v4160_v34, %v3129_v3 }
 0x88d   :  { %3343 = vmatpush1.bf16.msra.mxu0 %v6732_v42  ;;  %3384 = vmatpush1.bf16.msra.mxu1 %v6733_v11  ;;  %v6291_v32 = vsel %vm3135_vm13, %v3134_v20, %v6147_v49  ;;  %v4335_v42 = vld [vmem:[#allocation11 + $0x24] ss:$16 sps:$4 sm:$0xff]   ;;  %v4336_v11 = vld [vmem:[#allocation11 + $0x2c] ss:$16 sps:$4 sm:$0xff]   ;;  %v4337_v49 = vld [vmem:[#allocation11 + $0x20] ss:$16 sps:$4 sm:$0xff]  }
 0x88e   :  { %3410 = vmatprep.subr.bf16.mxu0 %v6748_v50  ;;  %3451 = vmatprep.subr.bf16.mxu1 %v6749_v47  ;;  %v3327_v41 = vpack.c.bf16 %v6291_v32, %v6291_v32 }
 0x890   :  { %3361 = vmatmul.mubr.bf16.vlgmr.msra.gmra.mrb[60].mxu0 %v3327_v41  ;;  %3402 = vmatmul.mubr.bf16.vlgmr.msra.gmra.mrb[60].mxu1 %v3327_v41 }
 0x891   :  { %3411 = vmatpush1.bf16.msra.mxu0 %v4333_v40  ;;  %3452 = vmatpush1.bf16.msra.mxu1 %v4334_v12 }
 0x892   :  { %3412 = vmatprep.subr.bf16.mxu0 %v4335_v42  ;;  %3453 = vmatprep.subr.bf16.mxu1 %v4336_v11 }
 0x893   :  { %3442 = vmatprep.mubr.bf16.mxu0 %v6538_v0  ;;  %3483 = vmatprep.mubr.bf16.mxu1 %v6538_v0  ;;  %v4347_v0 = vld [vmem:[#allocation11 + $0x84] ss:$16 sps:$4 sm:$0xff]  }
 0x895   :  { %3413 = vmatpush1.bf16.msra.mxu0 %v4337_v49  ;;  %3454 = vmatpush1.bf16.msra.mxu1 %v4338_v48 }
 0x896   :  { %3414 = vmatprep.subr.bf16.mxu0 %v4339_v53  ;;  %3455 = vmatprep.subr.bf16.mxu1 %v4340_v56 }
 0x899   :  { %3415 = vmatpush1.bf16.msra.mxu0 %v4341_v5  ;;  %3456 = vmatpush1.bf16.msra.mxu1 %v4342_v35 }
 0x89a   :  { %3416 = vmatprep.subr.bf16.mxu0 %v4343_v21  ;;  %3457 = vmatprep.subr.bf16.mxu1 %v4344_v54 }
 0x89d   :  { %3417 = vmatpush1.bf16.msra.mxu0 %v4345_v39  ;;  %3458 = vmatpush1.bf16.msra.mxu1 %v4346_v58 }
 0x89e   :  { %3418 = vmatprep.subr.bf16.mxu0 %v4347_v0  ;;  %3459 = vmatprep.subr.bf16.mxu1 %v4348_v33 }
 0x8a1   :  { %3419 = vmatpush1.bf16.msra.mxu0 %v4349_v45  ;;  %3460 = vmatpush1.bf16.msra.mxu1 %v4350_v4 }
 0x8a2   :  { %3420 = vmatprep.subr.bf16.mxu0 %v4351_v7  ;;  %3461 = vmatprep.subr.bf16.mxu1 %v4352_v38 }
 0x8a5   :  { %3421 = vmatpush1.bf16.msra.mxu0 %v4353_v44  ;;  %3462 = vmatpush1.bf16.msra.mxu1 %v4354_v25 }
 0x8a6   :  { %3422 = vmatprep.subr.bf16.mxu0 %v4355_v1  ;;  %3463 = vmatprep.subr.bf16.mxu1 %v4356_v9 }
 0x8a9   :  { %3423 = vmatpush1.bf16.msra.mxu0 %v4357_v6  ;;  %3464 = vmatpush1.bf16.msra.mxu1 %v4358_v30 }
 0x8aa   :  { %3424 = vmatprep.subr.bf16.mxu0 %v4359_v31  ;;  %3465 = vmatprep.subr.bf16.mxu1 %v4360_v59 }
 0x8ad   :  { %3425 = vmatpush1.bf16.msra.mxu0 %v4361_v61  ;;  %3466 = vmatpush1.bf16.msra.mxu1 %v4362_v26 }
 0x8b0   :  { %3443 = vmatmul.mubr.bf16.vlgmr.msra.gmra.mrb[60].mxu0 %v3140_v23  ;;  %3484 = vmatmul.mubr.bf16.vlgmr.msra.gmra.mrb[60].mxu1 %v3140_v23 }
 0x943   :  { %v3258_v13 = vpop.f32.mrb[56].mxu0  ;;  %v3299_v17 = vpop.f32.mrb[56].mxu1 }
 0x944   :  { %v3306_v28 = vmul.f32 0.5, %v3258_v13  ;;  %v3260_v19 = vpop.f32.mrb[57].mxu0  ;;  %v3301_v43 = vpop.f32.mrb[57].mxu1 }
 0x945   :  { %v3310_v24 = vmul.f32 0.5, %v3260_v19  ;;  %v3262_v52 = vpop.f32.mrb[58].mxu0  ;;  %v3303_v2 = vpop.f32.mrb[58].mxu1  ;;  %v3315_v15 = vmul.f32 0.5, %v3301_v43 }
 0x946   :  { %4161 = vtanh.f32 %v3306_v28  ;;  %v3263_v8 = vpop.f32.mrb[59].mxu0  ;;  %v3304_v27 = vpop.f32.mrb[59].mxu1 }
 0x947   :  { %4163 = vtanh.f32 %v3310_v24 }
 0x948   :  { %4165 = vtanh.f32 %v3299_v17 }
 0x949   :  { %4167 = vtanh.f32 %v3315_v15 }
 0x950   :  { %v4162_v57 = vpop.eup %4161 }
 0x951   :  { %v4164_v29 = vpop.eup %4163  ;;  %v3308_v46 = vmul.f32 0.5, %v4162_v57 }
 0x952   :  { %v3312_v63 = vmul.f32 0.5, %v4164_v29  ;;  %v4166_v14 = vpop.eup %4165 }
 0x953   :  { %v3309_v18 = vadd.f32 0.5, %v3308_v46  ;;  %v4168_v34 = vpop.eup %4167 }
 0x954   :  { %v3313_v22 = vadd.f32 0.5, %v3312_v63  ;;  %v3317_v20 = vmul.f32 0.5, %v4168_v34 }
 0x955   :  { %v3320_v10 = vmul.f32 %v4166_v14, %v3309_v18 }
 0x956   :  { %v3319_v55 = vmul.f32 %v3313_v22, %v6226_v62  ;;  %v3318_v50 = vadd.f32 0.5, %v3317_v20 }
 0x958   :  { %v3321_v36 = vadd.f32 %v3320_v10, %v3319_v55 }
 0x95a   :  { %4169 = vtanh.f32 %v3321_v36  ;;  %v3326_v3 = vsel %vm3324_vm14, %v3321_v36, %v6226_v62 }
 0x95b   :  { %3514 = vst [vmem:[#allocation3] sm:$0xff] %v3326_v3 }
 0x964   :  { %v4170_v47 = vpop.eup %4169 }
 0x965   :  { %v3323_v41 = vmul.f32 %v4170_v47, %v3318_v50 }
 0x967   :  { %v3325_v40 = vsel %vm3324_vm14, %v3323_v41, %v6229_v16 }
 0x968   :  { %3513 = vst [vmem:[#allocation2] sm:$0xff] %v3325_v40 }
 0x983   :  { %v3444_v12 = vpop.f32.mrb[60].mxu0  ;;  %v3485_v42 = vpop.f32.mrb[60].mxu1 }
 0x984   :  { %v3492_v11 = vmul.f32 0.5, %v3444_v12  ;;  %v3446_v49 = vpop.f32.mrb[61].mxu0  ;;  %v3487_v48 = vpop.f32.mrb[61].mxu1 }
 0x985   :  { %v3496_v53 = vmul.f32 0.5, %v3446_v49  ;;  %v3448_v37 = vpop.f32.mrb[62].mxu0  ;;  %v3489_v56 = vpop.f32.mrb[62].mxu1  ;;  %v3501_v35 = vmul.f32 0.5, %v3487_v48 }
 0x986   :  { %4171 = vtanh.f32 %v3492_v11  ;;  %v3449_v5 = vpop.f32.mrb[63].mxu0  ;;  %v3490_v62 = vpop.f32.mrb[63].mxu1 }
 0x987   :  { %4173 = vtanh.f32 %v3496_v53 }
 0x988   :  { %4175 = vtanh.f32 %v3485_v42 }
 0x989   :  { %4177 = vtanh.f32 %v3501_v35 }
 0x990   :  { %v4172_v21 = vpop.eup %4171 }
 0x991   :  { %v4174_v54 = vpop.eup %4173  ;;  %v3494_v39 = vmul.f32 0.5, %v4172_v21 }
 0x992   :  { %v3498_v58 = vmul.f32 0.5, %v4174_v54  ;;  %v4176_v0 = vpop.eup %4175 }
 0x993   :  { %v3495_v16 = vadd.f32 0.5, %v3494_v39  ;;  %v4178_v44 = vpop.eup %4177 }
 0x994   :  { %v3499_v33 = vadd.f32 0.5, %v3498_v58  ;;  %v3503_v25 = vmul.f32 0.5, %v4178_v44 }
 0x995   :  { %v3506_v45 = vmul.f32 %v4176_v0, %v3495_v16 }
 0x996   :  { %v3505_v4 = vmul.f32 %v3499_v33, %v6274_v51  ;;  %v3504_v1 = vadd.f32 0.5, %v3503_v25 }
 0x998   :  { %v3507_v7 = vadd.f32 %v3506_v45, %v3505_v4 }
 0x99a   :  { %4179 = vtanh.f32 %v3507_v7  ;;  %v3512_v38 = vsel %vm3510_vm15, %v3507_v7, %v6274_v51 }
 0x99b   :  { %3516 = vst [vmem:[#allocation3 + $0x8] sm:$0xff] %v3512_v38 }
 0x9a4   :  { %v4180_v9 = vpop.eup %4179 }
 0x9a5   :  { %v3509_v6 = vmul.f32 %v4180_v9, %v3504_v1 }
 0x9a7   :  { %v3511_v30 = vsel %vm3510_vm15, %v3509_v6, %v6291_v32 }
 0x9a8   :  { %3515 = vst [vmem:[#allocation2 + $0x8] sm:$0xff] %v3511_v30 }
 0x9a9 PF:  { %v6750_v31 = vmov 0.0   ;;  %v4363_v59 = vld [vmem:[#allocation14] sm:$0xff]   ;;  %vm4557_vm0 = vmmov 0   ;;  %v4364_v60 = vld [vmem:[#allocation14 + $0x8] sm:$0xff]   ;;  %v4365_v51 = vld [vmem:[#allocation14 + $0x10] sm:$0xff]   ;;  %s4558_s0 = smov [#allocation17]  }
 0x9aa   :  { %3761 = vmatprep.subr.bf16.mxu0 %v6750_v31  ;;  %3777 = vmatprep.mubr.msk.bf16.mxu0 %vm4557_vm0, %v6750_v31  ;;  %v4366_v61 = vld [vmem:[#allocation14 + $0x18] sm:$0xff]   ;;  %v4367_v32 = vld [vmem:[#allocation14 + $0x20] sm:$0xff]   ;;  %v4368_v26 = vld [vmem:[#allocation14 + $0x28] sm:$0xff]   ;;  %s3662_s6 = sshll.u32 %s4558_s0, 4  ;;  %s3663_s6 = int_to_ptr.vmem [resolvable:$true] %s3662_s6 }
 0x9ab   :  { %3762 = vmatpush3.bf16.msra.mxu0 %v4363_v59  ;;  %v4369_v23 = vld [vmem:[#allocation14 + $0x30] sm:$0xff]   ;;  %v4370_v13 = vld [vmem:[#allocation14 + $0x38] sm:$0xff]   ;;  %v3743_v43 = vld [vmem:[#allocation15] ss:$0 sm:$0xff]  ;;  %s4511_s10 = scalar_lea.vmem %s3663_s6, 256  ;;  %p4516_p8 = scmp.lt.s32.totalorder %s3663_s6, %s3663_s6 }
 0x9ac   :  { %3763 = vmatprep.subr.bf16.mxu0 %v6750_v31  ;;  %v3520_v17 = vld [vmem:[#allocation2] sm:$0xff]  ;;  %p4512_p7 = scmp.ne.s32.totalorder %s3663_s6, %s4511_s10  ;;  %p4517_p9 = scmp.lt.s32.totalorder %s4511_s10, %s4511_s10 }
 0x9ae   :  { %p4518_p10 = por %p4517_p9, %p4516_p8 }
 0x9af   :  { %3764 = vmatpush3.bf16.msra.mxu0 %v4364_v60  ;;  %v3521_v28 = vld [vmem:[#allocation2 + $0x8] sm:$0xff] }
 0x9b0   :  { %3765 = vmatprep.subr.bf16.mxu0 %v6750_v31  ;;  %v3522_v19 = vpack.c.bf16 %v3521_v28, %v3520_v17  ;;  %p4519_p11 = pnand %p4518_p10, %p4512_p7 }
 0x9b3   :  { %3766 = vmatpush3.bf16.msra.mxu0 %v4365_v51 }
 0x9b4   :  { %3767 = vmatprep.subr.bf16.mxu0 %v6750_v31 }
 0x9b7   :  { %3768 = vmatpush3.bf16.msra.mxu0 %v4366_v61 }
 0x9b8   :  { %3769 = vmatprep.subr.bf16.mxu0 %v6750_v31 }
 0x9bb   :  { %3770 = vmatpush3.bf16.msra.mxu0 %v4367_v32 }
 0x9bc   :  { %3771 = vmatprep.subr.bf16.mxu0 %v6750_v31 }
 0x9bf   :  { %3772 = vmatpush3.bf16.msra.mxu0 %v4368_v26 }
 0x9c0   :  { %3773 = vmatprep.subr.bf16.mxu0 %v6750_v31 }
 0x9c3   :  { %3774 = vmatpush3.bf16.msra.mxu0 %v4369_v23 }
 0x9c4   :  { %3775 = vmatprep.subr.bf16.mxu0 %v6750_v31 }
 0x9c7   :  { %3776 = vmatpush3.bf16.msra.mxu0 %v4370_v13 }
 0x9ca   :  { %3778 = vmatmul.mubr.bf16.vlgmr.msra.gmra.mrb[0].mxu0 %v3522_v19 }
 0xa9d   :  { %v3628_v24 = vpop.f32.mrb[0].mxu0 }
 0xa9e   :  { %v3629_v52 = vadd.f32 %v3743_v43, %v3628_v24  ;;  %v3779_v2 = vpop.f32.mrb[1].mxu0 }
 0xa9f   :  { %v3631_v8 = vpop.f32.mrb[2].mxu0 }
 0xaa0   :  { %3635 = vmax.xlane.f32.xlu0 %v3629_v52  ;;  %v3780_v27 = vpop.f32.mrb[3].mxu0  ;;  %v3632_v15 = vadd.f32 %v3743_v43, %v3631_v8 }
 0xaa4   :  { %3637 = vmax.xlane.f32.xlu0 %v3632_v15 }
 0xb2d   :  { %v3636_v57 = vpop.xlane.xlu0 %3635 }
 0xb2e   :  { %v3639_v29 = vsub.f32 %v3629_v52, %v3636_v57 }
 0xb30   :  { %v3641_v46 = vmul.f32 1.442695, %v3639_v29 }
 0xb31   :  { %v3638_v63 = vpop.xlane.xlu0 %3637 }
 0xb32   :  { %v3640_v18 = vsub.f32 %v3632_v15, %v3638_v63  ;;  %4371 = vpow2.f32 %v3641_v46 }
 0xb34   :  { %v3643_v14 = vmul.f32 1.442695, %v3640_v18 }
 0xb36   :  { %4373 = vpow2.f32 %v3643_v14 }
 0xb3c   :  { %v4372_v22 = vpop.eup %4371 }
 0xb3d   :  { %3645 = vadd.xlane.f32.xlu1 %v4372_v22 }
 0xb40   :  { %v4374_v10 = vpop.eup %4373 }
 0xb41   :  { %3647 = vadd.xlane.f32.xlu1 %v4374_v10 }
 0xbca   :  { %v3646_v55 = vpop.xlane.xlu1 %3645 }
 0xbcb   :  { %4375 = vlog2.f32 %v3646_v55 }
 0xbce   :  { %v3648_v36 = vpop.xlane.xlu1 %3647 }
 0xbcf   :  { %4377 = vlog2.f32 %v3648_v36 }
 0xbd5   :  { %v4376_v3 = vpop.eup %4375 }
 0xbd6   :  { %v3650_v34 = vmul.f32 0.6931472, %v4376_v3 }
 0xbd8   :  { %v3653_v20 = vsub.f32 %v3639_v29, %v3650_v34 }
 0xbd9   :  { %v4378_v50 = vpop.eup %4377 }
 0xbda   :  { %v3652_v47 = vmul.f32 0.6931472, %v4378_v50  ;;  %3655 = vst [vmem:[#allocation17] sm:$0xff] %v3653_v20 }
 0xbdc   :  { %v3654_v41 = vsub.f32 %v3640_v18, %v3652_v47 }
 0xbde   :  { %3656 = vst [vmem:[#allocation17 + $0x8] sm:$0xff] %v3654_v41 }
 0xbdf   :  { %4522 = shalt.err (!%p4519_p11)
}
 0xbe0   :  { %s4523_s15 = scalar_lea.hbm %s6338_s7, 256 }
 0xbe1   :  { %p4524_p12 = scmp.ne.s32.totalorder %s6338_s7, %s4523_s15  ;;  %p4527_p13 = scmp.lt.u32.totalorder %s4523_s15, %s6338_s7 }
 0xbe3   :  { %p4529_p0 = pnand %p4527_p13, %p4524_p12 }
 0xbe5   :  { %4532 = shalt.err (!%p4529_p0)
}
 0xbe6   :  { %3668 = dma.vmem_to_hbm [thread:$0]  %s3663_s6, 256, %s6338_s7, [#allocation8], %s4544_s11, %s4544_s11, %s4545_s12  }
 0xbe7   :  { %4541 = dma.done.wait [#allocation8], 256  }
 0xbe8   :  { %4542 = vsyncadd [#allocation8], 4294967040 }
 0xbe9   :  { %3672 = vsyncpa [#allocation7], 1 }
 0xbea   :  { %3673 = vsyncpa [#allocation10], 1 }
 0xbeb   :  { %3674 = vsyncpa [#allocation13], 1 }
 0xbec   :  { %3675 = vsyncpa [#allocation16], 1 }
 0xbed   :  { %3676 = vsyncpa [#allocation8], 1 }

</bundles_post_ra>
